<compile_context>
chip_gen: v6e
topology: v6e:2x2x1
jax: 0.10.0
libtpu: 0.0.40
codegen_flags: <defaults>
</compile_context>

<pallas_src>
import functools
import math

import jax
import jax.numpy as jnp
from jax.experimental import pallas as pl
from jax.experimental.pallas import tpu as pltpu


# ----------------------------------------------------------------------------
# In-kernel helpers (pure functions on VMEM-resident values)
# ----------------------------------------------------------------------------

def _layer_norm(x, gamma, beta, eps=1e-5):
    """LayerNorm over the last dim, torch defaults (eps=1e-5, affine). f32 math."""
    mu = jnp.mean(x, axis=-1, keepdims=True)
    var = jnp.mean(jnp.square(x - mu), axis=-1, keepdims=True)
    return (x - mu) * jax.lax.rsqrt(var + eps) * gamma + beta


def _mha(q_in, kv_in, wq, bq, wkv, bkv, wo, bo, ctx_ref, *, num_heads):
    """nn.MultiheadAttention (batch_first, eval) for one batch element.

    q_in: (Sq, D) f32, kv_in: (Skv, D) f32.
    Weights are bf16 (wq: (D,D), wkv: (D,2D) fused K|V, wo: (D,D)), biases f32.
    Per-head context is written into ctx_ref (VMEM scratch, (>=Sq, D) f32).
    """
    Sq, D = q_in.shape
    hd = D // num_heads
    scale = 1.0 / math.sqrt(hd)

    # Projections: bf16 operands, f32 accumulation.
    q16 = q_in.astype(jnp.bfloat16)
    kv16 = kv_in.astype(jnp.bfloat16)
    Q = jnp.dot(q16, wq, preferred_element_type=jnp.float32) + bq        # (Sq, D)
    KV = jnp.dot(kv16, wkv, preferred_element_type=jnp.float32) + bkv    # (Skv, 2D)
    K = KV[:, :D]
    V = KV[:, D:]

    # Per-head scaled softmax(Q K^T) V, head outputs written to scratch columns.
    for h in range(num_heads):
        s = h * hd
        qh = (Q[:, s:s + hd] * scale).astype(jnp.bfloat16)               # (Sq, hd)
        kh_t = K[:, s:s + hd].T.astype(jnp.bfloat16)                     # (hd, Skv)
        vh = V[:, s:s + hd].astype(jnp.bfloat16)                         # (Skv, hd)
        logits = jnp.dot(qh, kh_t, preferred_element_type=jnp.float32)   # (Sq, Skv)
        m = jnp.max(logits, axis=-1, keepdims=True)
        p = jnp.exp(logits - m)
        p = p * pl.reciprocal(jnp.sum(p, axis=-1, keepdims=True), approx=True)
        ctx_ref[0:Sq, s:s + hd] = jnp.dot(
            p.astype(jnp.bfloat16), vh, preferred_element_type=jnp.float32)

    attn = ctx_ref[0:Sq, :].astype(jnp.bfloat16)                         # (Sq, D)
    return jnp.dot(attn, wo, preferred_element_type=jnp.float32) + bo


def _ffn(x, w1, b1, w2, b2):
    """Linear(d, d_ff) -> ReLU -> Linear(d_ff, d); bf16 matmuls, f32 accum."""
    h = jnp.dot(x.astype(jnp.bfloat16), w1, preferred_element_type=jnp.float32) + b1
    h = jnp.maximum(h, 0.0)
    return jnp.dot(h.astype(jnp.bfloat16), w2, preferred_element_type=jnp.float32) + b2


# ----------------------------------------------------------------------------
# Fused CrossAttentionBlock kernel (one batch element per grid step)
# ----------------------------------------------------------------------------

def _cross_attention_block_kernel(
        # data (per batch element)
        images_ref, prompts_ref, orig_prompts_ref, pe_ref,
        # CrossAttention1 (q = prompts, kv = images)
        wq1_ref, bq1_ref, wkv1_ref, bkv1_ref, wo1_ref, bo1_ref,
        # FFN1
        f1w1_ref, f1b1_ref, f1w2_ref, f1b2_ref,
        # LayerNorms of res_connection1 / res_connection2
        ln1g_ref, ln1b_ref, ln2g_ref, ln2b_ref,
        # CrossAttention2 (q = images, kv = prompts_output)
        wq2_ref, bq2_ref, wkv2_ref, bkv2_ref, wo2_ref, bo2_ref,
        # FFN2
        f2w1_ref, f2b1_ref, f2w2_ref, f2b2_ref,
        # LayerNorms of res_connection3 / res_connection4
        ln3g_ref, ln3b_ref, ln4g_ref, ln4b_ref,
        # outputs
        images_out_ref, prompts_out_ref,
        # scratch
        ctx_ref,
        *, num_heads, add_pos):
    images = images_ref[0]            # (S_img, D) f32
    prompts = prompts_ref[0]          # (S_p,  D) f32
    orig_prompts = orig_prompts_ref[0]
    pe = pe_ref[0]

    # ResidualCrossConnection1: prompts = LN1(prompts + MHA1(q=prompts, kv=images))
    a1 = _mha(prompts, images,
              wq1_ref[...], bq1_ref[...], wkv1_ref[...], bkv1_ref[...],
              wo1_ref[...], bo1_ref[...], ctx_ref, num_heads=num_heads)
    prompts = _layer_norm(prompts + a1, ln1g_ref[...], ln1b_ref[...])

    # ResidualConnection2: prompts = LN2(prompts + FFN1(prompts))
    f1 = _ffn(prompts, f1w1_ref[...], f1b1_ref[...], f1w2_ref[...], f1b2_ref[...])
    prompts = _layer_norm(prompts + f1, ln2g_ref[...], ln2b_ref[...])

    # prompts_output = prompts + original_prompts
    prompts_out = prompts + orig_prompts
    prompts_out_ref[0] = prompts_out

    # ResidualCrossConnection3: images = LN3(images + MHA2(q=images, kv=prompts_output))
    a2 = _mha(images, prompts_out,
              wq2_ref[...], bq2_ref[...], wkv2_ref[...], bkv2_ref[...],
              wo2_ref[...], bo2_ref[...], ctx_ref, num_heads=num_heads)
    images = _layer_norm(images + a2, ln3g_ref[...], ln3b_ref[...])

    # ResidualPosConnection4: out = FFN2(images); if add_pos: out += pos; LN4(images + out)
    f2 = _ffn(images, f2w1_ref[...], f2b1_ref[...], f2w2_ref[...], f2b2_ref[...])
    if add_pos:
        f2 = f2 + pe
    images_out_ref[0] = _layer_norm(images + f2, ln4g_ref[...], ln4b_ref[...])


# Order must match the kernel signature above.
_WEIGHT_ORDER = (
    "wq1", "bq1", "wkv1", "bkv1", "wo1", "bo1",
    "f1w1", "f1b1", "f1w2", "f1b2",
    "ln1g", "ln1b", "ln2g", "ln2b",
    "wq2", "bq2", "wkv2", "bkv2", "wo2", "bo2",
    "f2w1", "f2b1", "f2w2", "f2b2",
    "ln3g", "ln3b", "ln4g", "ln4b",
)


def cross_attention_block(images, prompts_input, original_prompts, pos_encodings,
                          params, *, num_heads, add_pos=True):
    """Fused CrossAttentionBlock.forward. Returns (images, prompts_output)."""
    B, S_img, D = images.shape
    _, S_p, _ = prompts_input.shape

    kernel = functools.partial(_cross_attention_block_kernel,
                               num_heads=num_heads, add_pos=add_pos)

    def batch_spec(S):
        return pl.BlockSpec((1, S, D), lambda b: (b, 0, 0))

    def shared_spec(arr):
        return pl.BlockSpec(arr.shape, lambda b: (0, 0))

    weights = [params[name] for name in _WEIGHT_ORDER]
    weight_specs = [shared_spec(w) for w in weights]

    out_shape = (jax.ShapeDtypeStruct((B, S_img, D), jnp.float32),
                 jax.ShapeDtypeStruct((B, S_p, D), jnp.float32))
    out_specs = (batch_spec(S_img), batch_spec(S_p))

    return pl.pallas_call(
        kernel,
        out_shape=out_shape,
        grid=(B,),
        in_specs=[batch_spec(S_img),    # images
                  batch_spec(S_p),      # prompts_input
                  batch_spec(S_p),      # original_prompts
                  batch_spec(S_img)]    # pos_encodings
                 + weight_specs,
        out_specs=out_specs,
        scratch_shapes=[pltpu.VMEM((max(S_img, S_p), D), jnp.float32)],
        compiler_params=pltpu.CompilerParams(
            dimension_semantics=("parallel",)),   # B=2 shards over v7x's 2 TCs
    )(images, prompts_input, original_prompts, pos_encodings, *weights)


# ----------------------------------------------------------------------------
# Parameter init (deterministic, synthetic; weights bf16, biases / LN f32)
# ----------------------------------------------------------------------------

def init_params(key, *, d_model, d_ff):
    keys = jax.random.split(key, 10)

    def w(k, din, dout):
        return (jax.random.normal(k, (din, dout), jnp.float32) * 0.02).astype(jnp.bfloat16)

    def b(dout):
        return jnp.zeros((1, dout), jnp.float32)

    def ln():
        return jnp.ones((1, d_model), jnp.float32), jnp.zeros((1, d_model), jnp.float32)

    p = {}
    p["wq1"], p["bq1"] = w(keys[0], d_model, d_model), b(d_model)
    p["wkv1"], p["bkv1"] = w(keys[1], d_model, 2 * d_model), b(2 * d_model)
    p["wo1"], p["bo1"] = w(keys[2], d_model, d_model), b(d_model)
    p["f1w1"], p["f1b1"] = w(keys[3], d_model, d_ff), b(d_ff)
    p["f1w2"], p["f1b2"] = w(keys[4], d_ff, d_model), b(d_model)
    p["ln1g"], p["ln1b"] = ln()
    p["ln2g"], p["ln2b"] = ln()
    p["wq2"], p["bq2"] = w(keys[5], d_model, d_model), b(d_model)
    p["wkv2"], p["bkv2"] = w(keys[6], d_model, 2 * d_model), b(2 * d_model)
    p["wo2"], p["bo2"] = w(keys[7], d_model, d_model), b(d_model)
    p["f2w1"], p["f2b1"] = w(keys[8], d_model, d_ff), b(d_ff)
    p["f2w2"], p["f2b2"] = w(keys[9], d_ff, d_model), b(d_model)
    p["ln3g"], p["ln3b"] = ln()
    p["ln4g"], p["ln4b"] = ln()
    return p


# ----------------------------------------------------------------------------
# Main
# ----------------------------------------------------------------------------

if __name__ == "__main__":
    B = 2
    D_MODEL, NUM_HEADS, D_FF = 128, 4, 256      # lane-dense feature width
    H = W = 8
    S_IMG = H * W                               # 64 image tokens
    N_PROMPTS = 8

    key = jax.random.PRNGKey(0)
    k_par, k_img, k_pr, k_opr, k_pe = jax.random.split(key, 5)

    params = init_params(k_par, d_model=D_MODEL, d_ff=D_FF)

    images = jax.random.normal(k_img, (B, S_IMG, D_MODEL), jnp.float32)
    prompts_input = jax.random.normal(k_pr, (B, N_PROMPTS, D_MODEL), jnp.float32)
    original_prompts = jax.random.normal(k_opr, (B, N_PROMPTS, D_MODEL), jnp.float32)
    pos_encodings = jax.random.normal(k_pe, (B, S_IMG, D_MODEL), jnp.float32)

    fwd = jax.jit(functools.partial(cross_attention_block,
                                    num_heads=NUM_HEADS, add_pos=True))
    images_out, prompts_out = fwd(images, prompts_input, original_prompts,
                                  pos_encodings, params)

    jax.block_until_ready((images_out, prompts_out))
    assert images_out.shape == (B, S_IMG, D_MODEL)
    assert prompts_out.shape == (B, N_PROMPTS, D_MODEL)
    assert bool(jnp.all(jnp.isfinite(images_out)))
    assert bool(jnp.all(jnp.isfinite(prompts_out)))
    print("KERNEL_OK")
</pallas_src>

<mosaic_0001>
module attributes {stable_mosaic.version = 11 : i64} {
  func.func @_cross_attention_block_kernel(%arg0: i32, %arg1: memref<1x64x128xf32, #tpu.memory_space<vmem>>, %arg2: memref<1x8x128xf32, #tpu.memory_space<vmem>>, %arg3: memref<1x8x128xf32, #tpu.memory_space<vmem>>, %arg4: memref<1x64x128xf32, #tpu.memory_space<vmem>>, %arg5: memref<128x128xbf16, #tpu.memory_space<vmem>>, %arg6: memref<1x128xf32, #tpu.memory_space<vmem>>, %arg7: memref<128x256xbf16, #tpu.memory_space<vmem>>, %arg8: memref<1x256xf32, #tpu.memory_space<vmem>>, %arg9: memref<128x128xbf16, #tpu.memory_space<vmem>>, %arg10: memref<1x128xf32, #tpu.memory_space<vmem>>, %arg11: memref<128x256xbf16, #tpu.memory_space<vmem>>, %arg12: memref<1x256xf32, #tpu.memory_space<vmem>>, %arg13: memref<256x128xbf16, #tpu.memory_space<vmem>>, %arg14: memref<1x128xf32, #tpu.memory_space<vmem>>, %arg15: memref<1x128xf32, #tpu.memory_space<vmem>>, %arg16: memref<1x128xf32, #tpu.memory_space<vmem>>, %arg17: memref<1x128xf32, #tpu.memory_space<vmem>>, %arg18: memref<1x128xf32, #tpu.memory_space<vmem>>, %arg19: memref<128x128xbf16, #tpu.memory_space<vmem>>, %arg20: memref<1x128xf32, #tpu.memory_space<vmem>>, %arg21: memref<128x256xbf16, #tpu.memory_space<vmem>>, %arg22: memref<1x256xf32, #tpu.memory_space<vmem>>, %arg23: memref<128x128xbf16, #tpu.memory_space<vmem>>, %arg24: memref<1x128xf32, #tpu.memory_space<vmem>>, %arg25: memref<128x256xbf16, #tpu.memory_space<vmem>>, %arg26: memref<1x256xf32, #tpu.memory_space<vmem>>, %arg27: memref<256x128xbf16, #tpu.memory_space<vmem>>, %arg28: memref<1x128xf32, #tpu.memory_space<vmem>>, %arg29: memref<1x128xf32, #tpu.memory_space<vmem>>, %arg30: memref<1x128xf32, #tpu.memory_space<vmem>>, %arg31: memref<1x128xf32, #tpu.memory_space<vmem>>, %arg32: memref<1x128xf32, #tpu.memory_space<vmem>>, %arg33: memref<1x64x128xf32, #tpu.memory_space<vmem>>, %arg34: memref<1x8x128xf32, #tpu.memory_space<vmem>>, %arg35: memref<64x128xf32, #tpu.memory_space<vmem>>) attributes {dimension_semantics = [#tpu.dimension_semantics<parallel>], iteration_bounds = array<i64: 2>, scalar_prefetch = 0 : i64, scratch_operands = 1 : i64, tpu.core_type = #tpu.core_type<tc>, window_params = [{transform_indices = @transform_0, window_bounds = array<i64: 1, 64, 128>}, {transform_indices = @transform_1, window_bounds = array<i64: 1, 8, 128>}, {transform_indices = @transform_2, window_bounds = array<i64: 1, 8, 128>}, {transform_indices = @transform_3, window_bounds = array<i64: 1, 64, 128>}, {pipeline_mode = #tpu.pipeline_mode<synchronous>, transform_indices = @transform_4, window_bounds = array<i64: 128, 128>}, {pipeline_mode = #tpu.pipeline_mode<synchronous>, transform_indices = @transform_5, window_bounds = array<i64: 1, 128>}, {pipeline_mode = #tpu.pipeline_mode<synchronous>, transform_indices = @transform_6, window_bounds = array<i64: 128, 256>}, {pipeline_mode = #tpu.pipeline_mode<synchronous>, transform_indices = @transform_7, window_bounds = array<i64: 1, 256>}, {pipeline_mode = #tpu.pipeline_mode<synchronous>, transform_indices = @transform_8, window_bounds = array<i64: 128, 128>}, {pipeline_mode = #tpu.pipeline_mode<synchronous>, transform_indices = @transform_9, window_bounds = array<i64: 1, 128>}, {pipeline_mode = #tpu.pipeline_mode<synchronous>, transform_indices = @transform_10, window_bounds = array<i64: 128, 256>}, {pipeline_mode = #tpu.pipeline_mode<synchronous>, transform_indices = @transform_11, window_bounds = array<i64: 1, 256>}, {pipeline_mode = #tpu.pipeline_mode<synchronous>, transform_indices = @transform_12, window_bounds = array<i64: 256, 128>}, {pipeline_mode = #tpu.pipeline_mode<synchronous>, transform_indices = @transform_13, window_bounds = array<i64: 1, 128>}, {pipeline_mode = #tpu.pipeline_mode<synchronous>, transform_indices = @transform_14, window_bounds = array<i64: 1, 128>}, {pipeline_mode = #tpu.pipeline_mode<synchronous>, transform_indices = @transform_15, window_bounds = array<i64: 1, 128>}, {pipeline_mode = #tpu.pipeline_mode<synchronous>, transform_indices = @transform_16, window_bounds = array<i64: 1, 128>}, {pipeline_mode = #tpu.pipeline_mode<synchronous>, transform_indices = @transform_17, window_bounds = array<i64: 1, 128>}, {pipeline_mode = #tpu.pipeline_mode<synchronous>, transform_indices = @transform_18, window_bounds = array<i64: 128, 128>}, {pipeline_mode = #tpu.pipeline_mode<synchronous>, transform_indices = @transform_19, window_bounds = array<i64: 1, 128>}, {pipeline_mode = #tpu.pipeline_mode<synchronous>, transform_indices = @transform_20, window_bounds = array<i64: 128, 256>}, {pipeline_mode = #tpu.pipeline_mode<synchronous>, transform_indices = @transform_21, window_bounds = array<i64: 1, 256>}, {pipeline_mode = #tpu.pipeline_mode<synchronous>, transform_indices = @transform_22, window_bounds = array<i64: 128, 128>}, {pipeline_mode = #tpu.pipeline_mode<synchronous>, transform_indices = @transform_23, window_bounds = array<i64: 1, 128>}, {pipeline_mode = #tpu.pipeline_mode<synchronous>, transform_indices = @transform_24, window_bounds = array<i64: 128, 256>}, {pipeline_mode = #tpu.pipeline_mode<synchronous>, transform_indices = @transform_25, window_bounds = array<i64: 1, 256>}, {pipeline_mode = #tpu.pipeline_mode<synchronous>, transform_indices = @transform_26, window_bounds = array<i64: 256, 128>}, {pipeline_mode = #tpu.pipeline_mode<synchronous>, transform_indices = @transform_27, window_bounds = array<i64: 1, 128>}, {pipeline_mode = #tpu.pipeline_mode<synchronous>, transform_indices = @transform_28, window_bounds = array<i64: 1, 128>}, {pipeline_mode = #tpu.pipeline_mode<synchronous>, transform_indices = @transform_29, window_bounds = array<i64: 1, 128>}, {pipeline_mode = #tpu.pipeline_mode<synchronous>, transform_indices = @transform_30, window_bounds = array<i64: 1, 128>}, {pipeline_mode = #tpu.pipeline_mode<synchronous>, transform_indices = @transform_31, window_bounds = array<i64: 1, 128>}, {transform_indices = @transform_32, window_bounds = array<i64: 1, 64, 128>}, {transform_indices = @transform_33, window_bounds = array<i64: 1, 8, 128>}]} {
    %c0 = arith.constant 0 : index
    %c0_0 = arith.constant 0 : index
    %c0_1 = arith.constant 0 : index
    %0 = vector.load %arg1[%c0, %c0_0, %c0_1] : memref<1x64x128xf32, #tpu.memory_space<vmem>>, vector<1x64x128xf32>
    %1 = vector.shape_cast %0 : vector<1x64x128xf32> to vector<64x128xf32>
    %c0_2 = arith.constant 0 : index
    %c0_3 = arith.constant 0 : index
    %c0_4 = arith.constant 0 : index
    %2 = vector.load %arg2[%c0_2, %c0_3, %c0_4] : memref<1x8x128xf32, #tpu.memory_space<vmem>>, vector<1x8x128xf32>
    %3 = vector.shape_cast %2 : vector<1x8x128xf32> to vector<8x128xf32>
    %c0_5 = arith.constant 0 : index
    %c0_6 = arith.constant 0 : index
    %c0_7 = arith.constant 0 : index
    %4 = vector.load %arg3[%c0_5, %c0_6, %c0_7] : memref<1x8x128xf32, #tpu.memory_space<vmem>>, vector<1x8x128xf32>
    %5 = vector.shape_cast %4 : vector<1x8x128xf32> to vector<8x128xf32>
    %c0_8 = arith.constant 0 : index
    %c0_9 = arith.constant 0 : index
    %c0_10 = arith.constant 0 : index
    %6 = vector.load %arg4[%c0_8, %c0_9, %c0_10] : memref<1x64x128xf32, #tpu.memory_space<vmem>>, vector<1x64x128xf32>
    %7 = vector.shape_cast %6 : vector<1x64x128xf32> to vector<64x128xf32>
    %c0_11 = arith.constant 0 : index
    %c0_12 = arith.constant 0 : index
    %8 = vector.load %arg5[%c0_11, %c0_12] : memref<128x128xbf16, #tpu.memory_space<vmem>>, vector<128x128xbf16>
    %c0_13 = arith.constant 0 : index
    %c0_14 = arith.constant 0 : index
    %9 = vector.load %arg6[%c0_13, %c0_14] : memref<1x128xf32, #tpu.memory_space<vmem>>, vector<1x128xf32>
    %c0_15 = arith.constant 0 : index
    %c0_16 = arith.constant 0 : index
    %10 = vector.load %arg7[%c0_15, %c0_16] : memref<128x256xbf16, #tpu.memory_space<vmem>>, vector<128x256xbf16>
    %c0_17 = arith.constant 0 : index
    %c0_18 = arith.constant 0 : index
    %11 = vector.load %arg8[%c0_17, %c0_18] : memref<1x256xf32, #tpu.memory_space<vmem>>, vector<1x256xf32>
    %c0_19 = arith.constant 0 : index
    %c0_20 = arith.constant 0 : index
    %12 = vector.load %arg9[%c0_19, %c0_20] : memref<128x128xbf16, #tpu.memory_space<vmem>>, vector<128x128xbf16>
    %c0_21 = arith.constant 0 : index
    %c0_22 = arith.constant 0 : index
    %13 = vector.load %arg10[%c0_21, %c0_22] : memref<1x128xf32, #tpu.memory_space<vmem>>, vector<1x128xf32>
    %14 = arith.truncf %3 : vector<8x128xf32> to vector<8x128xbf16>
    %15 = arith.truncf %1 : vector<64x128xf32> to vector<64x128xbf16>
    %cst = arith.constant dense<0.000000e+00> : vector<8x128xf32>
    %16 = tpu.matmul %14, %8, %cst {dimension_numbers = #tpu.dot_dimension_numbers<[1], [0], [0], [1], [0, 0, 1, 1], [], []>} : vector<8x128xbf16>, vector<128x128xbf16>, vector<8x128xf32> -> vector<8x128xf32>
    %17 = vector.broadcast %9 : vector<1x128xf32> to vector<8x128xf32>
    %18 = arith.addf %16, %17 : vector<8x128xf32>
    %cst_23 = arith.constant dense<0.000000e+00> : vector<64x256xf32>
    %19 = tpu.matmul %15, %10, %cst_23 {dimension_numbers = #tpu.dot_dimension_numbers<[1], [0], [0], [1], [0, 0, 1, 1], [], []>} : vector<64x128xbf16>, vector<128x256xbf16>, vector<64x256xf32> -> vector<64x256xf32>
    %20 = vector.broadcast %11 : vector<1x256xf32> to vector<64x256xf32>
    %21 = arith.addf %19, %20 : vector<64x256xf32>
    %22 = vector.extract_strided_slice %21 {offsets = [0, 0], sizes = [64, 128], strides = [1, 1]} : vector<64x256xf32> to vector<64x128xf32>
    %23 = vector.extract_strided_slice %21 {offsets = [0, 128], sizes = [64, 128], strides = [1, 1]} : vector<64x256xf32> to vector<64x128xf32>
    %24 = vector.extract_strided_slice %18 {offsets = [0, 0], sizes = [8, 32], strides = [1, 1]} : vector<8x128xf32> to vector<8x32xf32>
    %cst_24 = arith.constant 0.176776692 : f32
    %25 = vector.broadcast %cst_24 : f32 to vector<8x32xf32>
    %26 = arith.mulf %24, %25 : vector<8x32xf32>
    %27 = arith.truncf %26 : vector<8x32xf32> to vector<8x32xbf16>
    %28 = vector.extract_strided_slice %22 {offsets = [0, 0], sizes = [64, 32], strides = [1, 1]} : vector<64x128xf32> to vector<64x32xf32>
    %29 = tpu.transpose %28, [1, 0] : vector<64x32xf32> -> vector<32x64xf32>
    %30 = arith.truncf %29 : vector<32x64xf32> to vector<32x64xbf16>
    %31 = vector.extract_strided_slice %23 {offsets = [0, 0], sizes = [64, 32], strides = [1, 1]} : vector<64x128xf32> to vector<64x32xf32>
    %32 = arith.truncf %31 : vector<64x32xf32> to vector<64x32xbf16>
    %cst_25 = arith.constant dense<0.000000e+00> : vector<8x64xf32>
    %33 = tpu.matmul %27, %30, %cst_25 {dimension_numbers = #tpu.dot_dimension_numbers<[1], [0], [0], [1], [0, 0, 1, 1], [], []>} : vector<8x32xbf16>, vector<32x64xbf16>, vector<8x64xf32> -> vector<8x64xf32>
    %cst_26 = arith.constant dense<0xFF800000> : vector<8xf32>
    %34 = vector.multi_reduction <maximumf>, %33, %cst_26 [1] : vector<8x64xf32> to vector<8xf32>
    %35 = vector.shape_cast %34 : vector<8xf32> to vector<8x1xf32>
    %36 = vector.broadcast %35 : vector<8x1xf32> to vector<8x64xf32>
    %37 = arith.subf %33, %36 : vector<8x64xf32>
    %38 = math.exp %37 : vector<8x64xf32>
    %cst_27 = arith.constant dense<0.000000e+00> : vector<8xf32>
    %39 = vector.multi_reduction <add>, %38, %cst_27 [1] : vector<8x64xf32> to vector<8xf32>
    %40 = vector.shape_cast %39 : vector<8xf32> to vector<8x1xf32>
    %41 = tpu.reciprocal %40 {approx = true} : vector<8x1xf32> -> vector<8x1xf32>
    %42 = vector.broadcast %41 : vector<8x1xf32> to vector<8x64xf32>
    %43 = arith.mulf %38, %42 : vector<8x64xf32>
    %44 = arith.truncf %43 : vector<8x64xf32> to vector<8x64xbf16>
    %cst_28 = arith.constant dense<0.000000e+00> : vector<8x32xf32>
    %45 = tpu.matmul %44, %32, %cst_28 {dimension_numbers = #tpu.dot_dimension_numbers<[1], [0], [0], [1], [0, 0, 1, 1], [], []>} : vector<8x64xbf16>, vector<64x32xbf16>, vector<8x32xf32> -> vector<8x32xf32>
    %c0_29 = arith.constant 0 : index
    %c0_30 = arith.constant 0 : index
    %46 = vector.load %arg35[%c0_29, %c0_30] : memref<64x128xf32, #tpu.memory_space<vmem>>, vector<8x32xf32>
    tpu.vector_store %arg35[%c0_29, %c0_30], %45 {strides = array<i32>} : memref<64x128xf32, #tpu.memory_space<vmem>>, vector<8x32xf32>,
    %47 = vector.extract_strided_slice %18 {offsets = [0, 32], sizes = [8, 32], strides = [1, 1]} : vector<8x128xf32> to vector<8x32xf32>
    %cst_31 = arith.constant 0.176776692 : f32
    %48 = vector.broadcast %cst_31 : f32 to vector<8x32xf32>
    %49 = arith.mulf %47, %48 : vector<8x32xf32>
    %50 = arith.truncf %49 : vector<8x32xf32> to vector<8x32xbf16>
    %51 = vector.extract_strided_slice %22 {offsets = [0, 32], sizes = [64, 32], strides = [1, 1]} : vector<64x128xf32> to vector<64x32xf32>
    %52 = tpu.transpose %51, [1, 0] : vector<64x32xf32> -> vector<32x64xf32>
    %53 = arith.truncf %52 : vector<32x64xf32> to vector<32x64xbf16>
    %54 = vector.extract_strided_slice %23 {offsets = [0, 32], sizes = [64, 32], strides = [1, 1]} : vector<64x128xf32> to vector<64x32xf32>
    %55 = arith.truncf %54 : vector<64x32xf32> to vector<64x32xbf16>
    %cst_32 = arith.constant dense<0.000000e+00> : vector<8x64xf32>
    %56 = tpu.matmul %50, %53, %cst_32 {dimension_numbers = #tpu.dot_dimension_numbers<[1], [0], [0], [1], [0, 0, 1, 1], [], []>} : vector<8x32xbf16>, vector<32x64xbf16>, vector<8x64xf32> -> vector<8x64xf32>
    %cst_33 = arith.constant dense<0xFF800000> : vector<8xf32>
    %57 = vector.multi_reduction <maximumf>, %56, %cst_33 [1] : vector<8x64xf32> to vector<8xf32>
    %58 = vector.shape_cast %57 : vector<8xf32> to vector<8x1xf32>
    %59 = vector.broadcast %58 : vector<8x1xf32> to vector<8x64xf32>
    %60 = arith.subf %56, %59 : vector<8x64xf32>
    %61 = math.exp %60 : vector<8x64xf32>
    %cst_34 = arith.constant dense<0.000000e+00> : vector<8xf32>
    %62 = vector.multi_reduction <add>, %61, %cst_34 [1] : vector<8x64xf32> to vector<8xf32>
    %63 = vector.shape_cast %62 : vector<8xf32> to vector<8x1xf32>
    %64 = tpu.reciprocal %63 {approx = true} : vector<8x1xf32> -> vector<8x1xf32>
    %65 = vector.broadcast %64 : vector<8x1xf32> to vector<8x64xf32>
    %66 = arith.mulf %61, %65 : vector<8x64xf32>
    %67 = arith.truncf %66 : vector<8x64xf32> to vector<8x64xbf16>
    %cst_35 = arith.constant dense<0.000000e+00> : vector<8x32xf32>
    %68 = tpu.matmul %67, %55, %cst_35 {dimension_numbers = #tpu.dot_dimension_numbers<[1], [0], [0], [1], [0, 0, 1, 1], [], []>} : vector<8x64xbf16>, vector<64x32xbf16>, vector<8x32xf32> -> vector<8x32xf32>
    %c0_36 = arith.constant 0 : index
    %c32 = arith.constant 32 : index
    %69 = vector.load %arg35[%c0_36, %c32] : memref<64x128xf32, #tpu.memory_space<vmem>>, vector<8x32xf32>
    tpu.vector_store %arg35[%c0_36, %c32], %68 {strides = array<i32>} : memref<64x128xf32, #tpu.memory_space<vmem>>, vector<8x32xf32>,
    %70 = vector.extract_strided_slice %18 {offsets = [0, 64], sizes = [8, 32], strides = [1, 1]} : vector<8x128xf32> to vector<8x32xf32>
    %cst_37 = arith.constant 0.176776692 : f32
    %71 = vector.broadcast %cst_37 : f32 to vector<8x32xf32>
    %72 = arith.mulf %70, %71 : vector<8x32xf32>
    %73 = arith.truncf %72 : vector<8x32xf32> to vector<8x32xbf16>
    %74 = vector.extract_strided_slice %22 {offsets = [0, 64], sizes = [64, 32], strides = [1, 1]} : vector<64x128xf32> to vector<64x32xf32>
    %75 = tpu.transpose %74, [1, 0] : vector<64x32xf32> -> vector<32x64xf32>
    %76 = arith.truncf %75 : vector<32x64xf32> to vector<32x64xbf16>
    %77 = vector.extract_strided_slice %23 {offsets = [0, 64], sizes = [64, 32], strides = [1, 1]} : vector<64x128xf32> to vector<64x32xf32>
    %78 = arith.truncf %77 : vector<64x32xf32> to vector<64x32xbf16>
    %cst_38 = arith.constant dense<0.000000e+00> : vector<8x64xf32>
    %79 = tpu.matmul %73, %76, %cst_38 {dimension_numbers = #tpu.dot_dimension_numbers<[1], [0], [0], [1], [0, 0, 1, 1], [], []>} : vector<8x32xbf16>, vector<32x64xbf16>, vector<8x64xf32> -> vector<8x64xf32>
    %cst_39 = arith.constant dense<0xFF800000> : vector<8xf32>
    %80 = vector.multi_reduction <maximumf>, %79, %cst_39 [1] : vector<8x64xf32> to vector<8xf32>
    %81 = vector.shape_cast %80 : vector<8xf32> to vector<8x1xf32>
    %82 = vector.broadcast %81 : vector<8x1xf32> to vector<8x64xf32>
    %83 = arith.subf %79, %82 : vector<8x64xf32>
    %84 = math.exp %83 : vector<8x64xf32>
    %cst_40 = arith.constant dense<0.000000e+00> : vector<8xf32>
    %85 = vector.multi_reduction <add>, %84, %cst_40 [1] : vector<8x64xf32> to vector<8xf32>
    %86 = vector.shape_cast %85 : vector<8xf32> to vector<8x1xf32>
    %87 = tpu.reciprocal %86 {approx = true} : vector<8x1xf32> -> vector<8x1xf32>
    %88 = vector.broadcast %87 : vector<8x1xf32> to vector<8x64xf32>
    %89 = arith.mulf %84, %88 : vector<8x64xf32>
    %90 = arith.truncf %89 : vector<8x64xf32> to vector<8x64xbf16>
    %cst_41 = arith.constant dense<0.000000e+00> : vector<8x32xf32>
    %91 = tpu.matmul %90, %78, %cst_41 {dimension_numbers = #tpu.dot_dimension_numbers<[1], [0], [0], [1], [0, 0, 1, 1], [], []>} : vector<8x64xbf16>, vector<64x32xbf16>, vector<8x32xf32> -> vector<8x32xf32>
    %c0_42 = arith.constant 0 : index
    %c64 = arith.constant 64 : index
    %92 = vector.load %arg35[%c0_42, %c64] : memref<64x128xf32, #tpu.memory_space<vmem>>, vector<8x32xf32>
    tpu.vector_store %arg35[%c0_42, %c64], %91 {strides = array<i32>} : memref<64x128xf32, #tpu.memory_space<vmem>>, vector<8x32xf32>,
    %93 = vector.extract_strided_slice %18 {offsets = [0, 96], sizes = [8, 32], strides = [1, 1]} : vector<8x128xf32> to vector<8x32xf32>
    %cst_43 = arith.constant 0.176776692 : f32
    %94 = vector.broadcast %cst_43 : f32 to vector<8x32xf32>
    %95 = arith.mulf %93, %94 : vector<8x32xf32>
    %96 = arith.truncf %95 : vector<8x32xf32> to vector<8x32xbf16>
    %97 = vector.extract_strided_slice %22 {offsets = [0, 96], sizes = [64, 32], strides = [1, 1]} : vector<64x128xf32> to vector<64x32xf32>
    %98 = tpu.transpose %97, [1, 0] : vector<64x32xf32> -> vector<32x64xf32>
    %99 = arith.truncf %98 : vector<32x64xf32> to vector<32x64xbf16>
    %100 = vector.extract_strided_slice %23 {offsets = [0, 96], sizes = [64, 32], strides = [1, 1]} : vector<64x128xf32> to vector<64x32xf32>
    %101 = arith.truncf %100 : vector<64x32xf32> to vector<64x32xbf16>
    %cst_44 = arith.constant dense<0.000000e+00> : vector<8x64xf32>
    %102 = tpu.matmul %96, %99, %cst_44 {dimension_numbers = #tpu.dot_dimension_numbers<[1], [0], [0], [1], [0, 0, 1, 1], [], []>} : vector<8x32xbf16>, vector<32x64xbf16>, vector<8x64xf32> -> vector<8x64xf32>
    %cst_45 = arith.constant dense<0xFF800000> : vector<8xf32>
    %103 = vector.multi_reduction <maximumf>, %102, %cst_45 [1] : vector<8x64xf32> to vector<8xf32>
    %104 = vector.shape_cast %103 : vector<8xf32> to vector<8x1xf32>
    %105 = vector.broadcast %104 : vector<8x1xf32> to vector<8x64xf32>
    %106 = arith.subf %102, %105 : vector<8x64xf32>
    %107 = math.exp %106 : vector<8x64xf32>
    %cst_46 = arith.constant dense<0.000000e+00> : vector<8xf32>
    %108 = vector.multi_reduction <add>, %107, %cst_46 [1] : vector<8x64xf32> to vector<8xf32>
    %109 = vector.shape_cast %108 : vector<8xf32> to vector<8x1xf32>
    %110 = tpu.reciprocal %109 {approx = true} : vector<8x1xf32> -> vector<8x1xf32>
    %111 = vector.broadcast %110 : vector<8x1xf32> to vector<8x64xf32>
    %112 = arith.mulf %107, %111 : vector<8x64xf32>
    %113 = arith.truncf %112 : vector<8x64xf32> to vector<8x64xbf16>
    %cst_47 = arith.constant dense<0.000000e+00> : vector<8x32xf32>
    %114 = tpu.matmul %113, %101, %cst_47 {dimension_numbers = #tpu.dot_dimension_numbers<[1], [0], [0], [1], [0, 0, 1, 1], [], []>} : vector<8x64xbf16>, vector<64x32xbf16>, vector<8x32xf32> -> vector<8x32xf32>
    %c0_48 = arith.constant 0 : index
    %c96 = arith.constant 96 : index
    %115 = vector.load %arg35[%c0_48, %c96] : memref<64x128xf32, #tpu.memory_space<vmem>>, vector<8x32xf32>
    tpu.vector_store %arg35[%c0_48, %c96], %114 {strides = array<i32>} : memref<64x128xf32, #tpu.memory_space<vmem>>, vector<8x32xf32>,
    %c0_49 = arith.constant 0 : index
    %c0_50 = arith.constant 0 : index
    %116 = vector.load %arg35[%c0_49, %c0_50] : memref<64x128xf32, #tpu.memory_space<vmem>>, vector<8x128xf32>
    %117 = arith.truncf %116 : vector<8x128xf32> to vector<8x128xbf16>
    %cst_51 = arith.constant dense<0.000000e+00> : vector<8x128xf32>
    %118 = tpu.matmul %117, %12, %cst_51 {dimension_numbers = #tpu.dot_dimension_numbers<[1], [0], [0], [1], [0, 0, 1, 1], [], []>} : vector<8x128xbf16>, vector<128x128xbf16>, vector<8x128xf32> -> vector<8x128xf32>
    %119 = vector.broadcast %13 : vector<1x128xf32> to vector<8x128xf32>
    %120 = arith.addf %118, %119 : vector<8x128xf32>
    %121 = arith.addf %3, %120 : vector<8x128xf32>
    %c0_52 = arith.constant 0 : index
    %c0_53 = arith.constant 0 : index
    %122 = vector.load %arg15[%c0_52, %c0_53] : memref<1x128xf32, #tpu.memory_space<vmem>>, vector<1x128xf32>
    %c0_54 = arith.constant 0 : index
    %c0_55 = arith.constant 0 : index
    %123 = vector.load %arg16[%c0_54, %c0_55] : memref<1x128xf32, #tpu.memory_space<vmem>>, vector<1x128xf32>
    %cst_56 = arith.constant dense<0.000000e+00> : vector<8xf32>
    %124 = vector.multi_reduction <add>, %121, %cst_56 [1] : vector<8x128xf32> to vector<8xf32>
    %125 = vector.shape_cast %124 : vector<8xf32> to vector<8x1xf32>
    %cst_57 = arith.constant 1.280000e+02 : f32
    %126 = vector.broadcast %cst_57 : f32 to vector<8x1xf32>
    %127 = arith.divf %125, %126 : vector<8x1xf32>
    %128 = vector.broadcast %127 : vector<8x1xf32> to vector<8x128xf32>
    %129 = arith.subf %121, %128 : vector<8x128xf32>
    %130 = arith.mulf %129, %129 : vector<8x128xf32>
    %cst_58 = arith.constant dense<0.000000e+00> : vector<8xf32>
    %131 = vector.multi_reduction <add>, %130, %cst_58 [1] : vector<8x128xf32> to vector<8xf32>
    %132 = vector.shape_cast %131 : vector<8xf32> to vector<8x1xf32>
    %cst_59 = arith.constant 1.280000e+02 : f32
    %133 = vector.broadcast %cst_59 : f32 to vector<8x1xf32>
    %134 = arith.divf %132, %133 : vector<8x1xf32>
    %135 = vector.broadcast %127 : vector<8x1xf32> to vector<8x128xf32>
    %136 = arith.subf %121, %135 : vector<8x128xf32>
    %cst_60 = arith.constant 9.99999974E-6 : f32
    %137 = vector.broadcast %cst_60 : f32 to vector<8x1xf32>
    %138 = arith.addf %134, %137 : vector<8x1xf32>
    %139 = math.rsqrt %138 : vector<8x1xf32>
    %140 = vector.broadcast %139 : vector<8x1xf32> to vector<8x128xf32>
    %141 = arith.mulf %136, %140 : vector<8x128xf32>
    %142 = vector.broadcast %122 : vector<1x128xf32> to vector<8x128xf32>
    %143 = arith.mulf %141, %142 : vector<8x128xf32>
    %144 = vector.broadcast %123 : vector<1x128xf32> to vector<8x128xf32>
    %145 = arith.addf %143, %144 : vector<8x128xf32>
    %c0_61 = arith.constant 0 : index
    %c0_62 = arith.constant 0 : index
    %146 = vector.load %arg11[%c0_61, %c0_62] : memref<128x256xbf16, #tpu.memory_space<vmem>>, vector<128x256xbf16>
    %c0_63 = arith.constant 0 : index
    %c0_64 = arith.constant 0 : index
    %147 = vector.load %arg12[%c0_63, %c0_64] : memref<1x256xf32, #tpu.memory_space<vmem>>, vector<1x256xf32>
    %c0_65 = arith.constant 0 : index
    %c0_66 = arith.constant 0 : index
    %148 = vector.load %arg13[%c0_65, %c0_66] : memref<256x128xbf16, #tpu.memory_space<vmem>>, vector<256x128xbf16>
    %c0_67 = arith.constant 0 : index
    %c0_68 = arith.constant 0 : index
    %149 = vector.load %arg14[%c0_67, %c0_68] : memref<1x128xf32, #tpu.memory_space<vmem>>, vector<1x128xf32>
    %150 = arith.truncf %145 : vector<8x128xf32> to vector<8x128xbf16>
    %cst_69 = arith.constant dense<0.000000e+00> : vector<8x256xf32>
    %151 = tpu.matmul %150, %146, %cst_69 {dimension_numbers = #tpu.dot_dimension_numbers<[1], [0], [0], [1], [0, 0, 1, 1], [], []>} : vector<8x128xbf16>, vector<128x256xbf16>, vector<8x256xf32> -> vector<8x256xf32>
    %152 = vector.broadcast %147 : vector<1x256xf32> to vector<8x256xf32>
    %153 = arith.addf %151, %152 : vector<8x256xf32>
    %cst_70 = arith.constant 0.000000e+00 : f32
    %154 = vector.broadcast %cst_70 : f32 to vector<8x256xf32>
    %155 = arith.maximumf %153, %154 : vector<8x256xf32>
    %156 = arith.truncf %155 : vector<8x256xf32> to vector<8x256xbf16>
    %cst_71 = arith.constant dense<0.000000e+00> : vector<8x128xf32>
    %157 = tpu.matmul %156, %148, %cst_71 {dimension_numbers = #tpu.dot_dimension_numbers<[1], [0], [0], [1], [0, 0, 1, 1], [], []>} : vector<8x256xbf16>, vector<256x128xbf16>, vector<8x128xf32> -> vector<8x128xf32>
    %158 = vector.broadcast %149 : vector<1x128xf32> to vector<8x128xf32>
    %159 = arith.addf %157, %158 : vector<8x128xf32>
    %160 = arith.addf %145, %159 : vector<8x128xf32>
    %c0_72 = arith.constant 0 : index
    %c0_73 = arith.constant 0 : index
    %161 = vector.load %arg17[%c0_72, %c0_73] : memref<1x128xf32, #tpu.memory_space<vmem>>, vector<1x128xf32>
    %c0_74 = arith.constant 0 : index
    %c0_75 = arith.constant 0 : index
    %162 = vector.load %arg18[%c0_74, %c0_75] : memref<1x128xf32, #tpu.memory_space<vmem>>, vector<1x128xf32>
    %cst_76 = arith.constant dense<0.000000e+00> : vector<8xf32>
    %163 = vector.multi_reduction <add>, %160, %cst_76 [1] : vector<8x128xf32> to vector<8xf32>
    %164 = vector.shape_cast %163 : vector<8xf32> to vector<8x1xf32>
    %cst_77 = arith.constant 1.280000e+02 : f32
    %165 = vector.broadcast %cst_77 : f32 to vector<8x1xf32>
    %166 = arith.divf %164, %165 : vector<8x1xf32>
    %167 = vector.broadcast %166 : vector<8x1xf32> to vector<8x128xf32>
    %168 = arith.subf %160, %167 : vector<8x128xf32>
    %169 = arith.mulf %168, %168 : vector<8x128xf32>
    %cst_78 = arith.constant dense<0.000000e+00> : vector<8xf32>
    %170 = vector.multi_reduction <add>, %169, %cst_78 [1] : vector<8x128xf32> to vector<8xf32>
    %171 = vector.shape_cast %170 : vector<8xf32> to vector<8x1xf32>
    %cst_79 = arith.constant 1.280000e+02 : f32
    %172 = vector.broadcast %cst_79 : f32 to vector<8x1xf32>
    %173 = arith.divf %171, %172 : vector<8x1xf32>
    %174 = vector.broadcast %166 : vector<8x1xf32> to vector<8x128xf32>
    %175 = arith.subf %160, %174 : vector<8x128xf32>
    %cst_80 = arith.constant 9.99999974E-6 : f32
    %176 = vector.broadcast %cst_80 : f32 to vector<8x1xf32>
    %177 = arith.addf %173, %176 : vector<8x1xf32>
    %178 = math.rsqrt %177 : vector<8x1xf32>
    %179 = vector.broadcast %178 : vector<8x1xf32> to vector<8x128xf32>
    %180 = arith.mulf %175, %179 : vector<8x128xf32>
    %181 = vector.broadcast %161 : vector<1x128xf32> to vector<8x128xf32>
    %182 = arith.mulf %180, %181 : vector<8x128xf32>
    %183 = vector.broadcast %162 : vector<1x128xf32> to vector<8x128xf32>
    %184 = arith.addf %182, %183 : vector<8x128xf32>
    %185 = arith.addf %184, %5 : vector<8x128xf32>
    %c0_81 = arith.constant 0 : index
    %c0_82 = arith.constant 0 : index
    %c0_83 = arith.constant 0 : index
    %186 = vector.load %arg34[%c0_81, %c0_82, %c0_83] : memref<1x8x128xf32, #tpu.memory_space<vmem>>, vector<1x8x128xf32>
    %187 = vector.shape_cast %186 : vector<1x8x128xf32> to vector<8x128xf32>
    %188 = vector.shape_cast %185 : vector<8x128xf32> to vector<1x8x128xf32>
    tpu.vector_store %arg34[%c0_81, %c0_82, %c0_83], %188 {strides = array<i32>} : memref<1x8x128xf32, #tpu.memory_space<vmem>>, vector<1x8x128xf32>,
    %c0_84 = arith.constant 0 : index
    %c0_85 = arith.constant 0 : index
    %189 = vector.load %arg19[%c0_84, %c0_85] : memref<128x128xbf16, #tpu.memory_space<vmem>>, vector<128x128xbf16>
    %c0_86 = arith.constant 0 : index
    %c0_87 = arith.constant 0 : index
    %190 = vector.load %arg20[%c0_86, %c0_87] : memref<1x128xf32, #tpu.memory_space<vmem>>, vector<1x128xf32>
    %c0_88 = arith.constant 0 : index
    %c0_89 = arith.constant 0 : index
    %191 = vector.load %arg21[%c0_88, %c0_89] : memref<128x256xbf16, #tpu.memory_space<vmem>>, vector<128x256xbf16>
    %c0_90 = arith.constant 0 : index
    %c0_91 = arith.constant 0 : index
    %192 = vector.load %arg22[%c0_90, %c0_91] : memref<1x256xf32, #tpu.memory_space<vmem>>, vector<1x256xf32>
    %c0_92 = arith.constant 0 : index
    %c0_93 = arith.constant 0 : index
    %193 = vector.load %arg23[%c0_92, %c0_93] : memref<128x128xbf16, #tpu.memory_space<vmem>>, vector<128x128xbf16>
    %c0_94 = arith.constant 0 : index
    %c0_95 = arith.constant 0 : index
    %194 = vector.load %arg24[%c0_94, %c0_95] : memref<1x128xf32, #tpu.memory_space<vmem>>, vector<1x128xf32>
    %195 = arith.truncf %1 : vector<64x128xf32> to vector<64x128xbf16>
    %196 = arith.truncf %185 : vector<8x128xf32> to vector<8x128xbf16>
    %cst_96 = arith.constant dense<0.000000e+00> : vector<64x128xf32>
    %197 = tpu.matmul %195, %189, %cst_96 {dimension_numbers = #tpu.dot_dimension_numbers<[1], [0], [0], [1], [0, 0, 1, 1], [], []>} : vector<64x128xbf16>, vector<128x128xbf16>, vector<64x128xf32> -> vector<64x128xf32>
    %198 = vector.broadcast %190 : vector<1x128xf32> to vector<64x128xf32>
    %199 = arith.addf %197, %198 : vector<64x128xf32>
    %cst_97 = arith.constant dense<0.000000e+00> : vector<8x256xf32>
    %200 = tpu.matmul %196, %191, %cst_97 {dimension_numbers = #tpu.dot_dimension_numbers<[1], [0], [0], [1], [0, 0, 1, 1], [], []>} : vector<8x128xbf16>, vector<128x256xbf16>, vector<8x256xf32> -> vector<8x256xf32>
    %201 = vector.broadcast %192 : vector<1x256xf32> to vector<8x256xf32>
    %202 = arith.addf %200, %201 : vector<8x256xf32>
    %203 = vector.extract_strided_slice %202 {offsets = [0, 0], sizes = [8, 128], strides = [1, 1]} : vector<8x256xf32> to vector<8x128xf32>
    %204 = vector.extract_strided_slice %202 {offsets = [0, 128], sizes = [8, 128], strides = [1, 1]} : vector<8x256xf32> to vector<8x128xf32>
    %205 = vector.extract_strided_slice %199 {offsets = [0, 0], sizes = [64, 32], strides = [1, 1]} : vector<64x128xf32> to vector<64x32xf32>
    %cst_98 = arith.constant 0.176776692 : f32
    %206 = vector.broadcast %cst_98 : f32 to vector<64x32xf32>
    %207 = arith.mulf %205, %206 : vector<64x32xf32>
    %208 = arith.truncf %207 : vector<64x32xf32> to vector<64x32xbf16>
    %209 = vector.extract_strided_slice %203 {offsets = [0, 0], sizes = [8, 32], strides = [1, 1]} : vector<8x128xf32> to vector<8x32xf32>
    %210 = tpu.transpose %209, [1, 0] : vector<8x32xf32> -> vector<32x8xf32>
    %211 = arith.truncf %210 : vector<32x8xf32> to vector<32x8xbf16>
    %212 = vector.extract_strided_slice %204 {offsets = [0, 0], sizes = [8, 32], strides = [1, 1]} : vector<8x128xf32> to vector<8x32xf32>
    %213 = arith.truncf %212 : vector<8x32xf32> to vector<8x32xbf16>
    %cst_99 = arith.constant dense<0.000000e+00> : vector<64x8xf32>
    %214 = tpu.matmul %208, %211, %cst_99 {dimension_numbers = #tpu.dot_dimension_numbers<[1], [0], [0], [1], [0, 0, 1, 1], [], []>} : vector<64x32xbf16>, vector<32x8xbf16>, vector<64x8xf32> -> vector<64x8xf32>
    %cst_100 = arith.constant dense<0xFF800000> : vector<64xf32>
    %215 = vector.multi_reduction <maximumf>, %214, %cst_100 [1] : vector<64x8xf32> to vector<64xf32>
    %216 = vector.shape_cast %215 : vector<64xf32> to vector<64x1xf32>
    %217 = vector.broadcast %216 : vector<64x1xf32> to vector<64x8xf32>
    %218 = arith.subf %214, %217 : vector<64x8xf32>
    %219 = math.exp %218 : vector<64x8xf32>
    %cst_101 = arith.constant dense<0.000000e+00> : vector<64xf32>
    %220 = vector.multi_reduction <add>, %219, %cst_101 [1] : vector<64x8xf32> to vector<64xf32>
    %221 = vector.shape_cast %220 : vector<64xf32> to vector<64x1xf32>
    %222 = tpu.reciprocal %221 {approx = true} : vector<64x1xf32> -> vector<64x1xf32>
    %223 = vector.broadcast %222 : vector<64x1xf32> to vector<64x8xf32>
    %224 = arith.mulf %219, %223 : vector<64x8xf32>
    %225 = arith.truncf %224 : vector<64x8xf32> to vector<64x8xbf16>
    %cst_102 = arith.constant dense<0.000000e+00> : vector<64x32xf32>
    %226 = tpu.matmul %225, %213, %cst_102 {dimension_numbers = #tpu.dot_dimension_numbers<[1], [0], [0], [1], [0, 0, 1, 1], [], []>} : vector<64x8xbf16>, vector<8x32xbf16>, vector<64x32xf32> -> vector<64x32xf32>
    %c0_103 = arith.constant 0 : index
    %c0_104 = arith.constant 0 : index
    %227 = vector.load %arg35[%c0_103, %c0_104] : memref<64x128xf32, #tpu.memory_space<vmem>>, vector<64x32xf32>
    tpu.vector_store %arg35[%c0_103, %c0_104], %226 {strides = array<i32>} : memref<64x128xf32, #tpu.memory_space<vmem>>, vector<64x32xf32>,
    %228 = vector.extract_strided_slice %199 {offsets = [0, 32], sizes = [64, 32], strides = [1, 1]} : vector<64x128xf32> to vector<64x32xf32>
    %cst_105 = arith.constant 0.176776692 : f32
    %229 = vector.broadcast %cst_105 : f32 to vector<64x32xf32>
    %230 = arith.mulf %228, %229 : vector<64x32xf32>
    %231 = arith.truncf %230 : vector<64x32xf32> to vector<64x32xbf16>
    %232 = vector.extract_strided_slice %203 {offsets = [0, 32], sizes = [8, 32], strides = [1, 1]} : vector<8x128xf32> to vector<8x32xf32>
    %233 = tpu.transpose %232, [1, 0] : vector<8x32xf32> -> vector<32x8xf32>
    %234 = arith.truncf %233 : vector<32x8xf32> to vector<32x8xbf16>
    %235 = vector.extract_strided_slice %204 {offsets = [0, 32], sizes = [8, 32], strides = [1, 1]} : vector<8x128xf32> to vector<8x32xf32>
    %236 = arith.truncf %235 : vector<8x32xf32> to vector<8x32xbf16>
    %cst_106 = arith.constant dense<0.000000e+00> : vector<64x8xf32>
    %237 = tpu.matmul %231, %234, %cst_106 {dimension_numbers = #tpu.dot_dimension_numbers<[1], [0], [0], [1], [0, 0, 1, 1], [], []>} : vector<64x32xbf16>, vector<32x8xbf16>, vector<64x8xf32> -> vector<64x8xf32>
    %cst_107 = arith.constant dense<0xFF800000> : vector<64xf32>
    %238 = vector.multi_reduction <maximumf>, %237, %cst_107 [1] : vector<64x8xf32> to vector<64xf32>
    %239 = vector.shape_cast %238 : vector<64xf32> to vector<64x1xf32>
    %240 = vector.broadcast %239 : vector<64x1xf32> to vector<64x8xf32>
    %241 = arith.subf %237, %240 : vector<64x8xf32>
    %242 = math.exp %241 : vector<64x8xf32>
    %cst_108 = arith.constant dense<0.000000e+00> : vector<64xf32>
    %243 = vector.multi_reduction <add>, %242, %cst_108 [1] : vector<64x8xf32> to vector<64xf32>
    %244 = vector.shape_cast %243 : vector<64xf32> to vector<64x1xf32>
    %245 = tpu.reciprocal %244 {approx = true} : vector<64x1xf32> -> vector<64x1xf32>
    %246 = vector.broadcast %245 : vector<64x1xf32> to vector<64x8xf32>
    %247 = arith.mulf %242, %246 : vector<64x8xf32>
    %248 = arith.truncf %247 : vector<64x8xf32> to vector<64x8xbf16>
    %cst_109 = arith.constant dense<0.000000e+00> : vector<64x32xf32>
    %249 = tpu.matmul %248, %236, %cst_109 {dimension_numbers = #tpu.dot_dimension_numbers<[1], [0], [0], [1], [0, 0, 1, 1], [], []>} : vector<64x8xbf16>, vector<8x32xbf16>, vector<64x32xf32> -> vector<64x32xf32>
    %c0_110 = arith.constant 0 : index
    %c32_111 = arith.constant 32 : index
    %250 = vector.load %arg35[%c0_110, %c32_111] : memref<64x128xf32, #tpu.memory_space<vmem>>, vector<64x32xf32>
    tpu.vector_store %arg35[%c0_110, %c32_111], %249 {strides = array<i32>} : memref<64x128xf32, #tpu.memory_space<vmem>>, vector<64x32xf32>,
    %251 = vector.extract_strided_slice %199 {offsets = [0, 64], sizes = [64, 32], strides = [1, 1]} : vector<64x128xf32> to vector<64x32xf32>
    %cst_112 = arith.constant 0.176776692 : f32
    %252 = vector.broadcast %cst_112 : f32 to vector<64x32xf32>
    %253 = arith.mulf %251, %252 : vector<64x32xf32>
    %254 = arith.truncf %253 : vector<64x32xf32> to vector<64x32xbf16>
    %255 = vector.extract_strided_slice %203 {offsets = [0, 64], sizes = [8, 32], strides = [1, 1]} : vector<8x128xf32> to vector<8x32xf32>
    %256 = tpu.transpose %255, [1, 0] : vector<8x32xf32> -> vector<32x8xf32>
    %257 = arith.truncf %256 : vector<32x8xf32> to vector<32x8xbf16>
    %258 = vector.extract_strided_slice %204 {offsets = [0, 64], sizes = [8, 32], strides = [1, 1]} : vector<8x128xf32> to vector<8x32xf32>
    %259 = arith.truncf %258 : vector<8x32xf32> to vector<8x32xbf16>
    %cst_113 = arith.constant dense<0.000000e+00> : vector<64x8xf32>
    %260 = tpu.matmul %254, %257, %cst_113 {dimension_numbers = #tpu.dot_dimension_numbers<[1], [0], [0], [1], [0, 0, 1, 1], [], []>} : vector<64x32xbf16>, vector<32x8xbf16>, vector<64x8xf32> -> vector<64x8xf32>
    %cst_114 = arith.constant dense<0xFF800000> : vector<64xf32>
    %261 = vector.multi_reduction <maximumf>, %260, %cst_114 [1] : vector<64x8xf32> to vector<64xf32>
    %262 = vector.shape_cast %261 : vector<64xf32> to vector<64x1xf32>
    %263 = vector.broadcast %262 : vector<64x1xf32> to vector<64x8xf32>
    %264 = arith.subf %260, %263 : vector<64x8xf32>
    %265 = math.exp %264 : vector<64x8xf32>
    %cst_115 = arith.constant dense<0.000000e+00> : vector<64xf32>
    %266 = vector.multi_reduction <add>, %265, %cst_115 [1] : vector<64x8xf32> to vector<64xf32>
    %267 = vector.shape_cast %266 : vector<64xf32> to vector<64x1xf32>
    %268 = tpu.reciprocal %267 {approx = true} : vector<64x1xf32> -> vector<64x1xf32>
    %269 = vector.broadcast %268 : vector<64x1xf32> to vector<64x8xf32>
    %270 = arith.mulf %265, %269 : vector<64x8xf32>
    %271 = arith.truncf %270 : vector<64x8xf32> to vector<64x8xbf16>
    %cst_116 = arith.constant dense<0.000000e+00> : vector<64x32xf32>
    %272 = tpu.matmul %271, %259, %cst_116 {dimension_numbers = #tpu.dot_dimension_numbers<[1], [0], [0], [1], [0, 0, 1, 1], [], []>} : vector<64x8xbf16>, vector<8x32xbf16>, vector<64x32xf32> -> vector<64x32xf32>
    %c0_117 = arith.constant 0 : index
    %c64_118 = arith.constant 64 : index
    %273 = vector.load %arg35[%c0_117, %c64_118] : memref<64x128xf32, #tpu.memory_space<vmem>>, vector<64x32xf32>
    tpu.vector_store %arg35[%c0_117, %c64_118], %272 {strides = array<i32>} : memref<64x128xf32, #tpu.memory_space<vmem>>, vector<64x32xf32>,
    %274 = vector.extract_strided_slice %199 {offsets = [0, 96], sizes = [64, 32], strides = [1, 1]} : vector<64x128xf32> to vector<64x32xf32>
    %cst_119 = arith.constant 0.176776692 : f32
    %275 = vector.broadcast %cst_119 : f32 to vector<64x32xf32>
    %276 = arith.mulf %274, %275 : vector<64x32xf32>
    %277 = arith.truncf %276 : vector<64x32xf32> to vector<64x32xbf16>
    %278 = vector.extract_strided_slice %203 {offsets = [0, 96], sizes = [8, 32], strides = [1, 1]} : vector<8x128xf32> to vector<8x32xf32>
    %279 = tpu.transpose %278, [1, 0] : vector<8x32xf32> -> vector<32x8xf32>
    %280 = arith.truncf %279 : vector<32x8xf32> to vector<32x8xbf16>
    %281 = vector.extract_strided_slice %204 {offsets = [0, 96], sizes = [8, 32], strides = [1, 1]} : vector<8x128xf32> to vector<8x32xf32>
    %282 = arith.truncf %281 : vector<8x32xf32> to vector<8x32xbf16>
    %cst_120 = arith.constant dense<0.000000e+00> : vector<64x8xf32>
    %283 = tpu.matmul %277, %280, %cst_120 {dimension_numbers = #tpu.dot_dimension_numbers<[1], [0], [0], [1], [0, 0, 1, 1], [], []>} : vector<64x32xbf16>, vector<32x8xbf16>, vector<64x8xf32> -> vector<64x8xf32>
    %cst_121 = arith.constant dense<0xFF800000> : vector<64xf32>
    %284 = vector.multi_reduction <maximumf>, %283, %cst_121 [1] : vector<64x8xf32> to vector<64xf32>
    %285 = vector.shape_cast %284 : vector<64xf32> to vector<64x1xf32>
    %286 = vector.broadcast %285 : vector<64x1xf32> to vector<64x8xf32>
    %287 = arith.subf %283, %286 : vector<64x8xf32>
    %288 = math.exp %287 : vector<64x8xf32>
    %cst_122 = arith.constant dense<0.000000e+00> : vector<64xf32>
    %289 = vector.multi_reduction <add>, %288, %cst_122 [1] : vector<64x8xf32> to vector<64xf32>
    %290 = vector.shape_cast %289 : vector<64xf32> to vector<64x1xf32>
    %291 = tpu.reciprocal %290 {approx = true} : vector<64x1xf32> -> vector<64x1xf32>
    %292 = vector.broadcast %291 : vector<64x1xf32> to vector<64x8xf32>
    %293 = arith.mulf %288, %292 : vector<64x8xf32>
    %294 = arith.truncf %293 : vector<64x8xf32> to vector<64x8xbf16>
    %cst_123 = arith.constant dense<0.000000e+00> : vector<64x32xf32>
    %295 = tpu.matmul %294, %282, %cst_123 {dimension_numbers = #tpu.dot_dimension_numbers<[1], [0], [0], [1], [0, 0, 1, 1], [], []>} : vector<64x8xbf16>, vector<8x32xbf16>, vector<64x32xf32> -> vector<64x32xf32>
    %c0_124 = arith.constant 0 : index
    %c96_125 = arith.constant 96 : index
    %296 = vector.load %arg35[%c0_124, %c96_125] : memref<64x128xf32, #tpu.memory_space<vmem>>, vector<64x32xf32>
    tpu.vector_store %arg35[%c0_124, %c96_125], %295 {strides = array<i32>} : memref<64x128xf32, #tpu.memory_space<vmem>>, vector<64x32xf32>,
    %c0_126 = arith.constant 0 : index
    %c0_127 = arith.constant 0 : index
    %297 = vector.load %arg35[%c0_126, %c0_127] : memref<64x128xf32, #tpu.memory_space<vmem>>, vector<64x128xf32>
    %298 = arith.truncf %297 : vector<64x128xf32> to vector<64x128xbf16>
    %cst_128 = arith.constant dense<0.000000e+00> : vector<64x128xf32>
    %299 = tpu.matmul %298, %193, %cst_128 {dimension_numbers = #tpu.dot_dimension_numbers<[1], [0], [0], [1], [0, 0, 1, 1], [], []>} : vector<64x128xbf16>, vector<128x128xbf16>, vector<64x128xf32> -> vector<64x128xf32>
    %300 = vector.broadcast %194 : vector<1x128xf32> to vector<64x128xf32>
    %301 = arith.addf %299, %300 : vector<64x128xf32>
    %302 = arith.addf %1, %301 : vector<64x128xf32>
    %c0_129 = arith.constant 0 : index
    %c0_130 = arith.constant 0 : index
    %303 = vector.load %arg29[%c0_129, %c0_130] : memref<1x128xf32, #tpu.memory_space<vmem>>, vector<1x128xf32>
    %c0_131 = arith.constant 0 : index
    %c0_132 = arith.constant 0 : index
    %304 = vector.load %arg30[%c0_131, %c0_132] : memref<1x128xf32, #tpu.memory_space<vmem>>, vector<1x128xf32>
    %cst_133 = arith.constant dense<0.000000e+00> : vector<64xf32>
    %305 = vector.multi_reduction <add>, %302, %cst_133 [1] : vector<64x128xf32> to vector<64xf32>
    %306 = vector.shape_cast %305 : vector<64xf32> to vector<64x1xf32>
    %cst_134 = arith.constant 1.280000e+02 : f32
    %307 = vector.broadcast %cst_134 : f32 to vector<64x1xf32>
    %308 = arith.divf %306, %307 : vector<64x1xf32>
    %309 = vector.broadcast %308 : vector<64x1xf32> to vector<64x128xf32>
    %310 = arith.subf %302, %309 : vector<64x128xf32>
    %311 = arith.mulf %310, %310 : vector<64x128xf32>
    %cst_135 = arith.constant dense<0.000000e+00> : vector<64xf32>
    %312 = vector.multi_reduction <add>, %311, %cst_135 [1] : vector<64x128xf32> to vector<64xf32>
    %313 = vector.shape_cast %312 : vector<64xf32> to vector<64x1xf32>
    %cst_136 = arith.constant 1.280000e+02 : f32
    %314 = vector.broadcast %cst_136 : f32 to vector<64x1xf32>
    %315 = arith.divf %313, %314 : vector<64x1xf32>
    %316 = vector.broadcast %308 : vector<64x1xf32> to vector<64x128xf32>
    %317 = arith.subf %302, %316 : vector<64x128xf32>
    %cst_137 = arith.constant 9.99999974E-6 : f32
    %318 = vector.broadcast %cst_137 : f32 to vector<64x1xf32>
    %319 = arith.addf %315, %318 : vector<64x1xf32>
    %320 = math.rsqrt %319 : vector<64x1xf32>
    %321 = vector.broadcast %320 : vector<64x1xf32> to vector<64x128xf32>
    %322 = arith.mulf %317, %321 : vector<64x128xf32>
    %323 = vector.broadcast %303 : vector<1x128xf32> to vector<64x128xf32>
    %324 = arith.mulf %322, %323 : vector<64x128xf32>
    %325 = vector.broadcast %304 : vector<1x128xf32> to vector<64x128xf32>
    %326 = arith.addf %324, %325 : vector<64x128xf32>
    %c0_138 = arith.constant 0 : index
    %c0_139 = arith.constant 0 : index
    %327 = vector.load %arg25[%c0_138, %c0_139] : memref<128x256xbf16, #tpu.memory_space<vmem>>, vector<128x256xbf16>
    %c0_140 = arith.constant 0 : index
    %c0_141 = arith.constant 0 : index
    %328 = vector.load %arg26[%c0_140, %c0_141] : memref<1x256xf32, #tpu.memory_space<vmem>>, vector<1x256xf32>
    %c0_142 = arith.constant 0 : index
    %c0_143 = arith.constant 0 : index
    %329 = vector.load %arg27[%c0_142, %c0_143] : memref<256x128xbf16, #tpu.memory_space<vmem>>, vector<256x128xbf16>
    %c0_144 = arith.constant 0 : index
    %c0_145 = arith.constant 0 : index
    %330 = vector.load %arg28[%c0_144, %c0_145] : memref<1x128xf32, #tpu.memory_space<vmem>>, vector<1x128xf32>
    %331 = arith.truncf %326 : vector<64x128xf32> to vector<64x128xbf16>
    %cst_146 = arith.constant dense<0.000000e+00> : vector<64x256xf32>
    %332 = tpu.matmul %331, %327, %cst_146 {dimension_numbers = #tpu.dot_dimension_numbers<[1], [0], [0], [1], [0, 0, 1, 1], [], []>} : vector<64x128xbf16>, vector<128x256xbf16>, vector<64x256xf32> -> vector<64x256xf32>
    %333 = vector.broadcast %328 : vector<1x256xf32> to vector<64x256xf32>
    %334 = arith.addf %332, %333 : vector<64x256xf32>
    %cst_147 = arith.constant 0.000000e+00 : f32
    %335 = vector.broadcast %cst_147 : f32 to vector<64x256xf32>
    %336 = arith.maximumf %334, %335 : vector<64x256xf32>
    %337 = arith.truncf %336 : vector<64x256xf32> to vector<64x256xbf16>
    %cst_148 = arith.constant dense<0.000000e+00> : vector<64x128xf32>
    %338 = tpu.matmul %337, %329, %cst_148 {dimension_numbers = #tpu.dot_dimension_numbers<[1], [0], [0], [1], [0, 0, 1, 1], [], []>} : vector<64x256xbf16>, vector<256x128xbf16>, vector<64x128xf32> -> vector<64x128xf32>
    %339 = vector.broadcast %330 : vector<1x128xf32> to vector<64x128xf32>
    %340 = arith.addf %338, %339 : vector<64x128xf32>
    %341 = arith.addf %340, %7 : vector<64x128xf32>
    %342 = arith.addf %326, %341 : vector<64x128xf32>
    %c0_149 = arith.constant 0 : index
    %c0_150 = arith.constant 0 : index
    %343 = vector.load %arg31[%c0_149, %c0_150] : memref<1x128xf32, #tpu.memory_space<vmem>>, vector<1x128xf32>
    %c0_151 = arith.constant 0 : index
    %c0_152 = arith.constant 0 : index
    %344 = vector.load %arg32[%c0_151, %c0_152] : memref<1x128xf32, #tpu.memory_space<vmem>>, vector<1x128xf32>
    %cst_153 = arith.constant dense<0.000000e+00> : vector<64xf32>
    %345 = vector.multi_reduction <add>, %342, %cst_153 [1] : vector<64x128xf32> to vector<64xf32>
    %346 = vector.shape_cast %345 : vector<64xf32> to vector<64x1xf32>
    %cst_154 = arith.constant 1.280000e+02 : f32
    %347 = vector.broadcast %cst_154 : f32 to vector<64x1xf32>
    %348 = arith.divf %346, %347 : vector<64x1xf32>
    %349 = vector.broadcast %348 : vector<64x1xf32> to vector<64x128xf32>
    %350 = arith.subf %342, %349 : vector<64x128xf32>
    %351 = arith.mulf %350, %350 : vector<64x128xf32>
    %cst_155 = arith.constant dense<0.000000e+00> : vector<64xf32>
    %352 = vector.multi_reduction <add>, %351, %cst_155 [1] : vector<64x128xf32> to vector<64xf32>
    %353 = vector.shape_cast %352 : vector<64xf32> to vector<64x1xf32>
    %cst_156 = arith.constant 1.280000e+02 : f32
    %354 = vector.broadcast %cst_156 : f32 to vector<64x1xf32>
    %355 = arith.divf %353, %354 : vector<64x1xf32>
    %356 = vector.broadcast %348 : vector<64x1xf32> to vector<64x128xf32>
    %357 = arith.subf %342, %356 : vector<64x128xf32>
    %cst_157 = arith.constant 9.99999974E-6 : f32
    %358 = vector.broadcast %cst_157 : f32 to vector<64x1xf32>
    %359 = arith.addf %355, %358 : vector<64x1xf32>
    %360 = math.rsqrt %359 : vector<64x1xf32>
    %361 = vector.broadcast %360 : vector<64x1xf32> to vector<64x128xf32>
    %362 = arith.mulf %357, %361 : vector<64x128xf32>
    %363 = vector.broadcast %343 : vector<1x128xf32> to vector<64x128xf32>
    %364 = arith.mulf %362, %363 : vector<64x128xf32>
    %365 = vector.broadcast %344 : vector<1x128xf32> to vector<64x128xf32>
    %366 = arith.addf %364, %365 : vector<64x128xf32>
    %c0_158 = arith.constant 0 : index
    %c0_159 = arith.constant 0 : index
    %c0_160 = arith.constant 0 : index
    %367 = vector.load %arg33[%c0_158, %c0_159, %c0_160] : memref<1x64x128xf32, #tpu.memory_space<vmem>>, vector<1x64x128xf32>
    %368 = vector.shape_cast %367 : vector<1x64x128xf32> to vector<64x128xf32>
    %369 = vector.shape_cast %366 : vector<64x128xf32> to vector<1x64x128xf32>
    tpu.vector_store %arg33[%c0_158, %c0_159, %c0_160], %369 {strides = array<i32>} : memref<1x64x128xf32, #tpu.memory_space<vmem>>, vector<1x64x128xf32>,
    return
  }
  func.func @transform_0(%arg0: i32) -> (i32, i32, i32) {
    %c0_i32 = arith.constant 0 : i32
    %c0_i32_0 = arith.constant 0 : i32
    %c0_i32_1 = arith.constant 0 : i32
    return %arg0, %c0_i32, %c0_i32_0 : i32, i32, i32
  }
  func.func @transform_1(%arg0: i32) -> (i32, i32, i32) {
    %c0_i32 = arith.constant 0 : i32
    %c0_i32_0 = arith.constant 0 : i32
    %c0_i32_1 = arith.constant 0 : i32
    return %arg0, %c0_i32, %c0_i32_0 : i32, i32, i32
  }
  func.func @transform_2(%arg0: i32) -> (i32, i32, i32) {
    %c0_i32 = arith.constant 0 : i32
    %c0_i32_0 = arith.constant 0 : i32
    %c0_i32_1 = arith.constant 0 : i32
    return %arg0, %c0_i32, %c0_i32_0 : i32, i32, i32
  }
  func.func @transform_3(%arg0: i32) -> (i32, i32, i32) {
    %c0_i32 = arith.constant 0 : i32
    %c0_i32_0 = arith.constant 0 : i32
    %c0_i32_1 = arith.constant 0 : i32
    return %arg0, %c0_i32, %c0_i32_0 : i32, i32, i32
  }
  func.func @transform_4(%arg0: i32) -> (i32, i32) {
    %c0_i32 = arith.constant 0 : i32
    %c0_i32_0 = arith.constant 0 : i32
    %c0_i32_1 = arith.constant 0 : i32
    return %c0_i32, %c0_i32_0 : i32, i32
  }
  func.func @transform_5(%arg0: i32) -> (i32, i32) {
    %c0_i32 = arith.constant 0 : i32
    %c0_i32_0 = arith.constant 0 : i32
    %c0_i32_1 = arith.constant 0 : i32
    return %c0_i32, %c0_i32_0 : i32, i32
  }
  func.func @transform_6(%arg0: i32) -> (i32, i32) {
    %c0_i32 = arith.constant 0 : i32
    %c0_i32_0 = arith.constant 0 : i32
    %c0_i32_1 = arith.constant 0 : i32
    return %c0_i32, %c0_i32_0 : i32, i32
  }
  func.func @transform_7(%arg0: i32) -> (i32, i32) {
    %c0_i32 = arith.constant 0 : i32
    %c0_i32_0 = arith.constant 0 : i32
    %c0_i32_1 = arith.constant 0 : i32
    return %c0_i32, %c0_i32_0 : i32, i32
  }
  func.func @transform_8(%arg0: i32) -> (i32, i32) {
    %c0_i32 = arith.constant 0 : i32
    %c0_i32_0 = arith.constant 0 : i32
    %c0_i32_1 = arith.constant 0 : i32
    return %c0_i32, %c0_i32_0 : i32, i32
  }
  func.func @transform_9(%arg0: i32) -> (i32, i32) {
    %c0_i32 = arith.constant 0 : i32
    %c0_i32_0 = arith.constant 0 : i32
    %c0_i32_1 = arith.constant 0 : i32
    return %c0_i32, %c0_i32_0 : i32, i32
  }
  func.func @transform_10(%arg0: i32) -> (i32, i32) {
    %c0_i32 = arith.constant 0 : i32
    %c0_i32_0 = arith.constant 0 : i32
    %c0_i32_1 = arith.constant 0 : i32
    return %c0_i32, %c0_i32_0 : i32, i32
  }
  func.func @transform_11(%arg0: i32) -> (i32, i32) {
    %c0_i32 = arith.constant 0 : i32
    %c0_i32_0 = arith.constant 0 : i32
    %c0_i32_1 = arith.constant 0 : i32
    return %c0_i32, %c0_i32_0 : i32, i32
  }
  func.func @transform_12(%arg0: i32) -> (i32, i32) {
    %c0_i32 = arith.constant 0 : i32
    %c0_i32_0 = arith.constant 0 : i32
    %c0_i32_1 = arith.constant 0 : i32
    return %c0_i32, %c0_i32_0 : i32, i32
  }
  func.func @transform_13(%arg0: i32) -> (i32, i32) {
    %c0_i32 = arith.constant 0 : i32
    %c0_i32_0 = arith.constant 0 : i32
    %c0_i32_1 = arith.constant 0 : i32
    return %c0_i32, %c0_i32_0 : i32, i32
  }
  func.func @transform_14(%arg0: i32) -> (i32, i32) {
    %c0_i32 = arith.constant 0 : i32
    %c0_i32_0 = arith.constant 0 : i32
    %c0_i32_1 = arith.constant 0 : i32
    return %c0_i32, %c0_i32_0 : i32, i32
  }
  func.func @transform_15(%arg0: i32) -> (i32, i32) {
    %c0_i32 = arith.constant 0 : i32
    %c0_i32_0 = arith.constant 0 : i32
    %c0_i32_1 = arith.constant 0 : i32
    return %c0_i32, %c0_i32_0 : i32, i32
  }
  func.func @transform_16(%arg0: i32) -> (i32, i32) {
    %c0_i32 = arith.constant 0 : i32
    %c0_i32_0 = arith.constant 0 : i32
    %c0_i32_1 = arith.constant 0 : i32
    return %c0_i32, %c0_i32_0 : i32, i32
  }
  func.func @transform_17(%arg0: i32) -> (i32, i32) {
    %c0_i32 = arith.constant 0 : i32
    %c0_i32_0 = arith.constant 0 : i32
    %c0_i32_1 = arith.constant 0 : i32
    return %c0_i32, %c0_i32_0 : i32, i32
  }
  func.func @transform_18(%arg0: i32) -> (i32, i32) {
    %c0_i32 = arith.constant 0 : i32
    %c0_i32_0 = arith.constant 0 : i32
    %c0_i32_1 = arith.constant 0 : i32
    return %c0_i32, %c0_i32_0 : i32, i32
  }
  func.func @transform_19(%arg0: i32) -> (i32, i32) {
    %c0_i32 = arith.constant 0 : i32
    %c0_i32_0 = arith.constant 0 : i32
    %c0_i32_1 = arith.constant 0 : i32
    return %c0_i32, %c0_i32_0 : i32, i32
  }
  func.func @transform_20(%arg0: i32) -> (i32, i32) {
    %c0_i32 = arith.constant 0 : i32
    %c0_i32_0 = arith.constant 0 : i32
    %c0_i32_1 = arith.constant 0 : i32
    return %c0_i32, %c0_i32_0 : i32, i32
  }
  func.func @transform_21(%arg0: i32) -> (i32, i32) {
    %c0_i32 = arith.constant 0 : i32
    %c0_i32_0 = arith.constant 0 : i32
    %c0_i32_1 = arith.constant 0 : i32
    return %c0_i32, %c0_i32_0 : i32, i32
  }
  func.func @transform_22(%arg0: i32) -> (i32, i32) {
    %c0_i32 = arith.constant 0 : i32
    %c0_i32_0 = arith.constant 0 : i32
    %c0_i32_1 = arith.constant 0 : i32
    return %c0_i32, %c0_i32_0 : i32, i32
  }
  func.func @transform_23(%arg0: i32) -> (i32, i32) {
    %c0_i32 = arith.constant 0 : i32
    %c0_i32_0 = arith.constant 0 : i32
    %c0_i32_1 = arith.constant 0 : i32
    return %c0_i32, %c0_i32_0 : i32, i32
  }
  func.func @transform_24(%arg0: i32) -> (i32, i32) {
    %c0_i32 = arith.constant 0 : i32
    %c0_i32_0 = arith.constant 0 : i32
    %c0_i32_1 = arith.constant 0 : i32
    return %c0_i32, %c0_i32_0 : i32, i32
  }
  func.func @transform_25(%arg0: i32) -> (i32, i32) {
    %c0_i32 = arith.constant 0 : i32
    %c0_i32_0 = arith.constant 0 : i32
    %c0_i32_1 = arith.constant 0 : i32
    return %c0_i32, %c0_i32_0 : i32, i32
  }
  func.func @transform_26(%arg0: i32) -> (i32, i32) {
    %c0_i32 = arith.constant 0 : i32
    %c0_i32_0 = arith.constant 0 : i32
    %c0_i32_1 = arith.constant 0 : i32
    return %c0_i32, %c0_i32_0 : i32, i32
  }
  func.func @transform_27(%arg0: i32) -> (i32, i32) {
    %c0_i32 = arith.constant 0 : i32
    %c0_i32_0 = arith.constant 0 : i32
    %c0_i32_1 = arith.constant 0 : i32
    return %c0_i32, %c0_i32_0 : i32, i32
  }
  func.func @transform_28(%arg0: i32) -> (i32, i32) {
    %c0_i32 = arith.constant 0 : i32
    %c0_i32_0 = arith.constant 0 : i32
    %c0_i32_1 = arith.constant 0 : i32
    return %c0_i32, %c0_i32_0 : i32, i32
  }
  func.func @transform_29(%arg0: i32) -> (i32, i32) {
    %c0_i32 = arith.constant 0 : i32
    %c0_i32_0 = arith.constant 0 : i32
    %c0_i32_1 = arith.constant 0 : i32
    return %c0_i32, %c0_i32_0 : i32, i32
  }
  func.func @transform_30(%arg0: i32) -> (i32, i32) {
    %c0_i32 = arith.constant 0 : i32
    %c0_i32_0 = arith.constant 0 : i32
    %c0_i32_1 = arith.constant 0 : i32
    return %c0_i32, %c0_i32_0 : i32, i32
  }
  func.func @transform_31(%arg0: i32) -> (i32, i32) {
    %c0_i32 = arith.constant 0 : i32
    %c0_i32_0 = arith.constant 0 : i32
    %c0_i32_1 = arith.constant 0 : i32
    return %c0_i32, %c0_i32_0 : i32, i32
  }
  func.func @transform_32(%arg0: i32) -> (i32, i32, i32) {
    %c0_i32 = arith.constant 0 : i32
    %c0_i32_0 = arith.constant 0 : i32
    %c0_i32_1 = arith.constant 0 : i32
    return %arg0, %c0_i32, %c0_i32_0 : i32, i32, i32
  }
  func.func @transform_33(%arg0: i32) -> (i32, i32, i32) {
    %c0_i32 = arith.constant 0 : i32
    %c0_i32_0 = arith.constant 0 : i32
    %c0_i32_1 = arith.constant 0 : i32
    return %arg0, %c0_i32, %c0_i32_0 : i32, i32, i32
  }
}

</mosaic_0001>

<bundles_post_ra>
// kernel: cross_attention_block.1
= control target key start
LH: loop header
LB: loop body
LE: loop exit
PB: predicated region body
PF: predicated region fallthrough
CT: control target
= control target key end

     0   :  { %s7493_s6 = smov 1   ;;  %s7494_s10 = smov 2   ;;  %s8968_s0 = inlined_call_operand.smem [shape: u32[34], index: -1, kind: input, shape index: {}] }
   0x1   :  { %s7563_s5 = sld [smem:[%s8968_s0]]   ;;  %s7495_s14 = smov 3  }
   0x2   :  { %s7568_s9 = sld [smem:[%s8968_s0 + %s7493_s6]]   ;;  %s7496_s18 = smov 4  }
   0x3   :  { %s7573_s13 = sld [smem:[%s8968_s0 + %s7494_s10]]   ;;  %s7497_s22 = smov 5  }
   0x4   :  { %s7578_s17 = sld [smem:[%s8968_s0 + %s7495_s14]]   ;;  %s7498_s26 = smov 6  }
   0x5   :  { %s7583_s21 = sld [smem:[%s8968_s0 + %s7496_s18]]   ;;  %s7499_s30 = smov 7  }
   0x6   :  { %s7588_s25 = sld [smem:[%s8968_s0 + %s7497_s22]]   ;;  %s7500_s4 = smov 8  }
   0x7   :  { %9003 = sst [smem:[#allocation41_spill]] %s7563_s5  ;;  %s7501_s10 = smov 9  }
   0x8   :  { %9004 = sst [smem:[#allocation42_spill]] %s7568_s9  ;;  %s7502_s15 = smov 10  }
   0x9   :  { %s7593_s29 = sld [smem:[%s8968_s0 + %s7498_s26]]   ;;  %s7503_s20 = smov 11  }
   0xa   :  { %9005 = sst [smem:[#allocation43_spill]] %s7578_s17  ;;  %s7504_s26 = smov 12  }
   0xb   :  { %9006 = sst [smem:[#allocation44_spill]] %s7583_s21  ;;  %s7505_s1 = smov 13  }
   0xc   :  { %9007 = sst [smem:[#allocation45_spill]] %s7588_s25  ;;  %s7506_s7 = smov 14  }
   0xd   :  { %s7598_s3 = sld [smem:[%s8968_s0 + %s7499_s30]]   ;;  %s7508_s22 = smov 16  }
   0xe   :  { %s7603_s8 = sld [smem:[%s8968_s0 + %s7500_s4]]   ;;  %s7509_s28 = smov 17  }
   0xf   :  { %9008 = sst [smem:[#allocation46_spill]] %s7593_s29 }
  0x10   :  { %s7608_s14 = sld [smem:[%s8968_s0 + %s7501_s10]]  }
  0x11   :  { %s7613_s19 = sld [smem:[%s8968_s0 + %s7502_s15]]   ;;  %s7507_s15 = smov 15  }
  0x12   :  { %s7618_s24 = sld [smem:[%s8968_s0 + %s7503_s20]]  }
  0x13   :  { %9009 = sst [smem:[#allocation47_spill]] %s7598_s3 }
  0x14   :  { %9010 = sst [smem:[#allocation48_spill]] %s7603_s8 }
  0x15   :  { %s7623_s30 = sld [smem:[%s8968_s0 + %s7504_s26]]  }
  0x16   :  { %9011 = sst [smem:[#allocation49_spill]] %s7608_s14 }
  0x17   :  { %9012 = sst [smem:[#allocation50_spill]] %s7613_s19 }
  0x18   :  { %9013 = sst [smem:[#allocation51_spill]] %s7618_s24 }
  0x19   :  { %s7628_s6 = sld [smem:[%s8968_s0 + %s7505_s1]]  }
  0x1a   :  { %s7633_s12 = sld [smem:[%s8968_s0 + %s7506_s7]]   ;;  %s7510_s7 = smov 18  }
  0x1b   :  { %s7638_s20 = sld [smem:[%s8968_s0 + %s7507_s15]]   ;;  %s7511_s15 = smov 19  }
  0x1c   :  { %s7643_s27 = sld [smem:[%s8968_s0 + %s7508_s22]]   ;;  %s7512_s22 = smov 20  }
  0x1d   :  { %s7648_s4 = sld [smem:[%s8968_s0 + %s7509_s28]]   ;;  %s7513_s28 = smov 21  }
  0x1e   :  { %s7658_s24 = sld [smem:[%s8968_s0 + %s7511_s15]]   ;;  %s7515_s15 = smov 23  }
  0x1f   :  { %9014 = sst [smem:[#allocation52_spill]] %s7628_s6 }
  0x20   :  { %9015 = sst [smem:[#allocation53_spill]] %s7633_s12 }
  0x21   :  { %9016 = sst [smem:[#allocation54_spill]] %s7638_s20 }
  0x22   :  { %9017 = sst [smem:[#allocation55_spill]] %s7643_s27 }
  0x23   :  { %9018 = sst [smem:[#allocation56_spill]] %s7648_s4 }
  0x24   :  { %s7653_s6 = sld [smem:[%s8968_s0 + %s7510_s7]]   ;;  %s7514_s7 = smov 22  }
  0x25   :  { %9020 = sst [smem:[#allocation58_spill]] %s7658_s24 }
  0x26   :  { %s7663_s27 = sld [smem:[%s8968_s0 + %s7512_s22]]   ;;  %s7516_s22 = smov 24  }
  0x27   :  { %s7668_s4 = sld [smem:[%s8968_s0 + %s7513_s28]]   ;;  %s7517_s28 = smov 25  }
  0x28   :  { %s7673_s20 = sld [smem:[%s8968_s0 + %s7514_s7]]   ;;  %s7518_s7 = smov 26  }
  0x29   :  { %s7678_s24 = sld [smem:[%s8968_s0 + %s7515_s15]]   ;;  %s7519_s15 = smov 27  }
  0x2a   :  { %9019 = sst [smem:[#allocation57_spill]] %s7653_s6 }
  0x2b   :  { %s7683_s12 = sld [smem:[%s8968_s0 + %s7516_s22]]   ;;  %s7520_s22 = smov 28  }
  0x2c   :  { %s7693_s14 = sld [smem:[%s8968_s0 + %s7518_s7]]   ;;  %s7522_s7 = smov 30  }
  0x2d   :  { %9021 = sst [smem:[#allocation59_spill]] %s7668_s4 }
  0x2e   :  { %9022 = sst [smem:[#allocation60_spill]] %s7673_s20 }
  0x2f   :  { %s7688_s4 = sld [smem:[%s8968_s0 + %s7517_s28]]   ;;  %s7521_s28 = smov 29  }
  0x30   :  { %s7698_s25 = sld [smem:[%s8968_s0 + %s7519_s15]]   ;;  %s7523_s15 = smov 31  }
  0x31   :  { %9023 = sst [smem:[#allocation61_spill]] %s7683_s12 }
  0x32   :  { %s7703_s3 = sld [smem:[%s8968_s0 + %s7520_s22]]   ;;  %s7524_s22 = smov 32  }
  0x33   :  { %s7713_s17 = sld [smem:[%s8968_s0 + %s7522_s7]]  }
  0x35   :  { %9024 = sst [smem:[#allocation62_spill]] %s7688_s4 }
  0x36   :  { %9025 = sst [smem:[#allocation63_spill]] %s7698_s25 }
  0x37   :  { %s7708_s4 = sld [smem:[%s8968_s0 + %s7521_s28]]   ;;  %s7525_s28 = smov 33  }
  0x38   :  { %9026 = sst [smem:[#allocation64_spill]] %s7703_s3 }
  0x39   :  { %9028 = sst [smem:[#allocation66_spill]] %s7713_s17 }
  0x3a   :  { %s7718_s25 = sld [smem:[%s8968_s0 + %s7523_s15]]  }
  0x3b   :  { %s7723_s3 = sld [smem:[%s8968_s0 + %s7524_s22]]  }
  0x3d   :  { %9027 = sst [smem:[#allocation65_spill]] %s7708_s4 }
  0x3e   :  { %s7728_s4 = sld [smem:[%s8968_s0 + %s7525_s28]]  }
  0x40   :  { %9029 = sst [smem:[#allocation67_spill]] %s7718_s25 }
  0x41   :  { %9030 = sst [smem:[#allocation68_spill]] %s7723_s3 }
  0x42   :  { %73 = vsyncpa [#allocation4], 0 }
  0x43   :  { %75 = vsyncpa [#allocation4 + $0x1], 0 }
  0x44   :  { %76 = vsyncpa [#allocation7], 0 }
  0x45   :  { %78 = vsyncpa [#allocation7 + $0x1], 0 }
  0x46   :  { %79 = vsyncpa [#allocation10], 0 }
  0x47   :  { %81 = vsyncpa [#allocation10 + $0x1], 0 }
  0x48   :  { %82 = vsyncpa [#allocation13], 0 }
  0x49   :  { %83 = vsyncpa [#allocation16], 0 }
  0x4a   :  { %84 = vsyncpa [#allocation19], 0 }
  0x4b   :  { %85 = vsyncpa [#allocation22], 0 }
  0x4c   :  { %86 = vsyncpa [#allocation25], 0 }
  0x4d   :  { %87 = vsyncpa [#allocation5], 0 }
  0x4e   :  { %89 = vsyncpa [#allocation5 + $0x1], 0 }
  0x4f   :  { %90 = vsyncpa [#allocation29], 0 }
  0x50   :  { %92 = vsyncpa [#allocation29 + $0x1], 0  ;;  %s7730_s7 = smov 0   ;;  %s7732_s10 = smov 0  }
  0x51   :  { %s7734_s0 = smov 0   ;;  %s7736_s11 = smov 0  }
  0x52 LB: > { %s9031_s5 = sld [smem:[#allocation41_spill]]  ;;  %s7526_s15 = smov [#allocation11]   ;;  %s7483_s10 = sphi %s7732_s10, %s9111_s10   ;;  %s7479_s7 = sphi %s7730_s7, %s9110_s7   ;;  %s7491_s11 = sphi %s7736_s11, %s9107_s11   ;;  %s7487_s0 = sphi %s7734_s0, %s9109_s0  }
  0x53   : > { %s9032_s9 = sld [smem:[#allocation42_spill]]  ;;  %s859_s16 = sshll.u32 %s7526_s15, 4  ;;  %s860_s16 = int_to_ptr.vmem [resolvable:$true] %s859_s16 }
  0x54   : > { %9033 = sst [smem:[#allocation69_spill]] %s7479_s7  ;;  %s7751_s18 = sadd.s32 4294967295, %s7491_s11  }
  0x55   : > { %9034 = sst [smem:[#allocation70_spill]] %s7487_s0  ;;  %p5583_p0 = scmp.ge.s32.totalorder %s7491_s11, 1 }
  0x56   : > { %p8975_p1 = scmp.eq.s32.totalorder %s7751_s18, 0  ;;  %p847_p2 = scmp.lt.s32.totalorder %s7491_s11, 3 }
  0x57   : > { %s7527_s23 = smov [#allocation12]   ;;  %s7528_s1 = smov [#allocation15]  }
  0x58   : > { %p7756_p3 = pnand %p5583_p0, %p847_p2  ;;  %s875_s26 = sshll.u32 %s7527_s23, 4  ;;  %s7769_s26 = int_to_ptr.vmem [resolvable:$true] %s875_s26 }
  0x59   : > { %s7771_s2 = sshll.u32 %s7528_s1, 4  ;;  %s6978_s3 = scalar_lea.vmem %s860_s16, 1024  ;;  %s908_s2 = int_to_ptr.vmem [resolvable:$true] %s7771_s2 }
  0x5a   : > { %s9035_s22 = scalar_select %p7756_p3, 1, 0 }
  0x5b   : > { %p6312_p5 = pneg %p7756_p3  ;;  %p6979_p8 = scmp.ne.s32.totalorder %s860_s16, %s6978_s3 }
  0x5c   : > { %p6986_p11 = scmp.lt.s32.totalorder %s860_s16, %s860_s16  ;;  %p6987_p12 = scmp.lt.s32.totalorder %s6978_s3, %s6978_s3 }
  0x5d   : > { %p7765_p6 = pnand %p6312_p5, %p8975_p1 }
  0x5e   : > { %p6988_p13 = por %p6987_p12, %p6986_p11 }
  0x5f   : > { %s9036_s28 = scalar_select %p7765_p6, 1, 0 }
  0x60   : > { %p7775_p7 = pneg %p7765_p6 }
  0x62   : > { %s9037_s15 = scalar_select %p7775_p7, 1, 0 }
  0x63   : > { %p6981_p9 = pnand %p6979_p8, %p7775_p7 }
  0x65   : > { %p6982_p10 = pneg %p6981_p9 }
  0x67   : > { %p6989_p0 = pnand %p6988_p13, %p6982_p10 }
  0x69   : > { %6992 = shalt.err (!%p6989_p0)
}
  0x6a   : > { %s8971_s23 = smov 64   ;;  %s9038_s21 = sld [smem:[#allocation44_spill]] }
  0x6b   : > { %s8973_s1 = smov 4   ;;  %s7004_s25 = scalar_lea.vmem %s7769_s26, 2048 }
  0x6c   : > { %p7005_p2 = scmp.ne.s32.totalorder %s7769_s26, %s7004_s25  ;;  %p7012_p9 = scmp.lt.s32.totalorder %s7769_s26, %s7769_s26 }
  0x6d   : > { %p7013_p10 = scmp.lt.s32.totalorder %s7004_s25, %s7004_s25 }
  0x6e   : > { %p7007_p5 = pnand %p7005_p2, %p7775_p7 }
  0x6f   : > { %p7014_p11 = por %p7013_p10, %p7012_p9 }
  0x70   : > { %6315 = dma.hbm_to_vmem [thread:$0]  (!%p7765_p6), %s9038_s21, 1024, %s860_s16, [#allocation10], %s8971_s23, %s8971_s23, %s8973_s1  }
  0x71   : > { %p7008_p8 = pneg %p7007_p5 }
  0x73   : > { %p7015_p12 = pnand %p7014_p11, %p7008_p8 }
  0x75   : > { %7018 = shalt.err (!%p7015_p12)
}
  0x76   : > { %s8976_s3 = smov 128   ;;  %s9039_s29 = sld [smem:[#allocation46_spill]] }
  0x77   : > { %s8978_s17 = smov 8   ;;  %s7030_s16 = scalar_lea.vmem %s908_s2, 2048 }
  0x78   : > { %p7031_p13 = scmp.ne.s32.totalorder %s908_s2, %s7030_s16  ;;  %p7038_p5 = scmp.lt.s32.totalorder %s908_s2, %s908_s2 }
  0x79   : > { %p7039_p8 = scmp.lt.s32.totalorder %s7030_s16, %s7030_s16 }
  0x7a   : > { %p7033_p0 = pnand %p7031_p13, %p7775_p7 }
  0x7b   : > { %p7040_p9 = por %p7039_p8, %p7038_p5 }
  0x7c   : > { %6318 = dma.hbm_to_vmem [thread:$0]  (!%p7765_p6), %s9039_s29, 2048, %s7769_s26, [#allocation13], %s8976_s3, %s8976_s3, %s8978_s17  }
  0x7d   : > { %p7034_p2 = pneg %p7033_p0 }
  0x7f   : > { %p7041_p10 = pnand %p7040_p9, %p7034_p2 }
  0x81   : > { %7044 = shalt.err (!%p7041_p10)
}
  0x82   : > { %s9040_s19 = sld [smem:[#allocation50_spill]]  ;;  %s7533_s25 = smov [#allocation18]  }
  0x83   : > { %s951_s26 = sshll.u32 %s7533_s25, 4  ;;  %s7534_s23 = smov [#allocation21]   ;;  %s952_s26 = int_to_ptr.vmem [resolvable:$true] %s951_s26 }
  0x84   : > { %s983_s1 = sshll.u32 %s7534_s23, 4  ;;  %s7056_s21 = scalar_lea.vmem %s952_s26, 1024  ;;  %s984_s1 = int_to_ptr.vmem [resolvable:$true] %s983_s1 }
  0x85   : > { %p7057_p11 = scmp.ne.s32.totalorder %s952_s26, %s7056_s21  ;;  %p7064_p0 = scmp.lt.s32.totalorder %s952_s26, %s952_s26 }
  0x86   : > { %p7065_p2 = scmp.lt.s32.totalorder %s7056_s21, %s7056_s21 }
  0x87   : > { %p7059_p12 = pnand %p7057_p11, %p7775_p7 }
  0x88   : > { %6324 = dma.hbm_to_vmem [thread:$0]  (!%p7765_p6), %s9040_s19, 2048, %s908_s2, [#allocation16], %s8976_s3, %s8976_s3, %s8978_s17  }
  0x89   : > { %p7060_p13 = pneg %p7059_p12  ;;  %p7066_p5 = por %p7065_p2, %p7064_p0 }
  0x8b   : > { %p7067_p8 = pnand %p7066_p5, %p7060_p13 }
  0x8d   : > { %7070 = shalt.err (!%p7067_p8)
}
  0x8e   : > { %s9041_s16 = smov 4   ;;  %s9042_s29 = smov 64  }
  0x8f   : > { %s9043_s6 = sld [smem:[#allocation57_spill]]  ;;  %s7082_s2 = scalar_lea.vmem %s984_s1, 1024 }
  0x90   : > { %p7083_p9 = scmp.ne.s32.totalorder %s984_s1, %s7082_s2  ;;  %p7090_p12 = scmp.lt.s32.totalorder %s984_s1, %s984_s1 }
  0x91   : > { %p7091_p4 = scmp.lt.s32.totalorder %s7082_s2, %s7082_s2 }
  0x92   : > { %p7085_p10 = pnand %p7083_p9, %p7775_p7 }
  0x93   : > { %p7092_p1 = por %p7091_p4, %p7090_p12 }
  0x94   : > { %p7086_p11 = pneg %p7085_p10 }
  0x95   : > { %6330 = dma.hbm_to_vmem [thread:$0]  (!%p7765_p6), %s9043_s6, 1024, %s952_s26, [#allocation19], %s9042_s29, %s9042_s29, %s9041_s16  }
  0x96   : > { %p7093_p0 = pnand %p7092_p1, %p7086_p11 }
  0x98   : > { %7096 = shalt.err (!%p7093_p0)
}
  0x99   : > { %s9044_s20 = sld [smem:[#allocation60_spill]]  ;;  %s7535_s21 = smov [#allocation24]  }
  0x9a   : > { %s1007_s23 = sshll.u32 %s7535_s21, 4  ;;  %s1008_s23 = int_to_ptr.vmem [resolvable:$true] %s1007_s23 }
  0x9b   : > { %s7108_s25 = scalar_lea.vmem %s1008_s23, 2048  ;;  %p7116_p8 = scmp.lt.s32.totalorder %s1008_s23, %s1008_s23 }
  0x9c   : > { %p7109_p13 = scmp.ne.s32.totalorder %s1008_s23, %s7108_s25  ;;  %p7117_p4 = scmp.lt.s32.totalorder %s7108_s25, %s7108_s25 }
  0x9e   : > { %p7111_p2 = pnand %p7109_p13, %p7775_p7  ;;  %p7118_p1 = por %p7117_p4, %p7116_p8 }
  0x9f   : > { %6336 = dma.hbm_to_vmem [thread:$0]  (!%p7765_p6), %s9044_s20, 1024, %s984_s1, [#allocation22], %s9042_s29, %s9042_s29, %s9041_s16  }
  0xa0   : > { %p7112_p5 = pneg %p7111_p2 }
  0xa2   : > { %p7119_p9 = pnand %p7118_p1, %p7112_p5 }
  0xa4   : > { %7122 = shalt.err (!%p7119_p9)
}
  0xa5   : > { %s9045_s12 = sld [smem:[#allocation61_spill]]  ;;  %s5582_s1 = sadd.s32 4294967294, %s7491_s11  }
  0xa6   : > { %s7835_s26 = sadd.s32 1, %s7491_s11   ;;  %s105_s21 = sadd.s32 1, %s7487_s0 }
  0xa7   : > { %9046 = sst [smem:[#allocation71_spill]] %s7835_s26  ;;  %s102_s2 = ssub.s32 %s7491_s11, %s7835_s26 }
  0xa8   : > { %p103_p10 = scmp.eq.s32.totalorder %s102_s2, 0  ;;  %p112_p11 = scmp.ne.s32.totalorder %s7487_s0, %s7483_s10 }
  0xa9   : > { %p113_p12 = scmp.eq.s32.totalorder %s7491_s11, 0  ;;  %p118_p0 = scmp.ne.s32.totalorder %s7483_s10, %s7479_s7 }
  0xaa   : > { %s7846_s25 = scalar_select %p103_p10, %s7487_s0, %s105_s21  }
  0xab   : > { %6342 = dma.hbm_to_vmem [thread:$0]  (!%p7765_p6), %s9045_s12, 2048, %s1008_s23, [#allocation25], %s8976_s3, %s8976_s3, %s8978_s17  }
  0xac   : > { %9047 = sst [smem:[#allocation72_spill]] %s7846_s25  ;;  %p114_p13 = por %p113_p12, %p112_p11 }
  0xad   : > { %p9048_p2 = scmp.eq.s32.totalorder %s7751_s18, 0  ;;  %p808_p8 = scmp.eq.s32.totalorder %s7751_s18, 1 }
  0xae   : > { %p814_p4 = scmp.eq.s32.totalorder %s5582_s1, 1  ;;  %p6377_p1 = scmp.lt.s32.totalorder %s7491_s11, 2 }
  0xaf   : > { %p7850_p5 = por %p9048_p2, %p118_p0  ;;  %s7857_s3 = sand.u32 1, %s7487_s0  }
  0xb0   : > { %p7859_p9 = por %p808_p8, %p112_p11  ;;  %p7863_p10 = por %p814_p4, %p118_p0 }
  0xb1   : > { %s9049_s23 = scalar_select %p7850_p5, 1, 0 }
  0xb2   : > { %s9050_s2 = scalar_select %p7859_p9, 1, 0 }
  0xb3   : > { %s9052_s21 = scalar_select %p7863_p10, 1, 0 }
  0xb4   : > { %9051 = sst [smem:[#allocation73_spill]] %s9050_s2  ;;  %p7868_p12 = pnand %p6377_p1, %p114_p13 }
  0xb5   : > { %9053 = sst [smem:[#allocation74_spill]] %s9052_s21  ;;  %s8988_s1 = sand.u32 1, %s7491_s11  }
  0xb6   : > { %s9054_s6 = scalar_select %p7868_p12, 1, 0 }
  0xb7   : > { %s8989_s12 = sshll.u32 %s7857_s3, 3  ;;  %s8984_s19 = sshll.u32 %s7491_s11, 7 }
  0xb8   : > { %s7878_s20 = scalar_lea.hbm %s9032_s9, %s8984_s19  ;;  %s1077_s25 = scalar_lea.vmem [#allocation6], %s8989_s12 }
  0xb9   : > { %s1084_s0 = sshll.u32 %s1077_s25, 4  ;;  %s7884_s17 = scalar_lea.sflag [#allocation7], %s8988_s1  ;;  %s1085_s0 = int_to_ptr.vmem [resolvable:$true] %s1084_s0 }
  0xba   : > { %s7123_s26 = scalar_lea.hbm %s7878_s20, 128  ;;  %p7890_p0 = pneg %p7868_p12 }
  0xbb   : > { %p7124_p11 = scmp.ne.s32.totalorder %s7878_s20, %s7123_s26  ;;  %s7128_s19 = scalar_lea.hbm %s9032_s9, 256 }
  0xbc   : > { %s9055_s21 = scalar_select %p7890_p0, 1, 0 }
  0xbd   : > { %p7126_p13 = pnand %p7890_p0, %p7124_p11  ;;  %p7129_p8 = scmp.lt.s32.totalorder %s7878_s20, %s9032_s9 }
  0xbe   : > { %p7130_p4 = scmp.lt.s32.totalorder %s7128_s19, %s7123_s26 }
  0xbf   : > { %p7127_p2 = pneg %p7126_p13 }
  0xc0   : > { %p7131_p1 = por %p7130_p4, %p7129_p8 }
  0xc2   : > { %p7132_p10 = pnand %p7131_p1, %p7127_p2 }
  0xc4   : > { %7135 = shalt.err (!%p7132_p10)
}
  0xc5   : > { %s7136_s25 = scalar_lea.vmem %s1085_s0, 128  ;;  %s7536_s1 = smov [#allocation6]  }
  0xc6   : > { %p7137_p9 = scmp.ne.s32.totalorder %s1085_s0, %s7136_s25  ;;  %s7141_s12 = sshll.u32 %s7536_s1, 4  ;;  %s7142_s12 = int_to_ptr.vmem [resolvable:$false] %s7141_s12 }
  0xc7   : > { %s7143_s7 = scalar_lea.vmem %s7142_s12, 256  ;;  %p7144_p6 = scmp.lt.s32.totalorder %s1085_s0, %s7142_s12 }
  0xc8   : > { %p7139_p5 = pnand %p7137_p9, %p7890_p0  ;;  %p7145_p7 = scmp.lt.s32.totalorder %s7143_s7, %s7136_s25 }
  0xca   : > { %p7140_p3 = pneg %p7139_p5  ;;  %p7146_p11 = por %p7145_p7, %p7144_p6 }
  0xcc   : > { %p7147_p13 = pnand %p7146_p11, %p7140_p3 }
  0xce   : > { %7150 = shalt.err (!%p7147_p13)
}
  0xcf   : > { %6352 = dma.hbm_to_vmem [thread:$0]  (!%p7868_p12), %s7878_s20, 128, %s1085_s0, %s7884_s17  }
  0xd0   : > { %s9056_s19 = sshll.u32 %s7491_s11, 7  ;;  %s9057_s1 = sshll.u32 %s7857_s3, 6 }
  0xd1   : > { %s7908_s26 = scalar_lea.hbm %s7573_s13, %s9056_s19  ;;  %s1113_s9 = scalar_lea.vmem [#allocation9], %s9057_s1 }
  0xd2   : > { %s1120_s2 = sshll.u32 %s1113_s9, 4  ;;  %s7537_s12 = smov [#allocation14]   ;;  %s7912_s2 = int_to_ptr.vmem [resolvable:$true] %s1120_s2 }
  0xd3   : > { %s891_s7 = sshll.u32 %s7537_s12, 4  ;;  %p9058_p6 = scmp.ne.s32.totalorder %s9037_s15, 0  ;;  %s892_s7 = int_to_ptr.vmem [resolvable:$true] %s891_s7 }
  0xd4   : > { %s7162_s25 = scalar_lea.vmem %s892_s7, 1024  ;;  %p7170_p9 = scmp.lt.s32.totalorder %s892_s7, %s892_s7 }
  0xd5   : > { %p7163_p3 = scmp.ne.s32.totalorder %s892_s7, %s7162_s25  ;;  %p7171_p10 = scmp.lt.s32.totalorder %s7162_s25, %s7162_s25 }
  0xd7   : > { %p7165_p7 = pnand %p7163_p3, %p9058_p6  ;;  %p7172_p2 = por %p7171_p10, %p7170_p9 }
  0xd9   : > { %p7166_p5 = pneg %p7165_p7 }
  0xdb   : > { %p7173_p8 = pnand %p7172_p2, %p7166_p5 }
  0xdd   : > { %7176 = shalt.err (!%p7173_p8)
}
  0xde   : > { %p9059_p4 = scmp.ne.s32.totalorder %s9036_s28, 0  ;;  %s9060_s8 = sld [smem:[#allocation48_spill]] }
  0xdf   : > { %s7538_s9 = smov [#allocation17]   ;;  %s7539_s0 = smov [#allocation20]  }
  0xe0   : > { %s923_s20 = sshll.u32 %s7538_s9, 4  ;;  %s967_s19 = sshll.u32 %s7539_s0, 4  ;;  %s924_s20 = int_to_ptr.vmem [resolvable:$true] %s923_s20  ;;  %s968_s19 = int_to_ptr.vmem [resolvable:$true] %s967_s19 }
  0xe1   : > { %s7188_s1 = scalar_lea.vmem %s924_s20, 2048  ;;  %p7196_p3 = scmp.lt.s32.totalorder %s924_s20, %s924_s20 }
  0xe2   : > { %p7189_p1 = scmp.ne.s32.totalorder %s924_s20, %s7188_s1  ;;  %p7197_p7 = scmp.lt.s32.totalorder %s7188_s1, %s7188_s1 }
  0xe4   : > { %6321 = dma.hbm_to_vmem [thread:$0]  (!%p9059_p4), %s9060_s8, 1024, %s892_s7, [#allocation13], %s9042_s29, %s9042_s29, %s9041_s16  }
  0xe5   : > { %p7191_p11 = pnand %p7189_p1, %p9058_p6  ;;  %p7198_p5 = por %p7197_p7, %p7196_p3 }
  0xe7   : > { %p7192_p13 = pneg %p7191_p11 }
  0xe9   : > { %p7199_p9 = pnand %p7198_p5, %p7192_p13 }
  0xeb   : > { %7202 = shalt.err (!%p7199_p9)
}
  0xec   : > { %6327 = dma.hbm_to_vmem [thread:$0]  (!%p9059_p4), %s7623_s30, 2048, %s924_s20, [#allocation16], %s9042_s29, %s9042_s29, %s9041_s16  }
  0xed   : > { %s7214_s12 = scalar_lea.vmem %s968_s19, 2048  ;;  %p7222_p1 = scmp.lt.s32.totalorder %s968_s19, %s968_s19 }
  0xee   : > { %p7215_p10 = scmp.ne.s32.totalorder %s968_s19, %s7214_s12  ;;  %p7223_p11 = scmp.lt.s32.totalorder %s7214_s12, %s7214_s12 }
  0xf0   : > { %p7217_p2 = pnand %p7215_p10, %p9058_p6  ;;  %p7224_p12 = por %p7223_p11, %p7222_p1 }
  0xf2   : > { %p7218_p8 = pneg %p7217_p2 }
  0xf4   : > { %p7225_p0 = pnand %p7224_p12, %p7218_p8 }
  0xf6   : > { %7228 = shalt.err (!%p7225_p0)
}
  0xf7   : > { %s9061_s7 = smov 8   ;;  %s9062_s25 = smov 128  }
  0xf8   : > { %6333 = dma.hbm_to_vmem [thread:$0]  (!%p9059_p4), %s7663_s27, 2048, %s968_s19, [#allocation19], %s9062_s25, %s9062_s25, %s9061_s7  }
  0xf9   : > { %s7540_s9 = smov [#allocation23]   ;;  %s7541_s0 = smov [#allocation26]  }
  0xfa   : > { %s997_s20 = sshll.u32 %s7540_s9, 4  ;;  %s1023_s1 = sshll.u32 %s7541_s0, 4  ;;  %s998_s20 = int_to_ptr.vmem [resolvable:$true] %s997_s20  ;;  %s1024_s1 = int_to_ptr.vmem [resolvable:$true] %s1023_s1 }
  0xfb   : > { %s7240_s8 = scalar_lea.vmem %s998_s20, 16  ;;  %s7247_s12 = scalar_lea.vmem %s998_s20, 32 }
  0xfc   : > { %p7241_p13 = scmp.ne.s32.totalorder %s998_s20, %s7240_s8  ;;  %p7248_p0 = scmp.lt.s32.totalorder %s998_s20, %s998_s20 }
  0xfd   : > { %p7249_p7 = scmp.lt.s32.totalorder %s7247_s12, %s7240_s8 }
  0xfe   : > { %p7243_p3 = pnand %p7241_p13, %p9058_p6 }
  0xff   : > { %p7250_p5 = por %p7249_p7, %p7248_p0 }
 0x100   : > { %p7244_p12 = pneg %p7243_p3 }
 0x102   : > { %p7251_p9 = pnand %p7250_p5, %p7244_p12 }
 0x104   : > { %7254 = shalt.err (!%p7251_p9)
}
 0x105   : > { %6339 = dma.hbm_to_vmem [thread:$0]  (!%p9059_p4), %s7678_s24, 16, %s998_s20, [#allocation22]  }
 0x106   : > { %s7266_s19 = scalar_lea.vmem %s1024_s1, 2048  ;;  %p7274_p1 = scmp.lt.s32.totalorder %s1024_s1, %s1024_s1 }
 0x107   : > { %p7267_p10 = scmp.ne.s32.totalorder %s1024_s1, %s7266_s19  ;;  %p7275_p11 = scmp.lt.s32.totalorder %s7266_s19, %s7266_s19 }
 0x109   : > { %p7269_p2 = pnand %p7267_p10, %p9058_p6  ;;  %p7276_p13 = por %p7275_p11, %p7274_p1 }
 0x10b   : > { %p7270_p8 = pneg %p7269_p2 }
 0x10d   : > { %p7277_p3 = pnand %p7276_p13, %p7270_p8 }
 0x10f   : > { %7280 = shalt.err (!%p7277_p3)
}
 0x110   : > { %6345 = dma.hbm_to_vmem [thread:$0]  (!%p9059_p4), %s7693_s14, 2048, %s1024_s1, [#allocation25], %s9042_s29, %s9042_s29, %s9041_s16  }
 0x111   : > { %s5813_s8 = sshll.u32 %s7491_s11, 10  ;;  %s9063_s15 = sshll.u32 %s7857_s3, 6 }
 0x112   : > { %s1056_s9 = scalar_lea.vmem [#allocation3], %s9063_s15  ;;  %s7957_s0 = scalar_lea.hbm %s9031_s5, %s5813_s8 }
 0x113   : > { %s1063_s20 = sshll.u32 %s1056_s9, 4  ;;  %s1053_s28 = scalar_lea.sflag [#allocation4], %s7857_s3  ;;  %s7959_s20 = int_to_ptr.vmem [resolvable:$true] %s1063_s20 }
 0x114   : > { %s7281_s12 = scalar_lea.hbm %s7957_s0, 1024  ;;  %p9064_p12 = scmp.ne.s32.totalorder %s9055_s21, 0 }
 0x115   : > { %p7282_p6 = scmp.ne.s32.totalorder %s7957_s0, %s7281_s12  ;;  %s7286_s19 = scalar_lea.hbm %s9031_s5, 2048 }
 0x116   : > { %p7287_p4 = scmp.lt.s32.totalorder %s7957_s0, %s9031_s5  ;;  %p7288_p5 = scmp.lt.s32.totalorder %s7286_s19, %s7281_s12 }
 0x117   : > { %p7284_p0 = pnand %p7282_p6, %p9064_p12 }
 0x118   : > { %p7289_p9 = por %p7288_p5, %p7287_p4 }
 0x119   : > { %p7285_p7 = pneg %p7284_p0 }
 0x11b   : > { %p7290_p10 = pnand %p7289_p9, %p7285_p7 }
 0x11d   : > { %7293 = shalt.err (!%p7290_p10)
}
 0x11e   : > { %s7294_s29 = scalar_lea.vmem %s7959_s20, 1024  ;;  %s7542_s16 = smov [#allocation3]  }
 0x11f   : > { %p7295_p2 = scmp.ne.s32.totalorder %s7959_s20, %s7294_s29  ;;  %s7299_s1 = sshll.u32 %s7542_s16, 4  ;;  %s7300_s1 = int_to_ptr.vmem [resolvable:$false] %s7299_s1 }
 0x120   : > { %s7301_s15 = scalar_lea.vmem %s7300_s1, 2048  ;;  %p7302_p11 = scmp.lt.s32.totalorder %s7959_s20, %s7300_s1 }
 0x121   : > { %p7297_p8 = pnand %p7295_p2, %p9064_p12  ;;  %p7303_p13 = scmp.lt.s32.totalorder %s7301_s15, %s7294_s29 }
 0x123   : > { %p7298_p1 = pneg %p7297_p8  ;;  %p7304_p3 = por %p7303_p13, %p7302_p11 }
 0x125   : > { %p7305_p6 = pnand %p7304_p3, %p7298_p1 }
 0x127   : > { %7308 = shalt.err (!%p7305_p6)
}
 0x128   : > { %p9065_p0 = scmp.ne.s32.totalorder %s9054_s6, 0  ;;  %s9066_s9 = sld [smem:[#allocation43_spill]] }
 0x129   : > { %s9067_s19 = sshll.u32 %s7857_s3, 3  ;;  %s7309_s1 = scalar_lea.hbm %s7908_s26, 128 }
 0x12a   : > { %6349 = dma.hbm_to_vmem [thread:$0]  (!%p9065_p0), %s7957_s0, 1024, %s7959_s20, %s1053_s28, %s9062_s25, %s9062_s25, %s9061_s7  }
 0x12b   : > { %s1095_s29 = scalar_lea.vmem [#allocation8], %s9067_s19  ;;  %p7310_p7 = scmp.ne.s32.totalorder %s7908_s26, %s7309_s1 }
 0x12c   : > { %s1102_s16 = sshll.u32 %s1095_s29, 4  ;;  %s7314_s15 = scalar_lea.hbm %s7573_s13, 256  ;;  %s1103_s16 = int_to_ptr.vmem [resolvable:$true] %s1102_s16 }
 0x12d   : > { %p7312_p4 = pnand %p7310_p7, %p9064_p12  ;;  %p7315_p9 = scmp.lt.s32.totalorder %s7908_s26, %s7573_s13 }
 0x12e   : > { %s7984_s12 = scalar_lea.hbm %s9066_s9, %s5813_s8  ;;  %p7316_p10 = scmp.lt.s32.totalorder %s7314_s15, %s7309_s1 }
 0x12f   : > { %p7313_p5 = pneg %p7312_p4 }
 0x130   : > { %p7317_p2 = por %p7316_p10, %p7315_p9 }
 0x132   : > { %p7318_p8 = pnand %p7317_p2, %p7313_p5 }
 0x134   : > { %7321 = shalt.err (!%p7318_p8)
}
 0x135   : > { %s7322_s5 = scalar_lea.vmem %s1103_s16, 128  ;;  %s7543_s3 = smov [#allocation8]  }
 0x136   : > { %p7323_p1 = scmp.ne.s32.totalorder %s1103_s16, %s7322_s5  ;;  %s7327_s8 = sshll.u32 %s7543_s3, 4  ;;  %s7328_s8 = int_to_ptr.vmem [resolvable:$false] %s7327_s8 }
 0x137   : > { %s7329_s20 = scalar_lea.vmem %s7328_s8, 256  ;;  %p7330_p3 = scmp.lt.s32.totalorder %s1103_s16, %s7328_s8 }
 0x138   : > { %p7325_p11 = pnand %p7323_p1, %p9064_p12  ;;  %p7331_p6 = scmp.lt.s32.totalorder %s7329_s20, %s7322_s5 }
 0x13a   : > { %p7326_p13 = pneg %p7325_p11  ;;  %p7332_p7 = por %p7331_p6, %p7330_p3 }
 0x13c   : > { %p7333_p4 = pnand %p7332_p7, %p7326_p13 }
 0x13e   : > { %7336 = shalt.err (!%p7333_p4)
}
 0x13f   : > { %6355 = dma.hbm_to_vmem [thread:$0]  (!%p9065_p0), %s7908_s26, 128, %s1103_s16, %s7884_s17  }
 0x140   : > { %s9068_s0 = sand.u32 1, %s7491_s11   ;;  %s7337_s19 = scalar_lea.hbm %s7984_s12, 1024 }
 0x141   : > { %s1110_s28 = scalar_lea.sflag [#allocation10], %s9068_s0  ;;  %p7338_p5 = scmp.ne.s32.totalorder %s7984_s12, %s7337_s19 }
 0x142   : > { %s7342_s5 = scalar_lea.hbm %s9066_s9, 2048  ;;  %p7343_p2 = scmp.lt.s32.totalorder %s7984_s12, %s9066_s9 }
 0x143   : > { %p7340_p9 = pnand %p7338_p5, %p9064_p12  ;;  %p7344_p8 = scmp.lt.s32.totalorder %s7342_s5, %s7337_s19 }
 0x145   : > { %p7341_p10 = pneg %p7340_p9  ;;  %p7345_p1 = por %p7344_p8, %p7343_p2 }
 0x147   : > { %p7346_p11 = pnand %p7345_p1, %p7341_p10 }
 0x149   : > { %7349 = shalt.err (!%p7346_p11)
}
 0x14a   : > { %s7350_s29 = scalar_lea.vmem %s7912_s2, 1024  ;;  %s7544_s17 = smov [#allocation9]  }
 0x14b   : > { %p7351_p13 = scmp.ne.s32.totalorder %s7912_s2, %s7350_s29  ;;  %s7355_s26 = sshll.u32 %s7544_s17, 4  ;;  %s7356_s26 = int_to_ptr.vmem [resolvable:$false] %s7355_s26 }
 0x14c   : > { %s7357_s16 = scalar_lea.vmem %s7356_s26, 2048  ;;  %p7358_p7 = scmp.lt.s32.totalorder %s7912_s2, %s7356_s26 }
 0x14d   : > { %p7353_p3 = pnand %p7351_p13, %p9064_p12  ;;  %p7359_p4 = scmp.lt.s32.totalorder %s7357_s16, %s7350_s29 }
 0x14f   : > { %p7354_p6 = pneg %p7353_p3  ;;  %p7360_p5 = por %p7359_p4, %p7358_p7 }
 0x151   : > { %p7361_p9 = pnand %p7360_p5, %p7354_p6 }
 0x153   : > { %7364 = shalt.err (!%p7361_p9)
}
 0x154   : > { %6358 = dma.hbm_to_vmem [thread:$0]  (!%p9065_p0), %s7984_s12, 1024, %s7912_s2, %s1110_s28, %s9062_s25, %s9062_s25, %s9061_s7  }
 0x155   : > { %p9069_p12 = scmp.ne.s32.totalorder %s9035_s22, 0 }
 0x156   : > { %s8025_s21 = sand.u32 (!%p9069_p12), 1, %s7483_s10   ;;  %p9070_p10 = scmp.ne.s32.totalorder (!%p9069_p12), %s9049_s23, 0 }
 0x157   : > { %1132 = sbr.rel (%p9069_p12) target bundleno = 6025 (0x1789), region = 148  ;;  %s8028_s1 = sshll.u32 (!%p9069_p12), %s8025_s21, 6 }
 0x158   : > { %s1135_s15 = scalar_lea.sflag (!%p9069_p12), [#allocation4], %s8025_s21  ;;  %s8032_s6 = scalar_lea.vmem (!%p9069_p12), [#allocation3], %s8028_s1 }
 0x15c   : > { %7434 = dma.done.wait (%p9070_p10), %s1135_s15, 1024  }
 0x15d   : > { %7436 = vsyncadd (%p9070_p10), %s1135_s15, 4294966272  ;;  %s1143_s22 = sand.u32 1, %s7751_s18   ;;  %s8040_s2 = sshll.u32 %s8025_s21, 3 }
 0x15e   : > { %s1144_s7 = scalar_lea.sflag [#allocation7], %s1143_s22  ;;  %s1147_s25 = scalar_lea.vmem [#allocation6], %s8040_s2 }
 0x15f   : > { %7438 = dma.done.wait (%p9070_p10), %s1144_s7, 256  }
 0x160   : > { %7440 = vsyncadd (%p9070_p10), %s1144_s7, 4294967040  ;;  %s1156_s12 = scalar_lea.vmem [#allocation8], %s8040_s2  ;;  %s1162_s3 = scalar_lea.sflag [#allocation10], %s1143_s22 }
 0x161   : > { %s8049_s8 = scalar_lea.vmem [#allocation9], %s8028_s1 }
 0x162   : > { %7442 = dma.done.wait (%p9070_p10), %s1162_s3, 1024  }
 0x163   : > { %7444 = vsyncadd (%p9070_p10), %s1162_s3, 4294966272  ;;  %p9071_p0 = scmp.eq.s32.totalorder %s7751_s18, 0 }
 0x165   : > { %7446 = dma.done.wait (%p9071_p0), [#allocation10], 1024   ;;  %p9072_p2 = pmov %p9071_p0 }
 0x166   : > { %p9073_p8 = pmov %p9071_p0 }
 0x167   : > { %7448 = vsyncadd (%p9072_p2), [#allocation10], 4294966272 }
 0x168   : > { %7450 = dma.done.wait (%p9073_p8), [#allocation13], 3072   ;;  %p9074_p1 = pmov %p9071_p0 }
 0x169   : > { %p9075_p11 = pmov %p9071_p0 }
 0x16a   : > { %7452 = vsyncadd (%p9074_p1), [#allocation13], 4294964224 }
 0x16b   : > { %7454 = dma.done.wait (%p9075_p11), [#allocation16], 4096   ;;  %p9076_p13 = pmov %p9071_p0 }
 0x16c   : > { %p9077_p3 = pmov %p9071_p0 }
 0x16d   : > { %7456 = vsyncadd (%p9076_p13), [#allocation16], 4294963200 }
 0x16e   : > { %7458 = dma.done.wait (%p9077_p3), [#allocation19], 3072   ;;  %p9078_p6 = pmov %p9071_p0 }
 0x16f   : > { %p9079_p7 = pmov %p9071_p0 }
 0x170   : > { %7460 = vsyncadd (%p9078_p6), [#allocation19], 4294964224 }
 0x171   : > { %7462 = dma.done.wait (%p9079_p7), [#allocation22], 1040   ;;  %p9080_p4 = pmov %p9071_p0 }
 0x172   : > { %p9081_p5 = pmov %p9071_p0 }
 0x173   : > { %7464 = vsyncadd (%p9080_p4), [#allocation22], 4294966256 }
 0x174   : > { %7466 = dma.done.wait (%p9081_p5), [#allocation25], 4096   ;;  %p9082_p9 = pmov %p9071_p0 }
 0x175   : > { %v7545_v0 = vmov 0   ;;  %v7546_v1 = vmov 0.0   ;;  %vm7547_vm0 = vmmov 0   ;;  %v6618_v2 = vld [vmem:[#allocation12 + $0x74] ss:$8 sps:$4 sm:$0xff]   ;;  %v6644_v17 = vld [vmem:[#allocation11 + $0x28] sm:$0xff]   ;;  %v1482_v40 = vlaneseq }
 0x176   : > { %7468 = vsyncadd (%p9082_p9), [#allocation25], 4294963200  ;;  %1604 = vmatprep.mubr.bf16.mxu1 %v7545_v0  ;;  %5996 = vmatprep.subr.bf16.mxu0 %v7546_v1  ;;  %v6620_v3 = vld [vmem:[#allocation12 + $0x70] ss:$8 sps:$4 sm:$0xff]   ;;  %v6621_v4 = vld [vmem:[#allocation12 + $0x64] ss:$8 sps:$4 sm:$0xff]  }
 0x177   : > { %6012 = vmatprep.mubr.msk.bf16.mxu0 %vm7547_vm0, %v7546_v1  ;;  %1572 = vmatprep.subr.bf16.mxu1 %v6618_v2  ;;  %v6623_v5 = vld [vmem:[#allocation12 + $0x60] ss:$8 sps:$4 sm:$0xff]   ;;  %v6624_v6 = vld [vmem:[#allocation12 + $0x54] ss:$8 sps:$4 sm:$0xff]   ;;  %v6626_v7 = vld [vmem:[#allocation12 + $0x50] ss:$8 sps:$4 sm:$0xff]  }
 0x178   : > { %1573 = vmatpush1.bf16.msra.mxu1 %v6620_v3  ;;  %v6627_v8 = vld [vmem:[#allocation12 + $0x44] ss:$8 sps:$4 sm:$0xff]   ;;  %v6629_v9 = vld [vmem:[#allocation12 + $0x40] ss:$8 sps:$4 sm:$0xff]   ;;  %v6630_v10 = vld [vmem:[#allocation12 + $0x34] ss:$8 sps:$4 sm:$0xff]  }
 0x179   : > { %1574 = vmatprep.subr.bf16.mxu1 %v6621_v4  ;;  %v6632_v11 = vld [vmem:[#allocation12 + $0x30] ss:$8 sps:$4 sm:$0xff]   ;;  %v6633_v13 = vld [vmem:[#allocation12 + $0x24] ss:$8 sps:$4 sm:$0xff]   ;;  %v6635_v15 = vld [vmem:[#allocation12 + $0x20] ss:$8 sps:$4 sm:$0xff]  }
 0x17a   : > { %v6642_v12 = vld [vmem:[#allocation11 + $0x38] sm:$0xff]   ;;  %v6643_v14 = vld [vmem:[#allocation11 + $0x30] sm:$0xff]   ;;  %v6639_v19 = vld [vmem:[#allocation12 + $0x4] ss:$8 sps:$4 sm:$0xff]   ;;  %s9083_s23 = sld [smem:[#allocation47_spill]]  ;;  %v1483_v41 = vshrl.u32 %v1482_v40, 7 }
 0x17b   : > { %5997 = vmatpush3.bf16.msra.mxu0 %v6642_v12  ;;  %v6636_v16 = vld [vmem:[#allocation12 + $0x14] ss:$8 sps:$4 sm:$0xff]   ;;  %v6638_v18 = vld [vmem:[#allocation12 + $0x10] ss:$8 sps:$4 sm:$0xff]   ;;  %v6645_v20 = vld [vmem:[#allocation11 + $0x20] sm:$0xff]   ;;  %s7548_s20 = smov 96  }
 0x17c   : > { %1575 = vmatpush1.bf16.msra.mxu1 %v6623_v5  ;;  %5998 = vmatprep.subr.bf16.mxu0 %v7546_v1  ;;  %v6641_v21 = vld [vmem:[#allocation12] ss:$8 sps:$4 sm:$0xff]   ;;  %v6646_v24 = vld [vmem:[#allocation11 + $0x18] sm:$0xff]   ;;  %v6647_v26 = vld [vmem:[#allocation11 + $0x10] sm:$0xff]   ;;  %v8121_v42 = vsub.s32 0, %v1483_v41  ;;  %s9084_s0 = sld [smem:[#allocation45_spill]] }
 0x17d   : > { %1576 = vmatprep.subr.bf16.mxu1 %v6624_v6  ;;  %v1313_v22 = vld [vmem:[%s8032_s6] sm:$0xff]  ;;  %v1314_v23 = vld [vmem:[%s8032_s6 + $0x8] sm:$0xff]  ;;  %v1315_v27 = vld [vmem:[%s8032_s6 + $0x10] sm:$0xff]  ;;  %s7549_s28 = smov 32   ;;  %s7550_s19 = smov 64   ;;  %vm1685_vm1 = vcmask 261120  }
 0x17e   : > { %v8089_v25 = vpack.c.bf16 %v1314_v23, %v1313_v22  ;;  %v1316_v28 = vld [vmem:[%s8032_s6 + $0x18] sm:$0xff]  ;;  %v6648_v29 = vld [vmem:[#allocation11 + $0x8] sm:$0xff]   ;;  %v6649_v31 = vld [vmem:[#allocation11] sm:$0xff]   ;;  %vm1729_vm2 = vcmask 523264   ;;  %s9085_s5 = sld [smem:[#allocation49_spill]]  ;;  %vm1973_vm3 = vcmask 523520  }
 0x17f   : > { %5999 = vmatpush3.bf16.msra.mxu0 %v6643_v14  ;;  %v8098_v30 = vpack.c.bf16 %v1316_v28, %v1315_v27  ;;  %v1321_v32 = vld [vmem:[%s1147_s25] sm:$0xff]  ;;  %v1319_v37 = vld [vmem:[%s8032_s6 + $0x30] sm:$0xff]  ;;  %v1320_v38 = vld [vmem:[%s8032_s6 + $0x38] sm:$0xff]  ;;  %vm2149_vm4 = vcmask 785920   ;;  %vm2325_vm5 = vcmask 1048320   ;;  %s9086_s29 = sld [smem:[#allocation53_spill]] }
 0x180   : > { %1577 = vmatpush1.bf16.msra.mxu1 %v6626_v7  ;;  %6000 = vmatprep.subr.bf16.mxu0 %v7546_v1  ;;  %v1317_v33 = vld [vmem:[%s8032_s6 + $0x20] sm:$0xff]  ;;  %v1318_v34 = vld [vmem:[%s8032_s6 + $0x28] sm:$0xff]  ;;  %v1382_v35 = vpack.c.bf16 %v1321_v32, %v1321_v32  ;;  %v8116_v39 = vpack.c.bf16 %v1320_v38, %v1319_v37  ;;  %s9087_s17 = sld [smem:[#allocation54_spill]]  ;;  %s1311_s3 = scalar_lea.vmem [#allocation28], %s8040_s2  ;;  %vm3343_vm6 = vcmask 1043456   ;;  %vm3238_vm7 = vcmask 64512  }
 0x181   : > { %1578 = vmatprep.subr.bf16.mxu1 %v6627_v8  ;;  %v8108_v36 = vpack.c.bf16 %v1318_v34, %v1317_v33  ;;  %v1364_v43 = vld [vmem:[%s9083_s23] sm:$0x3]  ;;  %s9088_s26 = sld [smem:[#allocation51_spill]] }
 0x182   : > { %v1485_v44 = vrot.slane %v1364_v43, %v8121_v42  ;;  %s9089_s16 = sld [smem:[#allocation52_spill]] }
 0x183   : > { %6001 = vmatpush3.bf16.msra.mxu0 %v6644_v17  ;;  %s9090_s15 = sld [smem:[#allocation55_spill]] }
 0x184   : > { %1579 = vmatpush1.bf16.msra.mxu1 %v6629_v9  ;;  %6002 = vmatprep.subr.bf16.mxu0 %v7546_v1  ;;  %v8135_v9 = vsub.s32 1, %v1483_v41  ;;  %s9091_s22 = sld [smem:[#allocation56_spill]] }
 0x185   : > { %1580 = vmatprep.subr.bf16.mxu1 %v6630_v10  ;;  %s9092_s7 = sld [smem:[#allocation59_spill]] }
 0x186   : > { %s9096_s23 = sld [smem:[#allocation62_spill]] }
 0x187   : > { %6003 = vmatpush3.bf16.msra.mxu0 %v6645_v20 }
 0x188   : > { %1581 = vmatpush1.bf16.msra.mxu1 %v6632_v11  ;;  %6004 = vmatprep.subr.bf16.mxu0 %v7546_v1 }
 0x189   : > { %1582 = vmatprep.subr.bf16.mxu1 %v6633_v13  ;;  %v1489_v13 = vrot.slane %v1364_v43, %v8135_v9 }
 0x18b   : > { %6005 = vmatpush3.bf16.msra.mxu0 %v6646_v24 }
 0x18c   : > { %1583 = vmatpush1.bf16.msra.mxu1 %v6635_v15  ;;  %6006 = vmatprep.subr.bf16.mxu0 %v7546_v1 }
 0x18d   : > { %1584 = vmatprep.subr.bf16.mxu1 %v6636_v16 }
 0x18f   : > { %6007 = vmatpush3.bf16.msra.mxu0 %v6647_v26 }
 0x190   : > { %1585 = vmatpush1.bf16.msra.mxu1 %v6638_v18  ;;  %6008 = vmatprep.subr.bf16.mxu0 %v7546_v1 }
 0x191   : > { %1586 = vmatprep.subr.bf16.mxu1 %v6639_v19 }
 0x193   : > { %6009 = vmatpush3.bf16.msra.mxu0 %v6648_v29 }
 0x194   : > { %1587 = vmatpush1.bf16.msra.mxu1 %v6641_v21  ;;  %6010 = vmatprep.subr.bf16.mxu0 %v7546_v1 }
 0x195   : > { %6016 = vmatprep.subr.bf16.mxu1 %v7546_v1 }
 0x197   : > { %1605 = vmatmul.mubr.bf16.vlgmr.msra.gmra.mxu1 %v8089_v25  ;;  %6011 = vmatpush3.bf16.msra.mxu0 %v6649_v31  ;;  %v5624_v31 = vld [vmem:[%s9084_s0] ss:$0 sm:$0xff]  ;;  %s5810_s0 = sshll.u32 %s7751_s18, 7 }
 0x198   : > { %1614 = vmatprep.mubr.bf16.mxu1 %v7545_v0  ;;  %6024 = vmatprep.subr.bf16.mxu0 %v7546_v1 }
 0x19a   : > { %6013 = vmatmul.mubr.bf16.vlgmr.msra.gmra.mxu0 %v1382_v35 }
 0x19b   : > { %6032 = vmatprep.mubr.msk.bf16.mxu0 %vm7547_vm0, %v7546_v1 }
 0x19f   : > { %1615 = vmatmul.mubr.bf16.gmra.mxu1 %v8098_v30 }
 0x1a0   : > { %1624 = vmatprep.mubr.bf16.mxu1 %v7545_v0 }
 0x1a7   : > { %1625 = vmatmul.mubr.bf16.gmra.mxu1 %v8108_v36 }
 0x1a8   : > { %1634 = vmatprep.mubr.bf16.mxu1 %v7545_v0 }
 0x1af   : > { %1635 = vmatmul.mubr.bf16.gmra.mxu1 %v8116_v39 }
 0x1b0   : > { %6020 = vmatprep.mubr.msk.bf16.mxu1 %vm7547_vm0, %v7546_v1 }
 0x257   : > { %v1606_v45 = vpop.f32.mrf.mxu1 }
 0x258   : > { %v1607_v46 = vadd.f32 %v1606_v45, %v1485_v44 }
 0x259   : > { %v1608_v47 = vpop.f32.mrf.mxu1 }
 0x25a   : > { %1647 = vxpose.xlu0.b32.start [1/8] (short) (narrow) %v1607_v46, 32  ;;  %v1475_v57 = vpop.f32.mrf.mxu0  ;;  %v1609_v28 = vadd.f32 %v1608_v47, %v1489_v13 }
 0x25b   : > { %v1610_v48 = vpop.f32.mrf.mxu1  ;;  %v1476_v32 = vadd.f32 %v5624_v31, %v1475_v57 }
 0x25c   : > { %v1611_v49 = vadd.f32 %v1610_v48, %v1485_v44  ;;  %v6014_v60 = vpop.f32.mrf.mxu0 }
 0x25d   : > { %v1612_v50 = vpop.f32.mrf.mxu1  ;;  %v1645_v33 = vmul.f32 0.17677669, %v1476_v32 }
 0x25e   : > { %1648 = vxpose.xlu0.b32.cont [2/8] (short) (narrow) %v1611_v49, 32  ;;  %v8125_v51 = vpack.i.bf16 %v1611_v49, %v1607_v46  ;;  %v1478_v63 = vpop.f32.mrf.mxu0  ;;  %v1613_v26 = vadd.f32 %v1612_v50, %v1489_v13 }
 0x25f   : > { %v1616_v52 = vpop.f32.mrf.mxu1  ;;  %v1646_v34 = vpack.c.bf16 %v1645_v33, %v1645_v33 }
 0x260   : > { %v1617_v53 = vadd.f32 %v1616_v52, %v1485_v44  ;;  %6479 = vrot.lane.b32.xlu1 %v8125_v51, %s7548_s20  ;;  %v6015_v3 = vpop.f32.mrf.mxu0  ;;  %v8152_v29 = vpack.c.bf16 %v1613_v26, %v1609_v28 }
 0x261   : > { %v1618_v54 = vpop.f32.mrf.mxu1 }
 0x262   : > { %1649 = vxpose.xlu0.b32.cont [3/8] (short) (narrow) %v1617_v53, 32  ;;  %v1619_v24 = vadd.f32 %v1618_v54, %v1489_v13 }
 0x263   : > { %v1620_v55 = vpop.f32.mrf.mxu1 }
 0x264   : > { %v1621_v56 = vadd.f32 %v1620_v55, %v1485_v44 }
 0x265   : > { %v1622_v58 = vpop.f32.mrf.mxu1 }
 0x266   : > { %1650 = vxpose.xlu0.b32.cont [4/8] (short) (narrow) %v1621_v56, 32  ;;  %v8129_v59 = vpack.i.bf16 %v1621_v56, %v1617_v53  ;;  %v1623_v22 = vadd.f32 %v1622_v58, %v1489_v13 }
 0x267   : > { %v1626_v61 = vpop.f32.mrf.mxu1 }
 0x268   : > { %v1627_v62 = vadd.f32 %v1626_v61, %v1485_v44  ;;  %6484 = vrot.lane.b32.xlu1 %v8129_v59, %s7548_s20  ;;  %v8148_v27 = vpack.c.bf16 %v1623_v22, %v1619_v24 }
 0x269   : > { %v1628_v2 = vpop.f32.mrf.mxu1 }
 0x26a   : > { %1651 = vxpose.xlu0.b32.cont [5/8] (short) (narrow) %v1627_v62, 32  ;;  %v1629_v21 = vadd.f32 %v1628_v2, %v1489_v13 }
 0x26b   : > { %v1630_v4 = vpop.f32.mrf.mxu1 }
 0x26c   : > { %v1631_v5 = vadd.f32 %v1630_v4, %v1485_v44 }
 0x26d   : > { %v1632_v6 = vpop.f32.mrf.mxu1 }
 0x26e   : > { %1652 = vxpose.xlu0.b32.cont [6/8] (short) (narrow) %v1631_v5, 32  ;;  %v8133_v7 = vpack.i.bf16 %v1631_v5, %v1627_v62  ;;  %v1633_v19 = vadd.f32 %v1632_v6, %v1489_v13 }
 0x26f   : > { %v1636_v8 = vpop.f32.mrf.mxu1 }
 0x270   : > { %v1637_v10 = vadd.f32 %v1636_v8, %v1485_v44  ;;  %6489 = vrot.lane.b32.xlu1 %v8133_v7, %s7548_s20  ;;  %v8144_v23 = vpack.c.bf16 %v1633_v19, %v1629_v21 }
 0x271   : > { %v1638_v11 = vpop.f32.mrf.mxu1 }
 0x272   : > { %1653 = vxpose.xlu0.b32.cont [7/8] (short) (narrow) %v1637_v10, 32  ;;  %v1639_v16 = vadd.f32 %v1638_v11, %v1489_v13 }
 0x273   : > { %v1640_v12 = vpop.f32.mrf.mxu1 }
 0x274   : > { %v1641_v14 = vadd.f32 %v1640_v12, %v1485_v44 }
 0x275   : > { %v1642_v15 = vpop.f32.mrf.mxu1 }
 0x276   : > { %v1643_v17 = vadd.f32 %v1642_v15, %v1489_v13  ;;  %1654 = vxpose.xlu0.b32.end [8/8] (short) (narrow) %v1641_v14, 32  ;;  %v6518_v18 = vpack.i.bf16 %v1641_v14, %v1637_v10 }
 0x278   : > { %v8140_v20 = vpack.c.bf16 %v1643_v17, %v1639_v16 }
 0x27a   : > { %6025 = vmatpush3.bf16.msra.mxu0 %v8140_v20 }
 0x27b   : > { %6026 = vmatprep.subr.bf16.mxu0 %v7546_v1 }
 0x27e   : > { %6027 = vmatpush3.bf16.msra.mxu0 %v8144_v23 }
 0x27f   : > { %6028 = vmatprep.subr.bf16.mxu0 %v7546_v1 }
 0x282   : > { %6029 = vmatpush3.bf16.msra.mxu0 %v8148_v27 }
 0x283   : > { %6030 = vmatprep.subr.bf16.mxu0 %v7546_v1 }
 0x286   : > { %6031 = vmatpush3.bf16.msra.mxu0 %v8152_v29 }
 0x287   : > { %6036 = vmatprep.subr.bf16.mxu0 %v7546_v1 }
 0x29f   : > { %6499 = vrot.lane.b32.xlu0 %v6518_v18, %s7548_s20 }
 0x2a3   : > { %6529 = vrot.lane.b32.xlu0 %v8133_v7, %s7549_s28 }
 0x2a7   : > { %6534 = vrot.lane.b32.xlu0 %v6518_v18, %s7549_s28 }
 0x2ab   : > { %1853 = vrot.lane.b32.xlu0 %v1646_v34, %s7548_s20 }
 0x2af   : > { %2033 = vrot.lane.b32.xlu0 %v1646_v34, %s7550_s19 }
 0x2d2   : > { %v6480_v49 = vpop.permute.xlu1 %6479 }
 0x2d3   : > { %v6481_v57 = vunpack.i.l.bf16 %v6480_v49  ;;  %v6482_v62 = vunpack.i.h.bf16 %v6480_v49 }
 0x2d6   : > { %v1663_v35 = vpop.trf.xlu0 }
 0x2da   : > { %v1664_v37 = vpop.trf.xlu0  ;;  %v6485_v50 = vpop.permute.xlu1 %6484 }
 0x2db   : > { %v1679_v43 = vpack.c.bf16 %v1664_v37, %v1663_v35  ;;  %v6486_v3 = vunpack.i.l.bf16 %v6485_v50  ;;  %v6487_v6 = vunpack.i.h.bf16 %v6485_v50 }
 0x2de   : > { %v1665_v38 = vpop.trf.xlu0 }
 0x2e2   : > { %v1666_v40 = vpop.trf.xlu0  ;;  %v6490_v52 = vpop.permute.xlu1 %6489 }
 0x2e3   : > { %v1680_v41 = vpack.c.bf16 %v1666_v40, %v1665_v38  ;;  %v6491_v13 = vunpack.i.l.bf16 %v6490_v52  ;;  %v6492_v17 = vunpack.i.h.bf16 %v6490_v52 }
 0x2e5   : > { %6017 = vmatpush3.bf16.msra.mxu1 %v1680_v41 }
 0x2e6   : > { %6018 = vmatprep.subr.bf16.mxu1 %v7546_v1 }
 0x2e9   : > { %6019 = vmatpush3.bf16.msra.mxu1 %v1679_v43 }
 0x2ea   : > { %6044 = vmatprep.subr.bf16.mxu1 %v7546_v1 }
 0x2ec   : > { %6021 = vmatmul.mubr.msk.bf16.vlgmr.msra.gmra.mxu1 %vm1685_vm1, %v1646_v34 }
 0x2ed   : > { %6052 = vmatprep.mubr.msk.bf16.mxu1 %vm7547_vm0, %v7546_v1 }
 0x3ac   : > { %v1723_v44 = vpop.f32.mrf.mxu1 }
 0x3ad   : > { %v1730_v45 = vsel %vm1729_vm2, %v1723_v44, -inf }
 0x3ae   : > { %1731 = vmax.xlane.f32.xlu1 %v1730_v45  ;;  %v6022_v46 = vpop.f32.mrf.mxu1 }
 0x3b0   : > { %v1726_v47 = vpop.f32.mrf.mxu1 }
 0x3b2   : > { %v6023_v48 = vpop.f32.mrf.mxu1 }
 0x3bf   : > { %6494 = vrot.lane.b32.xlu1 %v8125_v51, %s7550_s19 }
 0x3c3   : > { %6504 = vrot.lane.b32.xlu1 %v8129_v59, %s7550_s19 }
 0x3c7   : > { %6509 = vrot.lane.b32.xlu1 %v8133_v7, %s7550_s19 }
 0x3cb   : > { %6514 = vrot.lane.b32.xlu1 %v8125_v51, %s7549_s28 }
 0x3cf   : > { %6519 = vrot.lane.b32.xlu1 %v6518_v18, %s7550_s19  ;;  %v6500_v18 = vpop.permute.xlu0 %6499 }
 0x3d0   : > { %v6501_v22 = vunpack.i.l.bf16 %v6500_v18  ;;  %v6502_v28 = vunpack.i.h.bf16 %v6500_v18 }
 0x3d3   : > { %6524 = vrot.lane.b32.xlu1 %v8129_v59, %s7549_s28  ;;  %v6530_v38 = vpop.permute.xlu0 %6529 }
 0x3d4   : > { %v6531_v40 = vunpack.i.l.bf16 %v6530_v38  ;;  %v6532_v41 = vunpack.i.h.bf16 %v6530_v38 }
 0x3d7   : > { %2209 = vrot.lane.b32.xlu1 %v1646_v34, %s7549_s28  ;;  %v6535_v43 = vpop.permute.xlu0 %6534 }
 0x3d8   : > { %v6537_v45 = vunpack.i.h.bf16 %v6535_v43 }
 0x3db   : > { %v1854_v46 = vpop.permute.xlu0 %1853 }
 0x3df   : > { %v2034_v47 = vpop.permute.xlu0 %2033 }
 0x437   : > { %v1732_v53 = vpop.xlane.xlu1 %1731 }
 0x438   : > { %v1733_v54 = vsub.f32 %v1723_v44, %v1732_v53  ;;  %v6536_v44 = vunpack.i.l.bf16 %v6535_v43 }
 0x43a   : > { %v1734_v55 = vmul.f32 1.442695, %v1733_v54 }
 0x43b   : > { %v6495_v56 = vpop.permute.xlu1 %6494 }
 0x43c   : > { %6778 = vpow2.f32 %v1734_v55  ;;  %v6496_v58 = vunpack.i.l.bf16 %v6495_v56  ;;  %v6497_v60 = vunpack.i.h.bf16 %v6495_v56 }
 0x43e   : > { %v6538_v61 = vpack.i.bf16 %v6496_v58, %v6481_v57  ;;  %v6540_v63 = vpack.i.bf16 %v6497_v60, %v6482_v62 }
 0x43f   : > { %v6505_v51 = vpop.permute.xlu1 %6504 }
 0x440   : > { %6539 = vxpose.xlu0.b32.start [1/8] (short) (narrow) %v6538_v61, 32  ;;  %v6506_v2 = vunpack.i.l.bf16 %v6505_v51  ;;  %v6507_v4 = vunpack.i.h.bf16 %v6505_v51 }
 0x442   : > { %v6542_v5 = vpack.i.bf16 %v6506_v2, %v6486_v3  ;;  %v6544_v10 = vpack.i.bf16 %v6507_v4, %v6487_v6 }
 0x443   : > { %v6510_v59 = vpop.permute.xlu1 %6509 }
 0x444   : > { %6541 = vxpose.xlu0.b32.cont [2/8] (short) (narrow) %v6540_v63, 32  ;;  %v6511_v11 = vunpack.i.l.bf16 %v6510_v59  ;;  %v6512_v14 = vunpack.i.h.bf16 %v6510_v59 }
 0x446   : > { %v6546_v15 = vpack.i.bf16 %v6511_v11, %v6491_v13  ;;  %v6548_v19 = vpack.i.bf16 %v6512_v14, %v6492_v17 }
 0x447   : > { %v6515_v8 = vpop.permute.xlu1 %6514 }
 0x448   : > { %6543 = vxpose.xlu0.b32.cont [3/8] (short) (narrow) %v6542_v5, 32  ;;  %v6516_v32 = vunpack.i.l.bf16 %v6515_v8  ;;  %v6517_v33 = vunpack.i.h.bf16 %v6515_v8 }
 0x449   : > { %v6779_v7 = vpop.eup %6778 }
 0x44a   : > { %v1736_v12 = vsel %vm1729_vm2, %v6779_v7, 0.0 }
 0x44b   : > { %1737 = vadd.xlane.f32.xlu1 %v1736_v12  ;;  %v6520_v16 = vpop.permute.xlu1 %6519 }
 0x44c   : > { %6545 = vxpose.xlu0.b32.cont [4/8] (short) (narrow) %v6544_v10, 32  ;;  %v6521_v21 = vunpack.i.l.bf16 %v6520_v16  ;;  %v6522_v24 = vunpack.i.h.bf16 %v6520_v16 }
 0x44e   : > { %v6550_v26 = vpack.i.bf16 %v6521_v21, %v6501_v22  ;;  %v6552_v31 = vpack.i.bf16 %v6522_v24, %v6502_v28 }
 0x44f   : > { %v6525_v34 = vpop.permute.xlu1 %6524 }
 0x450   : > { %6547 = vxpose.xlu0.b32.cont [5/8] (short) (narrow) %v6546_v15, 32  ;;  %v6526_v35 = vunpack.i.l.bf16 %v6525_v34  ;;  %v6527_v37 = vunpack.i.h.bf16 %v6525_v34 }
 0x453   : > { %v2210_v53 = vpop.permute.xlu1 %2209 }
 0x454   : > { %6549 = vxpose.xlu0.b32.cont [6/8] (short) (narrow) %v6548_v19, 32 }
 0x458   : > { %6551 = vxpose.xlu0.b32.cont [7/8] (short) (narrow) %v6550_v26, 32 }
 0x45c   : > { %6553 = vxpose.xlu0.b32.end [8/8] (short) (narrow) %v6552_v31, 32 }
 0x47e   : > { %2175 = vxpose.xlu1.b32.start [1/8] (short) (narrow) %v6516_v32, 32 }
 0x482   : > { %2176 = vxpose.xlu1.b32.cont [2/8] (short) (narrow) %v6517_v33, 32 }
 0x486   : > { %2177 = vxpose.xlu1.b32.cont [3/8] (short) (narrow) %v6526_v35, 32 }
 0x48a   : > { %2178 = vxpose.xlu1.b32.cont [4/8] (short) (narrow) %v6527_v37, 32 }
 0x48e   : > { %2179 = vxpose.xlu1.b32.cont [5/8] (short) (narrow) %v6531_v40, 32 }
 0x492   : > { %2180 = vxpose.xlu1.b32.cont [6/8] (short) (narrow) %v6532_v41, 32 }
 0x496   : > { %2181 = vxpose.xlu1.b32.cont [7/8] (short) (narrow) %v6536_v44, 32 }
 0x49a   : > { %2182 = vxpose.xlu1.b32.end [8/8] (short) (narrow) %v6537_v45, 32 }
 0x4bc   : > { %v6554_v48 = vpop.trf.xlu0 }
 0x4bd   : > { %v6555_v60 = vunpack.i.l.bf16 %v6554_v48  ;;  %v6558_v4 = vunpack.i.h.bf16 %v6554_v48 }
 0x4c0   : > { %v6559_v49 = vpop.trf.xlu0 }
 0x4c1   : > { %v6560_v61 = vunpack.i.l.bf16 %v6559_v49  ;;  %v6563_v5 = vunpack.i.h.bf16 %v6559_v49 }
 0x4c3   : > { %v1850_v59 = vpack.c.bf16 %v6560_v61, %v6555_v60  ;;  %v2031_v6 = vpack.c.bf16 %v6563_v5, %v6558_v4 }
 0x4c4   : > { %v6564_v50 = vpop.trf.xlu0 }
 0x4c5   : > { %v6565_v55 = vunpack.i.l.bf16 %v6564_v50  ;;  %v6568_v63 = vunpack.i.h.bf16 %v6564_v50 }
 0x4c8   : > { %v6569_v52 = vpop.trf.xlu0 }
 0x4c9   : > { %v6570_v56 = vunpack.i.l.bf16 %v6569_v52  ;;  %v6573_v2 = vunpack.i.h.bf16 %v6569_v52 }
 0x4cb   : > { %v1851_v51 = vpack.c.bf16 %v6570_v56, %v6565_v55  ;;  %v2032_v3 = vpack.c.bf16 %v6573_v2, %v6568_v63 }
 0x4d4   : > { %v1738_v54 = vpop.xlane.xlu1 %1737 }
 0x4d5   : > { %6780 = vrcp.f32 %v1738_v54 }
 0x4e2   : > { %v6781_v57 = vpop.eup %6780 }
 0x4e3   : > { %v1740_v58 = vmul.f32 %v6781_v57, %v6779_v7 }
 0x4e5   : > { %v1741_v62 = vpack.c.bf16 %v1740_v58, %v1740_v58 }
 0x4e7   : > { %6033 = vmatmul.mubr.msk.bf16.vlgmr.msra.gmra.mxu0 %vm1729_vm2, %v1741_v62 }
 0x4e8   : > { %6037 = vmatpush3.bf16.msra.mxu0 %v1851_v51  ;;  %6040 = vmatprep.mubr.msk.bf16.mxu0 %vm7547_vm0, %v7546_v1 }
 0x4e9   : > { %6038 = vmatprep.subr.bf16.mxu0 %v7546_v1 }
 0x4ec   : > { %6039 = vmatpush3.bf16.msra.mxu0 %v1850_v59 }
 0x4ed   : > { %6056 = vmatprep.subr.bf16.mxu0 %v7546_v1 }
 0x4ef   : > { %6041 = vmatmul.mubr.msk.bf16.vlgmr.msra.gmra.mxu0 %vm1685_vm1, %v1854_v46 }
 0x4f0   : > { %6057 = vmatpush3.bf16.msra.mxu0 %v2032_v3  ;;  %6060 = vmatprep.mubr.msk.bf16.mxu0 %vm7547_vm0, %v7546_v1 }
 0x4f1   : > { %6058 = vmatprep.subr.bf16.mxu0 %v7546_v1 }
 0x4f4   : > { %6059 = vmatpush3.bf16.msra.mxu0 %v2031_v6 }
 0x4f5   : > { %6076 = vmatprep.subr.bf16.mxu0 %v7546_v1 }
 0x4f7   : > { %6061 = vmatmul.mubr.msk.bf16.vlgmr.msra.gmra.mxu0 %vm1685_vm1, %v2034_v47 }
 0x4f8   : > { %6080 = vmatprep.mubr.msk.bf16.mxu0 %vm7547_vm0, %v7546_v1 }
 0x4fa   : > { %v2191_v7 = vpop.trf.xlu1 }
 0x4fe   : > { %v2192_v8 = vpop.trf.xlu1 }
 0x4ff   : > { %v2207_v13 = vpack.c.bf16 %v2192_v8, %v2191_v7 }
 0x502   : > { %v2193_v10 = vpop.trf.xlu1 }
 0x506   : > { %v2194_v11 = vpop.trf.xlu1 }
 0x507   : > { %v2208_v12 = vpack.c.bf16 %v2194_v11, %v2193_v10 }
 0x509   : > { %6077 = vmatpush3.bf16.msra.mxu0 %v2208_v12 }
 0x50a   : > { %6078 = vmatprep.subr.bf16.mxu0 %v7546_v1 }
 0x50d   : > { %6079 = vmatpush3.bf16.msra.mxu0 %v2207_v13 }
 0x50e   : > { %6084 = vmatprep.subr.bf16.mxu0 %v7546_v1 }
 0x510   : > { %6081 = vmatmul.mubr.msk.bf16.vlgmr.msra.gmra.mxu0 %vm1685_vm1, %v2210_v53 }
 0x511   : > { %6092 = vmatprep.mubr.msk.bf16.mxu0 %vm7547_vm0, %v7546_v1 }
 0x5a7   : > { %v1779_v14 = vpop.f32.mrf.mxu0 }
 0x5a8   : > { %1785 = vst.msk [vmem:[#allocation2] sm:$0xff] %vm1685_vm1, %v1779_v14 }
 0x5a9   : > { %v6034_v15 = vpop.f32.mrf.mxu0 }
 0x5ab   : > { %v1782_v16 = vpop.f32.mrf.mxu0 }
 0x5ac   : > { %v6650_v16 = vld [vmem:[#allocation14 + $0x38] sm:$0xff]  }
 0x5ad   : > { %v6035_v17 = vpop.f32.mrf.mxu0 }
 0x5af   : > { %v1892_v18 = vpop.f32.mrf.mxu0 }
 0x5b0   : > { %v1898_v19 = vsel %vm1729_vm2, %v1892_v18, -inf }
 0x5b1   : > { %1899 = vmax.xlane.f32.xlu0 %v1898_v19  ;;  %v6042_v21 = vpop.f32.mrf.mxu0  ;;  %v6651_v19 = vld [vmem:[#allocation14 + $0x30] sm:$0xff]  }
 0x5b3   : > { %v1895_v22 = vpop.f32.mrf.mxu0 }
 0x5b4   : > { %v6652_v22 = vld [vmem:[#allocation14 + $0x28] sm:$0xff]  }
 0x5b5   : > { %v6043_v24 = vpop.f32.mrf.mxu0 }
 0x5b7   : > { %v2072_v26 = vpop.f32.mrf.mxu0 }
 0x5b8   : > { %v2078_v28 = vsel %vm1729_vm2, %v2072_v26, -inf }
 0x5b9   : > { %2079 = vmax.xlane.f32.xlu1 %v2078_v28  ;;  %v6062_v31 = vpop.f32.mrf.mxu0  ;;  %v6654_v28 = vld [vmem:[#allocation14 + $0x18] sm:$0xff]  }
 0x5bb   : > { %v2075_v32 = vpop.f32.mrf.mxu0 }
 0x5bc   : > { %v6655_v32 = vld [vmem:[#allocation14 + $0x10] sm:$0xff]  }
 0x5bd   : > { %v6063_v33 = vpop.f32.mrf.mxu0 }
 0x5ca   : > { %1916 = vrot.lane.b32.xlu1 %v8148_v27, %s7548_s20 }
 0x5ce   : > { %2270 = vrot.lane.b32.xlu1 %v8144_v23, %s7549_s28 }
 0x5d0   : > { %v2248_v34 = vpop.f32.mrf.mxu0 }
 0x5d1   : > { %v2254_v35 = vsel %vm1729_vm2, %v2248_v34, -inf }
 0x5d2   : > { %2268 = vrot.lane.b32.xlu1 %v8148_v27, %s7549_s28  ;;  %2255 = vmax.xlane.f32.xlu0 %v2254_v35  ;;  %v6082_v37 = vpop.f32.mrf.mxu0  ;;  %v6656_v35 = vld [vmem:[#allocation14 + $0x8] sm:$0xff]  }
 0x5d4   : > { %v2251_v38 = vpop.f32.mrf.mxu0 }
 0x5d5   : > { %v6657_v38 = vld [vmem:[#allocation14] sm:$0xff]  }
 0x5d6   : > { %v6083_v40 = vpop.f32.mrf.mxu0 }
 0x5e8   : > { %1920 = vrot.lane.b32.xlu0 %v8140_v20, %s7548_s20 }
 0x5ec   : > { %1918 = vrot.lane.b32.xlu0 %v8144_v23, %s7548_s20 }
 0x5f0   : > { %1914 = vrot.lane.b32.xlu0 %v8152_v29, %s7548_s20 }
 0x5f4   : > { %2096 = vrot.lane.b32.xlu0 %v8140_v20, %s7550_s19 }
 0x63a   : > { %v1900_v41 = vpop.xlane.xlu0 %1899 }
 0x63b   : > { %v1901_v43 = vsub.f32 %v1892_v18, %v1900_v41 }
 0x63d   : > { %v1902_v44 = vmul.f32 1.442695, %v1901_v43 }
 0x63f   : > { %6782 = vpow2.f32 %v1902_v44 }
 0x642   : > { %v2080_v45 = vpop.xlane.xlu1 %2079 }
 0x643   : > { %v2081_v46 = vsub.f32 %v2072_v26, %v2080_v45  ;;  %v6653_v26 = vld [vmem:[#allocation14 + $0x20] sm:$0xff]  }
 0x645   : > { %v2082_v47 = vmul.f32 1.442695, %v2081_v46 }
 0x646   : > { %v1917_v58 = vpop.permute.xlu1 %1916 }
 0x647   : > { %6784 = vpow2.f32 %v2082_v47 }
 0x64a   : > { %v2271_v51 = vpop.permute.xlu1 %2270 }
 0x64c   : > { %v6783_v48 = vpop.eup %6782 }
 0x64d   : > { %v1904_v49 = vsel %vm1729_vm2, %v6783_v48, 0.0 }
 0x64e   : > { %1905 = vadd.xlane.f32.xlu0 %v1904_v49  ;;  %v5657_v49 = vld [vmem:[%s9085_s5] ss:$0 sm:$0xff]  ;;  %s5248_s5 = scalar_lea.sflag [#allocation29], %s8025_s21 }
 0x654   : > { %v6785_v50 = vpop.eup %6784 }
 0x655   : > { %v2084_v52 = vsel %vm1729_vm2, %v6785_v50, 0.0 }
 0x656   : > { %2085 = vadd.xlane.f32.xlu1 %v2084_v52 }
 0x65b   : > { %v2256_v53 = vpop.xlane.xlu0 %2255 }
 0x65c   : > { %v2257_v54 = vsub.f32 %v2248_v34, %v2256_v53 }
 0x65e   : > { %v2258_v55 = vmul.f32 1.442695, %v2257_v54  ;;  %v6958_v54 = vld [vmem:[%s1147_s25] sm:$0xff]  ;;  %s9093_s25 = sld [smem:[#allocation58_spill]] }
 0x65f   : > { %v1921_v56 = vpop.permute.xlu0 %1920 }
 0x660   : > { %6786 = vpow2.f32 %v2258_v55  ;;  %6045 = vmatpush3.bf16.msra.mxu1 %v1921_v56 }
 0x661   : > { %6046 = vmatprep.subr.bf16.mxu1 %v7546_v1 }
 0x663   : > { %v1919_v57 = vpop.permute.xlu0 %1918 }
 0x664   : > { %2272 = vrot.lane.b32.xlu0 %v8140_v20, %s7549_s28  ;;  %6047 = vmatpush3.bf16.msra.mxu1 %v1919_v57 }
 0x665   : > { %6048 = vmatprep.subr.bf16.mxu1 %v7546_v1 }
 0x667   : > { %v1915_v60 = vpop.permute.xlu0 %1914 }
 0x668   : > { %2094 = vrot.lane.b32.xlu0 %v8144_v23, %s7550_s19  ;;  %6049 = vmatpush3.bf16.msra.mxu1 %v1917_v58  ;;  %v6658_v58 = vld [vmem:[#allocation15 + $0x70] ss:$8 sps:$4 sm:$0xff]  }
 0x669   : > { %6050 = vmatprep.subr.bf16.mxu1 %v7546_v1 }
 0x66b   : > { %v2097_v23 = vpop.permute.xlu0 %2096 }
 0x66c   : > { %2092 = vrot.lane.b32.xlu0 %v8148_v27, %s7550_s19  ;;  %6051 = vmatpush3.bf16.msra.mxu1 %v1915_v60  ;;  %v2269_v27 = vpop.permute.xlu1 %2268  ;;  %v6660_v60 = vld [vmem:[#allocation15 + $0x74] ss:$8 sps:$4 sm:$0xff]  }
 0x66d   : > { %v6787_v61 = vpop.eup %6786  ;;  %6064 = vmatprep.subr.bf16.mxu1 %v7546_v1 }
 0x66e   : > { %v2260_v20 = vsel %vm1729_vm2, %v6787_v61, 0.0 }
 0x66f   : > { %2261 = vadd.xlane.f32.xlu1 %v2260_v20  ;;  %v6661_v20 = vld [vmem:[#allocation15 + $0x60] ss:$8 sps:$4 sm:$0xff]  }
 0x670   : > { %2090 = vrot.lane.b32.xlu0 %v8152_v29, %s7550_s19 }
 0x680   : > { %2266 = vrot.lane.b32.xlu1 %v8152_v29, %s7549_s28 }
 0x6d7   : > { %v1906_v62 = vpop.xlane.xlu0 %1905 }
 0x6d8   : > { %6788 = vrcp.f32 %v1906_v62 }
 0x6db   : > { %v2273_v63 = vpop.permute.xlu0 %2272 }
 0x6dc   : > { %6085 = vmatpush3.bf16.msra.mxu0 %v2273_v63 }
 0x6dd   : > { %6086 = vmatprep.subr.bf16.mxu0 %v7546_v1 }
 0x6df   : > { %v2086_v2 = vpop.xlane.xlu1 %2085  ;;  %v2095_v4 = vpop.permute.xlu0 %2094 }
 0x6e0   : > { %6087 = vmatpush3.bf16.msra.mxu0 %v2271_v51  ;;  %6790 = vrcp.f32 %v2086_v2  ;;  %v6664_v2 = vld [vmem:[#allocation15 + $0x50] ss:$8 sps:$4 sm:$0xff]  }
 0x6e1   : > { %6088 = vmatprep.subr.bf16.mxu0 %v7546_v1 }
 0x6e3   : > { %v2093_v5 = vpop.permute.xlu0 %2092 }
 0x6e4   : > { %6089 = vmatpush3.bf16.msra.mxu0 %v2269_v27  ;;  %v6666_v27 = vld [vmem:[#allocation15 + $0x54] ss:$8 sps:$4 sm:$0xff]  }
 0x6e5   : > { %v6789_v59 = vpop.eup %6788  ;;  %6090 = vmatprep.subr.bf16.mxu0 %v7546_v1 }
 0x6e6   : > { %v1908_v3 = vmul.f32 %v6789_v59, %v6783_v48  ;;  %v6667_v59 = vld [vmem:[#allocation15 + $0x40] ss:$8 sps:$4 sm:$0xff]  }
 0x6e7   : > { %v2091_v8 = vpop.permute.xlu0 %2090 }
 0x6e8   : > { %v1909_v29 = vpack.c.bf16 %v1908_v3, %v1908_v3  ;;  %v6669_v3 = vld [vmem:[#allocation15 + $0x44] ss:$8 sps:$4 sm:$0xff]  }
 0x6ea   : > { %6053 = vmatmul.mubr.msk.bf16.vlgmr.msra.gmra.mxu1 %vm1729_vm2, %v1909_v29  ;;  %v6672_v29 = vld [vmem:[#allocation15 + $0x34] ss:$8 sps:$4 sm:$0xff]  }
 0x6eb   : > { %6065 = vmatpush3.bf16.msra.mxu1 %v2097_v23  ;;  %6072 = vmatprep.mubr.msk.bf16.mxu1 %vm7547_vm0, %v7546_v1 }
 0x6ec   : > { %6066 = vmatprep.subr.bf16.mxu1 %v7546_v1 }
 0x6ed   : > { %v6791_v6 = vpop.eup %6790 }
 0x6ee   : > { %v2088_v7 = vmul.f32 %v6791_v6, %v6785_v50  ;;  %v6673_v6 = vld [vmem:[#allocation15 + $0x20] ss:$8 sps:$4 sm:$0xff]  }
 0x6ef   : > { %6067 = vmatpush3.bf16.msra.mxu1 %v2095_v4  ;;  %v6670_v4 = vld [vmem:[#allocation15 + $0x30] ss:$8 sps:$4 sm:$0xff]  }
 0x6f0   : > { %6068 = vmatprep.subr.bf16.mxu1 %v7546_v1  ;;  %v2089_v11 = vpack.c.bf16 %v2088_v7, %v2088_v7  ;;  %v6678_v7 = vld [vmem:[#allocation15 + $0x14] ss:$8 sps:$4 sm:$0xff]  }
 0x6f3   : > { %6069 = vmatpush3.bf16.msra.mxu1 %v2093_v5  ;;  %v6675_v5 = vld [vmem:[#allocation15 + $0x24] ss:$8 sps:$4 sm:$0xff]  }
 0x6f4   : > { %6070 = vmatprep.subr.bf16.mxu1 %v7546_v1 }
 0x6f7   : > { %6071 = vmatpush3.bf16.msra.mxu1 %v2091_v8  ;;  %v6676_v8 = vld [vmem:[#allocation15 + $0x10] ss:$8 sps:$4 sm:$0xff]  }
 0x6f8   : > { %v2262_v10 = vpop.xlane.xlu1 %2261  ;;  %6096 = vmatprep.subr.bf16.mxu1 %v7546_v1 }
 0x6f9   : > { %6792 = vrcp.f32 %v2262_v10  ;;  %v6681_v10 = vld [vmem:[#allocation15 + $0x4] ss:$8 sps:$4 sm:$0xff]  }
 0x6fa   : > { %6073 = vmatmul.mubr.msk.bf16.vlgmr.msra.gmra.mxu1 %vm1729_vm2, %v2089_v11  ;;  %v6679_v11 = vld [vmem:[#allocation15] ss:$8 sps:$4 sm:$0xff]  }
 0x6fb   : > { %6112 = vmatprep.mubr.msk.bf16.mxu1 %vm7547_vm0, %v7546_v1  ;;  %6097 = vmatpush3.bf16.msra.mxu1 %v6650_v16  ;;  %v6686_v16 = vld [vmem:[#allocation17 + $0x68] sm:$0xff]  }
 0x6fc   : > { %v2267_v12 = vpop.permute.xlu1 %2266  ;;  %6098 = vmatprep.subr.bf16.mxu1 %v7546_v1 }
 0x6fd   : > { %6091 = vmatpush3.bf16.msra.mxu0 %v2267_v12  ;;  %v6682_v12 = vld [vmem:[#allocation17 + $0x78] sm:$0xff]  }
 0x6fe   : > { %2594 = vmatprep.subr.bf16.mxu0 %v6660_v60 }
 0x6ff   : > { %6099 = vmatpush3.bf16.msra.mxu1 %v6651_v19  ;;  %v6689_v19 = vld [vmem:[#allocation17 + $0x20] sm:$0xff]  }
 0x700   : > { %6100 = vmatprep.subr.bf16.mxu1 %v7546_v1 }
 0x703   : > { %6101 = vmatpush3.bf16.msra.mxu1 %v6652_v22  ;;  %v6691_v22 = vld [vmem:[#allocation17 + $0x18] sm:$0xff]  }
 0x704   : > { %6102 = vmatprep.subr.bf16.mxu1 %v7546_v1 }
 0x706   : > { %v6793_v13 = vpop.eup %6792 }
 0x707   : > { %v2264_v14 = vmul.f32 %v6793_v13, %v6787_v61  ;;  %6103 = vmatpush3.bf16.msra.mxu1 %v6653_v26  ;;  %v6663_v61 = vld [vmem:[#allocation15 + $0x64] ss:$8 sps:$4 sm:$0xff]   ;;  %v6683_v13 = vld [vmem:[#allocation17 + $0x38] sm:$0xff]   ;;  %v6693_v26 = vld [vmem:[#allocation17 + $0x10] sm:$0xff]  }
 0x708   : > { %6104 = vmatprep.subr.bf16.mxu1 %v7546_v1 }
 0x709   : > { %v2265_v15 = vpack.c.bf16 %v2264_v14, %v2264_v14  ;;  %v6684_v14 = vld [vmem:[#allocation17 + $0x70] sm:$0xff]  }
 0x70b   : > { %6093 = vmatmul.mubr.msk.bf16.vlgmr.msra.gmra.mxu0 %vm1729_vm2, %v2265_v15  ;;  %6105 = vmatpush3.bf16.msra.mxu1 %v6654_v28  ;;  %v6685_v15 = vld [vmem:[#allocation17 + $0x30] sm:$0xff]  }
 0x70c   : > { %2626 = vmatprep.mubr.bf16.mxu0 %v7545_v0  ;;  %6106 = vmatprep.subr.bf16.mxu1 %v7546_v1 }
 0x70d   : > { %2595 = vmatpush1.bf16.msra.mxu0 %v6658_v58 }
 0x70e   : > { %2596 = vmatprep.subr.bf16.mxu0 %v6663_v61  ;;  %v5684_v61 = vld [vmem:[%s9089_s16] ss:$0 sm:$0xff] }
 0x70f   : > { %6107 = vmatpush3.bf16.msra.mxu1 %v6655_v32 }
 0x710   : > { %6108 = vmatprep.subr.bf16.mxu1 %v7546_v1 }
 0x711   : > { %2597 = vmatpush1.bf16.msra.mxu0 %v6661_v20 }
 0x712   : > { %2598 = vmatprep.subr.bf16.mxu0 %v6666_v27 }
 0x713   : > { %6109 = vmatpush3.bf16.msra.mxu1 %v6656_v35 }
 0x714   : > { %6110 = vmatprep.subr.bf16.mxu1 %v7546_v1 }
 0x715   : > { %2599 = vmatpush1.bf16.msra.mxu0 %v6664_v2  ;;  %v6698_v2 = vld [vmem:[#allocation20 + $0x70] ss:$8 sps:$4 sm:$0xff]  }
 0x716   : > { %2600 = vmatprep.subr.bf16.mxu0 %v6669_v3 }
 0x717   : > { %6111 = vmatpush3.bf16.msra.mxu1 %v6657_v38 }
 0x718   : > { %5866 = vmatprep.subr.bf16.mxu1 %v6682_v12  ;;  %v6707_v12 = vld [vmem:[#allocation20 + $0x40] ss:$8 sps:$4 sm:$0xff]  }
 0x719   : > { %2601 = vmatpush1.bf16.msra.mxu0 %v6667_v59  ;;  %v6700_v59 = vld [vmem:[#allocation20 + $0x74] ss:$8 sps:$4 sm:$0xff]  }
 0x71a   : > { %2602 = vmatprep.subr.bf16.mxu0 %v6672_v29 }
 0x71d   : > { %2603 = vmatpush1.bf16.msra.mxu0 %v6670_v4 }
 0x71e   : > { %2604 = vmatprep.subr.bf16.mxu0 %v6675_v5 }
 0x721   : > { %2605 = vmatpush1.bf16.msra.mxu0 %v6673_v6  ;;  %v6703_v6 = vld [vmem:[#allocation20 + $0x64] ss:$8 sps:$4 sm:$0xff]  }
 0x722   : > { %2606 = vmatprep.subr.bf16.mxu0 %v6678_v7  ;;  %v6701_v7 = vld [vmem:[#allocation20 + $0x60] ss:$8 sps:$4 sm:$0xff]  }
 0x725   : > { %2607 = vmatpush1.bf16.msra.mxu0 %v6676_v8  ;;  %v6706_v8 = vld [vmem:[#allocation20 + $0x54] ss:$8 sps:$4 sm:$0xff]  }
 0x726   : > { %2608 = vmatprep.subr.bf16.mxu0 %v6681_v10  ;;  %v6704_v10 = vld [vmem:[#allocation20 + $0x50] ss:$8 sps:$4 sm:$0xff]  }
 0x729   : > { %2609 = vmatpush1.bf16.msra.mxu0 %v6679_v11  ;;  %v6709_v11 = vld [vmem:[#allocation20 + $0x44] ss:$8 sps:$4 sm:$0xff]  }
 0x7aa   : > { %v1963_v17 = vpop.f32.mrf.mxu1 }
 0x7ab   : > { %1970 = vrot.lane.b32.xlu0 %v1963_v17, %s7549_s28  ;;  %v6687_v17 = vld [vmem:[#allocation17 + $0x28] sm:$0xff]  }
 0x7ac   : > { %v6054_v18 = vpop.f32.mrf.mxu1 }
 0x7ad   : > { %v6688_v18 = vld [vmem:[#allocation17 + $0x60] sm:$0xff]  }
 0x7ae   : > { %v1966_v21 = vpop.f32.mrf.mxu1 }
 0x7af   : > { %v6690_v21 = vld [vmem:[#allocation17 + $0x58] sm:$0xff]  }
 0x7b0   : > { %v6055_v24 = vpop.f32.mrf.mxu1 }
 0x7b1   : > { %v6692_v24 = vld [vmem:[#allocation17 + $0x50] sm:$0xff]  }
 0x7ba   : > { %v2139_v31 = vpop.f32.mrf.mxu1 }
 0x7bb   : > { %2146 = vrot.lane.b32.xlu1 %v2139_v31, %s7550_s19 }
 0x7bc   : > { %v6074_v33 = vpop.f32.mrf.mxu1 }
 0x7be   : > { %v2142_v34 = vpop.f32.mrf.mxu1 }
 0x7bf   : > { %v5666_v34 = vld [vmem:[%s9086_s29] ss:$0 sm:$0xff] }
 0x7c0   : > { %v6075_v37 = vpop.f32.mrf.mxu1 }
 0x7c1   : > { %v5667_v37 = vld [vmem:[%s9087_s17] ss:$0 sm:$0xff]  ;;  %s7551_s17 = smov [#allocation28]  }
 0x7cb   : > { %v2315_v40 = vpop.f32.mrf.mxu0 }
 0x7cc   : > { %2322 = vrot.lane.b32.xlu0 %v2315_v40, %s7548_s20 }
 0x7cd   : > { %v6094_v41 = vpop.f32.mrf.mxu0 }
 0x7cf   : > { %v2318_v43 = vpop.f32.mrf.mxu0 }
 0x7d0   : > { %v6694_v43 = vld [vmem:[#allocation17 + $0x48] sm:$0xff]  }
 0x7d1   : > { %v6095_v44 = vpop.f32.mrf.mxu0 }
 0x7d2   : > { %v6695_v44 = vld [vmem:[#allocation17 + $0x8] sm:$0xff]  }
 0x81d   : > { %v1971_v45 = vpop.permute.xlu0 %1970 }
 0x81e   : > { %1974 = vst.msk [vmem:[#allocation2] sm:$0xff] %vm1973_vm3, %v1971_v45  ;;  %v6696_v45 = vld [vmem:[#allocation17 + $0x40] sm:$0xff]  }
 0x82d   : > { %v2147_v46 = vpop.permute.xlu1 %2146 }
 0x82e   : > { %2150 = vst.msk [vmem:[#allocation2] sm:$0xff] %vm2149_vm4, %v2147_v46  ;;  %v6697_v46 = vld [vmem:[#allocation17] sm:$0xff]  }
 0x83e   : > { %v2323_v47 = vpop.permute.xlu0 %2322 }
 0x83f   : > { %2326 = vst.msk [vmem:[#allocation2] sm:$0xff] %vm2325_vm5, %v2323_v47  ;;  %v2468_v47 = vld [vmem:[%s9088_s26] sm:$0x3]  ;;  %s7369_s26 = sshll.u32 %s7551_s17, 4  ;;  %s7370_s26 = int_to_ptr.vmem [resolvable:$false] %s7369_s26 }
 0x840   : > { %s7371_s16 = scalar_lea.vmem %s7370_s26, 256 }
 0x846   : > { %v2327_v1 = vld [vmem:[#allocation2] sm:$0xff] }
 0x847   : > { %v2328_v48 = vpack.c.bf16 %v2327_v1, %v2327_v1  ;;  %v2507_v1 = vrot.slane %v2468_v47, %v8121_v42 }
 0x849   : > { %6113 = vmatmul.mubr.bf16.vlgmr.msra.gmra.mxu1 %v2328_v48  ;;  %v2511_v48 = vrot.slane %v2468_v47, %v8135_v9 }
 0x84a   : > { %5867 = vmatpush3.bf16.msra.mxu1 %v6683_v13  ;;  %v6712_v13 = vld [vmem:[#allocation20 + $0x34] ss:$8 sps:$4 sm:$0xff]  }
 0x84b   : > { %5868 = vmatprep.subr.bf16.mxu1 %v6684_v14  ;;  %v6710_v14 = vld [vmem:[#allocation20 + $0x30] ss:$8 sps:$4 sm:$0xff]  }
 0x84e   : > { %5869 = vmatpush3.bf16.msra.mxu1 %v6685_v15  ;;  %v6715_v15 = vld [vmem:[#allocation20 + $0x24] ss:$8 sps:$4 sm:$0xff]  }
 0x84f   : > { %5870 = vmatprep.subr.bf16.mxu1 %v6686_v16  ;;  %v6713_v16 = vld [vmem:[#allocation20 + $0x20] ss:$8 sps:$4 sm:$0xff]  }
 0x852   : > { %5871 = vmatpush3.bf16.msra.mxu1 %v6687_v17  ;;  %v6718_v17 = vld [vmem:[#allocation20 + $0x14] ss:$8 sps:$4 sm:$0xff]  }
 0x853   : > { %5872 = vmatprep.subr.bf16.mxu1 %v6688_v18  ;;  %v6716_v18 = vld [vmem:[#allocation20 + $0x10] ss:$8 sps:$4 sm:$0xff]  }
 0x856   : > { %5873 = vmatpush3.bf16.msra.mxu1 %v6689_v19  ;;  %v6721_v19 = vld [vmem:[#allocation20 + $0x4] ss:$8 sps:$4 sm:$0xff]  }
 0x857   : > { %5874 = vmatprep.subr.bf16.mxu1 %v6690_v21  ;;  %v6719_v21 = vld [vmem:[#allocation20] ss:$8 sps:$4 sm:$0xff]  }
 0x85a   : > { %5875 = vmatpush3.bf16.msra.mxu1 %v6691_v22  ;;  %v6722_v22 = vld [vmem:[#allocation18 + $0x38] sm:$0xff]  }
 0x85b   : > { %5876 = vmatprep.subr.bf16.mxu1 %v6692_v24  ;;  %v6723_v24 = vld [vmem:[#allocation18 + $0x30] sm:$0xff]   ;;  %6116 = vmatprep.subr.bf16.mxu0 %v6722_v22 }
 0x85e   : > { %5877 = vmatpush3.bf16.msra.mxu1 %v6693_v26  ;;  %v6724_v26 = vld [vmem:[#allocation18 + $0x28] sm:$0xff]  }
 0x85f   : > { %5878 = vmatprep.subr.bf16.mxu1 %v6694_v43 }
 0x862   : > { %5879 = vmatpush3.bf16.msra.mxu1 %v6695_v44  ;;  %v5702_v44 = vld [vmem:[%s9091_s22] ss:$0 sm:$0xff] }
 0x863   : > { %5880 = vmatprep.subr.bf16.mxu1 %v6696_v45 }
 0x866   : > { %5881 = vmatpush3.bf16.msra.mxu1 %v6697_v46  ;;  %v1322_v46 = vld [vmem:[%s1156_s12] sm:$0xff]  ;;  %s9095_s12 = sld [smem:[#allocation65_spill]] }
 0x867   : > { %3073 = vmatprep.subr.bf16.mxu1 %v6700_v59 }
 0x909   : > { %v2417_v50 = vpop.f32.mrf.mxu1 }
 0x90a   : > { %v2418_v52 = vadd.f32 %v5657_v49, %v2417_v50 }
 0x90b   : > { %v6114_v53 = vpop.f32.mrf.mxu1 }
 0x90c   : > { %v2423_v55 = vadd.f32 %v6958_v54, %v2418_v52 }
 0x90d   : > { %v2420_v56 = vpop.f32.mrf.mxu1 }
 0x90e   : > { %2426 = vadd.xlane.f32.xlu1 %v2423_v55 }
 0x90f   : > { %v6115_v57 = vpop.f32.mrf.mxu1 }
 0x997   : > { %v2427_v23 = vpop.xlane.xlu1 %2426 }
 0x998   : > { %v2429_v51 = vmul.f32 0.0078125, %v2427_v23 }
 0x99a   : > { %v2430_v62 = vsub.f32 %v2423_v55, %v2429_v51 }
 0x99c   : > { %v2431_v63 = vmul.f32 %v2430_v62, %v2430_v62 }
 0x99e   : > { %2432 = vadd.xlane.f32.xlu0 %v2431_v63 }
 0xa27   : > { %v2433_v28 = vpop.xlane.xlu0 %2432 }
 0xa28   : > { %v2434_v31 = vmul.f32 0.0078125, %v2433_v28  ;;  %v6725_v28 = vld [vmem:[#allocation18 + $0x20] sm:$0xff]  }
 0xa2a   : > { %v2435_v32 = vadd.f32 1e-05, %v2434_v31  ;;  %v6726_v31 = vld [vmem:[#allocation18 + $0x18] sm:$0xff]  }
 0xa2c   : > { %6794 = vrsqrt.f32 %v2435_v32  ;;  %v6727_v32 = vld [vmem:[#allocation18 + $0x10] sm:$0xff]  }
 0xa39   : > { %v6795_v33 = vpop.eup %6794 }
 0xa3a   : > { %v2437_v35 = vmul.f32 %v6795_v33, %v2430_v62  ;;  %v6728_v33 = vld [vmem:[#allocation18 + $0x8] sm:$0xff]  }
 0xa3c   : > { %v2444_v38 = vmul.f32 %v5666_v34, %v2437_v35  ;;  %v6729_v34 = vld [vmem:[#allocation18] sm:$0xff]  }
 0xa3e   : > { %v2451_v40 = vadd.f32 %v5667_v37, %v2444_v38 }
 0xa40   : > { %v2502_v41 = vpack.c.bf16 %v2451_v40, %v2451_v40 }
 0xa42   : > { %2627 = vmatmul.mubr.bf16.vlgmr.msra.gmra.mxu0 %v2502_v41  ;;  %v5701_v41 = vld [vmem:[%s9090_s15] ss:$0 sm:$0xff] }
 0xa43   : > { %6132 = vmatprep.mubr.bf16.mxu0 %v8089_v25  ;;  %6117 = vmatpush3.bf16.msra.mxu0 %v6722_v22 }
 0xa44   : > { %6118 = vmatprep.subr.bf16.mxu0 %v6723_v24 }
 0xa47   : > { %6119 = vmatpush3.bf16.msra.mxu0 %v6723_v24 }
 0xa48   : > { %6120 = vmatprep.subr.bf16.mxu0 %v6724_v26 }
 0xa4b   : > { %6121 = vmatpush3.bf16.msra.mxu0 %v6724_v26 }
 0xa4c   : > { %6122 = vmatprep.subr.bf16.mxu0 %v6725_v28 }
 0xa4f   : > { %6123 = vmatpush3.bf16.msra.mxu0 %v6725_v28 }
 0xa50   : > { %6124 = vmatprep.subr.bf16.mxu0 %v6726_v31 }
 0xa53   : > { %6125 = vmatpush3.bf16.msra.mxu0 %v6726_v31 }
 0xa54   : > { %6126 = vmatprep.subr.bf16.mxu0 %v6727_v32 }
 0xa57   : > { %6127 = vmatpush3.bf16.msra.mxu0 %v6727_v32 }
 0xa58   : > { %6128 = vmatprep.subr.bf16.mxu0 %v6728_v33 }
 0xa5b   : > { %6129 = vmatpush3.bf16.msra.mxu0 %v6728_v33 }
 0xa5c   : > { %6130 = vmatprep.subr.bf16.mxu0 %v6729_v34 }
 0xa5f   : > { %6131 = vmatpush3.bf16.msra.mxu0 %v6729_v34 }
 0xa62   : > { %6133 = vmatmul.mubr.bf16.vlgmr.msra.gmra.mxu0 %v8098_v30 }
 0xa63   : > { %6136 = vmatprep.mubr.bf16.mxu0 %v8108_v36 }
 0xa6a   : > { %6137 = vmatmul.mubr.bf16.gmra.mxu0 %v8116_v39  ;;  %v2844_v39 = vld [vmem:[%s9092_s7] sm:$0x3] }
 0xb02   : > { %v2628_v49 = vpop.f32.mrf.mxu0 }
 0xb03   : > { %v2629_v50 = vadd.f32 %v2628_v49, %v2507_v1 }
 0xb04   : > { %v2630_v52 = vpop.f32.mrf.mxu0 }
 0xb05   : > { %v2631_v53 = vadd.f32 %v2630_v52, %v2511_v48  ;;  %v2635_v54 = vmax.f32 %v2629_v50, 0.0  ;;  %v2986_v48 = vrot.slane %v2844_v39, %v8121_v42  ;;  %v2990_v50 = vrot.slane %v2844_v39, %v8135_v9 }
 0xb06   : > { %v2632_v25 = vpop.f32.mrf.mxu0 }
 0xb07   : > { %v2636_v55 = vmax.f32 %v2631_v53, 0.0  ;;  %v2637_v58 = vpack.c.bf16 %v2635_v54, %v2635_v54 }
 0xb08   : > { %v2633_v56 = vpop.f32.mrf.mxu0 }
 0xb09   : > { %v2638_v57 = vpack.c.bf16 %v2636_v55, %v2636_v55  ;;  %v5703_v55 = vld [vmem:[%s9093_s25] ss:$0 sm:$0xff] }
 0xb0b   : > { %2773 = vmatprep.mubr.bf16.mxu1 %v2638_v57 }
 0xb0c   : > { %2774 = vmatmul.mubr.bf16.vlgmr.msra.gmra.mxu1 %v2637_v58 }
 0xb0d   : > { %3105 = vmatprep.mubr.bf16.mxu1 %v7545_v0  ;;  %3074 = vmatpush1.bf16.msra.mxu1 %v6698_v2 }
 0xb0e   : > { %3075 = vmatprep.subr.bf16.mxu1 %v6703_v6 }
 0xb11   : > { %3076 = vmatpush1.bf16.msra.mxu1 %v6701_v7 }
 0xb12   : > { %3077 = vmatprep.subr.bf16.mxu1 %v6706_v8 }
 0xb15   : > { %3078 = vmatpush1.bf16.msra.mxu1 %v6704_v10 }
 0xb16   : > { %3079 = vmatprep.subr.bf16.mxu1 %v6709_v11 }
 0xb19   : > { %3080 = vmatpush1.bf16.msra.mxu1 %v6707_v12 }
 0xb1a   : > { %3081 = vmatprep.subr.bf16.mxu1 %v6712_v13 }
 0xb1d   : > { %3082 = vmatpush1.bf16.msra.mxu1 %v6710_v14 }
 0xb1e   : > { %3083 = vmatprep.subr.bf16.mxu1 %v6715_v15 }
 0xb21   : > { %3084 = vmatpush1.bf16.msra.mxu1 %v6713_v16 }
 0xb22   : > { %3085 = vmatprep.subr.bf16.mxu1 %v6718_v17  ;;  %v6134_v1 = vpop.f32.mrf.mxu0 }
 0xb24   : > { %v2951_v49 = vpop.f32.mrf.mxu0 }
 0xb25   : > { %3086 = vmatpush1.bf16.msra.mxu1 %v6716_v18  ;;  %v2952_v58 = vadd.f32 %v5703_v55, %v2951_v49 }
 0xb26   : > { %3087 = vmatprep.subr.bf16.mxu1 %v6721_v19  ;;  %v6135_v53 = vpop.f32.mrf.mxu0 }
 0xb28   : > { %v2954_v56 = vpop.f32.mrf.mxu0 }
 0xb29   : > { %3088 = vmatpush1.bf16.msra.mxu1 %v6719_v21 }
 0xbcc   : > { %v5882_v60 = vpop.f32.mrf.mxu1 }
 0xbce   : > { %v5883_v20 = vpop.f32.mrf.mxu1 }
 0xbcf   : > { %v5884_v23 = vadd.f32 %v5883_v20, %v5882_v60  ;;  %v2955_v60 = vadd.f32 %v5703_v55, %v2954_v56  ;;  %v6138_v20 = vpop.f32.mrf.mxu0 }
 0xbd0   : > { %v5885_v51 = vpop.f32.mrf.mxu1  ;;  %v2976_v8 = vadd.f32 %v6138_v20, %v5703_v55 }
 0xbd1   : > { %v2776_v62 = vadd.f32 %v5884_v23, %v5684_v61  ;;  %v2960_v51 = vadd.f32 %v6134_v1, %v5703_v55  ;;  %v3115_v2 = vmul.f32 0.17677669, %v2955_v60  ;;  %v2967_v59 = vpop.f32.mrf.mxu0 }
 0xbd2   : > { %v5886_v63 = vpop.f32.mrf.mxu1  ;;  %v3120_v16 = vmul.f32 0.17677669, %v2976_v8 }
 0xbd3   : > { %v2781_v27 = vadd.f32 %v2776_v62, %v2451_v40  ;;  %v3114_v62 = vmul.f32 0.17677669, %v2952_v58  ;;  %v2963_v63 = vadd.f32 %v6135_v53, %v5703_v55  ;;  %v6139_v7 = vpop.f32.mrf.mxu0 }
 0xbd4   : > { %v2979_v13 = vadd.f32 %v6139_v7, %v5703_v55 }
 0xbd5   : > { %2784 = vadd.xlane.f32.xlu0 %v2781_v27  ;;  %v3122_v6 = vpack.c.bf16 %v3115_v2, %v3114_v62  ;;  %v2970_v10 = vpop.f32.mrf.mxu0 }
 0xbd6   : > { %v2971_v14 = vadd.f32 %v5703_v55, %v2970_v10  ;;  %v3121_v17 = vmul.f32 0.17677669, %v2979_v13 }
 0xbd7   : > { %6144 = vmatprep.mubr.msk.bf16.mxu0 %vm1685_vm1, %v3122_v6 }
 0xbd8   : > { %v3119_v15 = vmul.f32 0.17677669, %v2971_v14  ;;  %v3125_v19 = vpack.c.bf16 %v3121_v17, %v3120_v16 }
 0xc5e   : > { %v2785_v3 = vpop.xlane.xlu0 %2784 }
 0xc5f   : > { %v2786_v29 = vmul.f32 0.0078125, %v2785_v3 }
 0xc61   : > { %v8274_v4 = vsub.f32 %v2781_v27, %v2786_v29  ;;  %v3116_v29 = vmul.f32 0.17677669, %v2960_v51 }
 0xc63   : > { %v2788_v5 = vmul.f32 %v8274_v4, %v8274_v4 }
 0xc65   : > { %2789 = vadd.xlane.f32.xlu1 %v2788_v5  ;;  %v2968_v5 = vadd.f32 %v5703_v55, %v2967_v59 }
 0xc67   : > { %v3118_v12 = vmul.f32 0.17677669, %v2968_v5 }
 0xc69   : > { %v3124_v18 = vpack.c.bf16 %v3119_v15, %v3118_v12 }
 0xcee   : > { %v2790_v35 = vpop.xlane.xlu1 %2789 }
 0xcef   : > { %v2791_v37 = vmul.f32 0.0078125, %v2790_v35 }
 0xcf1   : > { %v2792_v38 = vadd.f32 1e-05, %v2791_v37 }
 0xcf3   : > { %6796 = vrsqrt.f32 %v2792_v38 }
 0xd00   : > { %v6797_v40 = vpop.eup %6796 }
 0xd01   : > { %v2794_v43 = vmul.f32 %v6797_v40, %v8274_v4  ;;  %v3117_v4 = vmul.f32 0.17677669, %v2963_v63 }
 0xd03   : > { %v2801_v45 = vmul.f32 %v5701_v41, %v2794_v43  ;;  %v3123_v11 = vpack.c.bf16 %v3117_v4, %v3116_v29 }
 0xd05   : > { %v2808_v30 = vadd.f32 %v5702_v44, %v2801_v45 }
 0xd07   : > { %v2809_v47 = vadd.f32 %v2808_v30, %v1322_v46 }
 0xd09   : > { %v2862_v36 = vpack.c.bf16 %v2809_v47, %v2809_v47  ;;  %2810 = vst [vmem:[%s1311_s3] sm:$0xff] %v2809_v47 }
 0xd0b   : > { %3106 = vmatmul.mubr.bf16.vlgmr.msra.gmra.mxu1 %v2862_v36 }
 0xdcb   : > { %v3107_v52 = vpop.f32.mrf.mxu1 }
 0xdcc   : > { %v3108_v54 = vadd.f32 %v3107_v52, %v2986_v48 }
 0xdcd   : > { %v3109_v25 = vpop.f32.mrf.mxu1 }
 0xdce   : > { %v3110_v57 = vadd.f32 %v3109_v25, %v2990_v50  ;;  %3762 = vrot.lane.b32.xlu1 %v3108_v54, %s7550_s19  ;;  %3421 = vrot.lane.b32.xlu0 %v3108_v54, %s7548_s20 }
 0xdcf   : > { %v3111_v61 = vpop.f32.mrf.mxu1 }
 0xdd0   : > { %v8295_v23 = vpack.c.bf16 %v3110_v57, %v3110_v57 }
 0xdd1   : > { %v3112_v27 = vpop.f32.mrf.mxu1 }
 0xdd2   : > { %6252 = vmatprep.subr.msk.bf16.mxu1 %vm3343_vm6, %v8295_v23  ;;  %4098 = vrot.lane.b32.xlu1 %v3108_v54, %s7549_s28  ;;  %v3345_v3 = vsel %vm3343_vm6, %v8295_v23, 0 }
 0xdd3   : > { %6153 = vmatpush3.bf16.msra.mxu1 %v3345_v3 }
 0xdd6   : > { %3462 = vrot.lane.b32.xlu1 %v3122_v6, %s7548_s20 }
 0xdda   : > { %3464 = vrot.lane.b32.xlu1 %v3123_v11, %s7548_s20 }
 0xdde   : > { %3466 = vrot.lane.b32.xlu1 %v3124_v18, %s7548_s20 }
 0xde2   : > { %3468 = vrot.lane.b32.xlu1 %v3125_v19, %s7548_s20 }
 0xde6   : > { %3799 = vrot.lane.b32.xlu1 %v3122_v6, %s7550_s19 }
 0xdea   : > { %3801 = vrot.lane.b32.xlu1 %v3123_v11, %s7550_s19 }
 0xdee   : > { %3803 = vrot.lane.b32.xlu1 %v3124_v18, %s7550_s19 }
 0xdf2   : > { %3805 = vrot.lane.b32.xlu1 %v3125_v19, %s7550_s19 }
 0xdf6   : > { %4135 = vrot.lane.b32.xlu1 %v3122_v6, %s7549_s28 }
 0xdfa   : > { %4137 = vrot.lane.b32.xlu1 %v3123_v11, %s7549_s28 }
 0xdfe   : > { %4139 = vrot.lane.b32.xlu1 %v3124_v18, %s7549_s28 }
 0xe40   : > { %v3422_v21 = vpop.permute.xlu0 %3421  ;;  %v3763_v24 = vpop.permute.xlu1 %3762 }
 0xe41   : > { %v6574_v22 = vpack.i.bf16 %v3422_v21, %v3108_v54 }
 0xe43   : > { %6575 = vxpose.xlu0.b32.start.end [1/1] (short) (narrow) %v6574_v22, 32 }
 0xe44   : > { %v4099_v26 = vpop.permute.xlu1 %4098 }
 0xe45   : > { %v6596_v28 = vpack.i.bf16 %v4099_v26, %v3763_v24 }
 0xe48   : > { %v3463_v43 = vpop.permute.xlu1 %3462 }
 0xe4c   : > { %v3465_v1 = vpop.permute.xlu1 %3464 }
 0xe50   : > { %6597 = vxpose.xlu0.b32.start.end [1/1] (short) (narrow) %v6596_v28, 32  ;;  %v3467_v52 = vpop.permute.xlu1 %3466 }
 0xe54   : > { %v3469_v56 = vpop.permute.xlu1 %3468 }
 0xe58   : > { %v3800_v60 = vpop.permute.xlu1 %3799 }
 0xe5c   : > { %v3802_v63 = vpop.permute.xlu1 %3801 }
 0xe60   : > { %v3804_v27 = vpop.permute.xlu1 %3803 }
 0xe64   : > { %v3806_v29 = vpop.permute.xlu1 %3805 }
 0xe68   : > { %v4136_v4 = vpop.permute.xlu1 %4135 }
 0xe6c   : > { %v4138_v5 = vpop.permute.xlu1 %4137 }
 0xe70   : > { %v4140_v6 = vpop.permute.xlu1 %4139 }
 0xe85   : > { %4141 = vrot.lane.b32.xlu0 %v3125_v19, %s7549_s28 }
 0xebf   : > { %v6576_v31 = vpop.trf.xlu0 }
 0xec0   : > { %v6577_v41 = vunpack.i.l.bf16 %v6576_v31  ;;  %v6580_v48 = vunpack.i.h.bf16 %v6576_v31 }
 0xec3   : > { %v6581_v32 = vpop.trf.xlu0 }
 0xec4   : > { %v6582_v35 = vunpack.i.l.bf16 %v6581_v32  ;;  %v6585_v39 = vunpack.i.h.bf16 %v6581_v32 }
 0xec6   : > { %v3158_v45 = vpack.c.bf16 %v6582_v35, %v6577_v41  ;;  %v3456_v50 = vpack.c.bf16 %v6585_v39, %v6580_v48 }
 0xec7   : > { %v6586_v33 = vpop.trf.xlu0 }
 0xec8   : > { %v6587_v38 = vunpack.i.l.bf16 %v6586_v33  ;;  %v6590_v30 = vunpack.i.h.bf16 %v6586_v33 }
 0xecb   : > { %v6591_v34 = vpop.trf.xlu0 }
 0xecc   : > { %v6592_v37 = vunpack.i.l.bf16 %v6591_v34  ;;  %v6595_v46 = vunpack.i.h.bf16 %v6591_v34 }
 0xece   : > { %v3159_v40 = vpack.c.bf16 %v6592_v37, %v6587_v38  ;;  %v3457_v36 = vpack.c.bf16 %v6595_v46, %v6590_v30 }
 0xecf   : > { %v6598_v44 = vpop.trf.xlu0 }
 0xed0   : > { %6140 = vmatprep.subr.bf16.mxu0 %v3159_v40  ;;  %v6599_v58 = vunpack.i.l.bf16 %v6598_v44  ;;  %v6602_v59 = vunpack.i.h.bf16 %v6598_v44 }
 0xed1   : > { %6141 = vmatpush3.bf16.msra.mxu0 %v3159_v40 }
 0xed2   : > { %6142 = vmatprep.subr.bf16.mxu0 %v3158_v45 }
 0xed3   : > { %v6603_v47 = vpop.trf.xlu0 }
 0xed4   : > { %v6604_v57 = vunpack.i.l.bf16 %v6603_v47  ;;  %v6607_v2 = vunpack.i.h.bf16 %v6603_v47 }
 0xed5   : > { %6143 = vmatpush3.bf16.msra.mxu0 %v3158_v45 }
 0xed6   : > { %6162 = vmatprep.subr.bf16.mxu0 %v3457_v36  ;;  %v3797_v61 = vpack.c.bf16 %v6604_v57, %v6599_v58  ;;  %v4133_v3 = vpack.c.bf16 %v6607_v2, %v6602_v59 }
 0xed7   : > { %v6608_v49 = vpop.trf.xlu0 }
 0xed8   : > { %6145 = vmatmul.mubr.msk.bf16.vlgmr.msra.gmra.mxu0 %vm1685_vm1, %v3123_v11  ;;  %v6609_v53 = vunpack.i.l.bf16 %v6608_v49  ;;  %v6612_v51 = vunpack.i.h.bf16 %v6608_v49 }
 0xed9   : > { %6148 = vmatprep.mubr.msk.bf16.mxu0 %vm1685_vm1, %v3124_v18  ;;  %6163 = vmatpush3.bf16.msra.mxu0 %v3457_v36 }
 0xeda   : > { %6164 = vmatprep.subr.bf16.mxu0 %v3456_v50 }
 0xedb   : > { %v6613_v54 = vpop.trf.xlu0 }
 0xedc   : > { %v6614_v25 = vunpack.i.l.bf16 %v6613_v54  ;;  %v6617_v20 = vunpack.i.h.bf16 %v6613_v54 }
 0xedd   : > { %6165 = vmatpush3.bf16.msra.mxu0 %v3456_v50 }
 0xede   : > { %v3798_v55 = vpack.c.bf16 %v6614_v25, %v6609_v53  ;;  %v4134_v62 = vpack.c.bf16 %v6617_v20, %v6612_v51 }
 0xee0   : > { %6149 = vmatmul.mubr.msk.bf16.gmra.mxu0 %vm1685_vm1, %v3125_v19  ;;  %6184 = vmatprep.subr.bf16.mxu0 %v3798_v55 }
 0xee1   : > { %6166 = vmatprep.mubr.msk.bf16.mxu0 %vm1685_vm1, %v3463_v43 }
 0xee8   : > { %6167 = vmatmul.mubr.msk.bf16.vlgmr.msra.gmra.mxu0 %vm1685_vm1, %v3465_v1 }
 0xee9   : > { %6170 = vmatprep.mubr.msk.bf16.mxu0 %vm1685_vm1, %v3467_v52  ;;  %6185 = vmatpush3.bf16.msra.mxu0 %v3798_v55 }
 0xeea   : > { %6186 = vmatprep.subr.bf16.mxu0 %v3797_v61 }
 0xeed   : > { %6187 = vmatpush3.bf16.msra.mxu0 %v3797_v61 }
 0xeee   : > { %6206 = vmatprep.subr.bf16.mxu0 %v4134_v62 }
 0xef0   : > { %6171 = vmatmul.mubr.msk.bf16.gmra.mxu0 %vm1685_vm1, %v3469_v56 }
 0xef1   : > { %6188 = vmatprep.mubr.msk.bf16.mxu0 %vm1685_vm1, %v3800_v60 }
 0xef7   : > { %v4142_v7 = vpop.permute.xlu0 %4141 }
 0xef8   : > { %6189 = vmatmul.mubr.msk.bf16.vlgmr.msra.gmra.mxu0 %vm1685_vm1, %v3802_v63 }
 0xef9   : > { %6192 = vmatprep.mubr.msk.bf16.mxu0 %vm1685_vm1, %v3804_v27  ;;  %6207 = vmatpush3.bf16.msra.mxu0 %v4134_v62 }
 0xefa   : > { %6208 = vmatprep.subr.bf16.mxu0 %v4133_v3 }
 0xefd   : > { %6209 = vmatpush3.bf16.msra.mxu0 %v4133_v3 }
 0xf00   : > { %6193 = vmatmul.mubr.msk.bf16.gmra.mxu0 %vm1685_vm1, %v3806_v29 }
 0xf01   : > { %6210 = vmatprep.mubr.msk.bf16.mxu0 %vm1685_vm1, %v4136_v4 }
 0xf08   : > { %6211 = vmatmul.mubr.msk.bf16.vlgmr.msra.gmra.mxu0 %vm1685_vm1, %v4138_v5 }
 0xf09   : > { %6214 = vmatprep.mubr.msk.bf16.mxu0 %vm1685_vm1, %v4140_v6 }
 0xf10   : > { %6215 = vmatmul.mubr.msk.bf16.gmra.mxu0 %vm1685_vm1, %v4142_v7 }
 0xf98   : > { %v8330_v8 = vpop.f32.mrf.mxu0 }
 0xf99   : > { %v3245_v10 = vsel %vm3238_vm7, %v8330_v8, -inf }
 0xf9a   : > { %3246 = vmax.xlane.f32.xlu1 %v3245_v10  ;;  %v8334_v11 = vpop.f32.mrf.mxu0 }
 0xf9b   : > { %v3239_v13 = vsel %vm3238_vm7, %v8334_v11, -inf }
 0xf9c   : > { %v8336_v12 = vpop.f32.mrf.mxu0 }
 0xf9d   : > { %v3248_v16 = vsel %vm3238_vm7, %v8336_v12, -inf }
 0xf9e   : > { %3240 = vmax.xlane.f32.xlu1 %v3239_v13  ;;  %v8340_v14 = vpop.f32.mrf.mxu0 }
 0xf9f   : > { %v3242_v19 = vsel %vm3238_vm7, %v8340_v14, -inf }
 0xfa0   : > { %v8342_v15 = vpop.f32.mrf.mxu0 }
 0xfa1   : > { %v3257_v26 = vsel %vm3238_vm7, %v8342_v15, -inf }
 0xfa2   : > { %3249 = vmax.xlane.f32.xlu1 %v3248_v16  ;;  %v8346_v17 = vpop.f32.mrf.mxu0 }
 0xfa3   : > { %v3251_v32 = vsel %vm3238_vm7, %v8346_v17, -inf }
 0xfa4   : > { %v8348_v18 = vpop.f32.mrf.mxu0 }
 0xfa5   : > { %v3260_v35 = vsel %vm3238_vm7, %v8348_v18, -inf }
 0xfa6   : > { %3243 = vmax.xlane.f32.xlu1 %v3242_v19  ;;  %v8352_v21 = vpop.f32.mrf.mxu0 }
 0xfa7   : > { %v3254_v22 = vsel %vm3238_vm7, %v8352_v21, -inf }
 0xfa8   : > { %v8356_v24 = vpop.f32.mrf.mxu0  ;;  %3255 = vmax.xlane.f32.xlu0 %v3254_v22 }
 0xfa9   : > { %v3553_v41 = vsel %vm3238_vm7, %v8356_v24, -inf }
 0xfaa   : > { %3258 = vmax.xlane.f32.xlu1 %v3257_v26  ;;  %v8360_v28 = vpop.f32.mrf.mxu0 }
 0xfab   : > { %v3547_v45 = vsel %vm3238_vm7, %v8360_v28, -inf }
 0xfac   : > { %v8362_v31 = vpop.f32.mrf.mxu0 }
 0xfad   : > { %v3556_v36 = vsel %vm3238_vm7, %v8362_v31, -inf }
 0xfae   : > { %3252 = vmax.xlane.f32.xlu1 %v3251_v32  ;;  %v8366_v33 = vpop.f32.mrf.mxu0 }
 0xfaf   : > { %v3550_v49 = vsel %vm3238_vm7, %v8366_v33, -inf }
 0xfb0   : > { %v8368_v34 = vpop.f32.mrf.mxu0 }
 0xfb1   : > { %v3565_v37 = vsel %vm3238_vm7, %v8368_v34, -inf }
 0xfb2   : > { %3261 = vmax.xlane.f32.xlu1 %v3260_v35  ;;  %v8374_v38 = vpop.f32.mrf.mxu0  ;;  %3566 = vmax.xlane.f32.xlu0 %v3565_v37 }
 0xfb3   : > { %v3559_v54 = vsel %vm3238_vm7, %v8374_v38, -inf }
 0xfb4   : > { %v8376_v40 = vpop.f32.mrf.mxu0 }
 0xfb5   : > { %v3568_v57 = vsel %vm3238_vm7, %v8376_v40, -inf }
 0xfb6   : > { %3554 = vmax.xlane.f32.xlu1 %v3553_v41  ;;  %v8380_v43 = vpop.f32.mrf.mxu0 }
 0xfb7   : > { %v3562_v20 = vsel %vm3238_vm7, %v8380_v43, -inf }
 0xfb8   : > { %v8382_v44 = vpop.f32.mrf.mxu0 }
 0xfb9   : > { %v3890_v46 = vsel %vm3238_vm7, %v8382_v44, -inf }
 0xfba   : > { %3548 = vmax.xlane.f32.xlu1 %v3547_v45  ;;  %v8388_v30 = vpop.f32.mrf.mxu0  ;;  %3891 = vmax.xlane.f32.xlu0 %v3890_v46 }
 0xfbb   : > { %v3884_v39 = vsel %vm3238_vm7, %v8388_v30, -inf }
 0xfbc   : > { %v8390_v47 = vpop.f32.mrf.mxu0 }
 0xfbd   : > { %v3893_v27 = vsel %vm3238_vm7, %v8390_v47, -inf }
 0xfbe   : > { %3557 = vmax.xlane.f32.xlu1 %v3556_v36  ;;  %v8396_v1 = vpop.f32.mrf.mxu0  ;;  %3885 = vmax.xlane.f32.xlu0 %v3884_v39 }
 0xfbf   : > { %v3887_v3 = vsel %vm3238_vm7, %v8396_v1, -inf }
 0xfc0   : > { %v8398_v48 = vpop.f32.mrf.mxu0 }
 0xfc1   : > { %v3902_v50 = vsel %vm3238_vm7, %v8398_v48, -inf }
 0xfc2   : > { %3551 = vmax.xlane.f32.xlu1 %v3550_v49  ;;  %v8404_v52 = vpop.f32.mrf.mxu0  ;;  %3903 = vmax.xlane.f32.xlu0 %v3902_v50 }
 0xfc3   : > { %v3896_v25 = vsel %vm3238_vm7, %v8404_v52, -inf }
 0xfc4   : > { %v8406_v53 = vpop.f32.mrf.mxu0 }
 0xfc5   : > { %v3905_v4 = vsel %vm3238_vm7, %v8406_v53, -inf }
 0xfc6   : > { %3560 = vmax.xlane.f32.xlu1 %v3559_v54  ;;  %v8412_v55 = vpop.f32.mrf.mxu0  ;;  %3897 = vmax.xlane.f32.xlu0 %v3896_v25 }
 0xfc7   : > { %v3899_v5 = vsel %vm3238_vm7, %v8412_v55, -inf }
 0xfc8   : > { %v8414_v56 = vpop.f32.mrf.mxu0 }
 0xfc9   : > { %v4226_v58 = vsel %vm3238_vm7, %v8414_v56, -inf }
 0xfca   : > { %3569 = vmax.xlane.f32.xlu1 %v3568_v57  ;;  %v8420_v60 = vpop.f32.mrf.mxu0  ;;  %4227 = vmax.xlane.f32.xlu0 %v4226_v58 }
 0xfcb   : > { %v4220_v51 = vsel %vm3238_vm7, %v8420_v60, -inf }
 0xfcc   : > { %v8422_v61 = vpop.f32.mrf.mxu0 }
 0xfcd   : > { %v4229_v6 = vsel %vm3238_vm7, %v8422_v61, -inf }
 0xfce   : > { %v8428_v62 = vpop.f32.mrf.mxu0  ;;  %3563 = vmax.xlane.f32.xlu1 %v3562_v20  ;;  %4221 = vmax.xlane.f32.xlu0 %v4220_v51 }
 0xfcf   : > { %v4223_v7 = vsel %vm3238_vm7, %v8428_v62, -inf }
 0xfd0   : > { %v8430_v63 = vpop.f32.mrf.mxu0 }
 0xfd1   : > { %v4238_v2 = vsel %vm3238_vm7, %v8430_v63, -inf }
 0xfd2   : > { %v8436_v59 = vpop.f32.mrf.mxu0  ;;  %3894 = vmax.xlane.f32.xlu1 %v3893_v27  ;;  %4239 = vmax.xlane.f32.xlu0 %v4238_v2 }
 0xfd3   : > { %v4232_v29 = vsel %vm3238_vm7, %v8436_v59, -inf }
 0xfd4   : > { %v8450_v10 = vpop.f32.mrf.mxu0 }
 0xfd5   : > { %v4241_v13 = vsel %vm3238_vm7, %v8450_v10, -inf }
 0xfd6   : > { %3888 = vmax.xlane.f32.xlu1 %v3887_v3  ;;  %4233 = vmax.xlane.f32.xlu0 %v4232_v29  ;;  %v8454_v16 = vpop.f32.mrf.mxu0 }
 0xfd7   : > { %v4235_v19 = vsel %vm3238_vm7, %v8454_v16, -inf }
 0xfda   : > { %3906 = vmax.xlane.f32.xlu1 %v3905_v4 }
 0xfde   : > { %3900 = vmax.xlane.f32.xlu1 %v3899_v5 }
 0xfe2   : > { %4230 = vmax.xlane.f32.xlu1 %v4229_v6 }
 0xfe6   : > { %4224 = vmax.xlane.f32.xlu1 %v4223_v7 }
 0xfea   : > { %4242 = vmax.xlane.f32.xlu1 %v4241_v13 }
 0xfec   : > { %3640 = vrot.lane.b32.xlu0 %v8295_v23, %s7548_s20 }
 0xfee   : > { %4236 = vmax.xlane.f32.xlu1 %v4235_v19 }
0x1023   : > { %v3247_v22 = vpop.xlane.xlu1 %3246 }
0x1024   : > { %v3265_v26 = vsub.f32 %v8330_v8, %v3247_v22 }
0x1026   : > { %v3275_v32 = vmul.f32 1.442695, %v3265_v26 }
0x1027   : > { %v3241_v35 = vpop.xlane.xlu1 %3240 }
0x1028   : > { %6798 = vpow2.f32 %v3275_v32  ;;  %v3263_v37 = vsub.f32 %v8334_v11, %v3241_v35 }
0x102a   : > { %v3271_v41 = vmul.f32 1.442695, %v3263_v37 }
0x102b   : > { %v3250_v45 = vpop.xlane.xlu1 %3249 }
0x102c   : > { %6800 = vpow2.f32 %v3271_v41  ;;  %v3266_v46 = vsub.f32 %v8336_v12, %v3250_v45 }
0x102e   : > { %v3277_v36 = vmul.f32 1.442695, %v3266_v46 }
0x102f   : > { %v3244_v39 = vpop.xlane.xlu1 %3243 }
0x1030   : > { %6802 = vpow2.f32 %v3277_v36  ;;  %v3264_v49 = vsub.f32 %v8340_v14, %v3244_v39 }
0x1031   : > { %v3256_v58 = vpop.xlane.xlu0 %3255 }
0x1032   : > { %v3273_v50 = vmul.f32 1.442695, %v3264_v49  ;;  %v3268_v14 = vsub.f32 %v8352_v21, %v3256_v58 }
0x1033   : > { %v3259_v54 = vpop.xlane.xlu1 %3258 }
0x1034   : > { %6804 = vpow2.f32 %v3273_v50  ;;  %v3269_v8 = vsub.f32 %v8342_v15, %v3259_v54  ;;  %v3281_v4 = vmul.f32 1.442695, %v3268_v14 }
0x1035   : > { %v8465_v25 = vpop.eup %6798 }
0x1036   : > { %v3283_v57 = vmul.f32 1.442695, %v3269_v8  ;;  %v3293_v11 = vsel %vm3238_vm7, %v8465_v25, 0.0 }
0x1037   : > { %v3253_v20 = vpop.xlane.xlu1 %3252  ;;  %3294 = vadd.xlane.f32.xlu0 %v3293_v11 }
0x1038   : > { %6806 = vpow2.f32 %v3283_v57  ;;  %v3267_v12 = vsub.f32 %v8346_v17, %v3253_v20 }
0x1039   : > { %v8470_v51 = vpop.eup %6800 }
0x103a   : > { %v3279_v27 = vmul.f32 1.442695, %v3267_v12  ;;  %v3287_v15 = vsel %vm3238_vm7, %v8470_v51, 0.0 }
0x103b   : > { %v3262_v2 = vpop.xlane.xlu1 %3261  ;;  %3288 = vadd.xlane.f32.xlu0 %v3287_v15  ;;  %v3567_v6 = vpop.xlane.xlu0 %3566 }
0x103c   : > { %6808 = vpow2.f32 %v3279_v27  ;;  %v3270_v3 = vsub.f32 %v8348_v18, %v3262_v2  ;;  %v3577_v19 = vsub.f32 %v8368_v34, %v3567_v6 }
0x103d   : > { %v8476_v29 = vpop.eup %6802 }
0x103e   : > { %v3285_v5 = vmul.f32 1.442695, %v3270_v3  ;;  %v3296_v17 = vsel %vm3238_vm7, %v8476_v29, 0.0  ;;  %v3591_v41 = vmul.f32 1.442695, %v3577_v19 }
0x103f   : > { %v3555_v7 = vpop.xlane.xlu1 %3554  ;;  %3297 = vadd.xlane.f32.xlu1 %v3296_v17 }
0x1040   : > { %6810 = vpow2.f32 %v3285_v5  ;;  %v3573_v21 = vsub.f32 %v8356_v24, %v3555_v7 }
0x1041   : > { %v8481_v13 = vpop.eup %6804  ;;  %6812 = vpow2.f32 %v3281_v4 }
0x1042   : > { %v3583_v22 = vmul.f32 1.442695, %v3573_v21  ;;  %v3290_v18 = vsel %vm3238_vm7, %v8481_v13, 0.0 }
0x1043   : > { %v3549_v26 = vpop.xlane.xlu1 %3548  ;;  %3291 = vadd.xlane.f32.xlu1 %v3290_v18  ;;  %v3892_v32 = vpop.xlane.xlu0 %3891 }
0x1044   : > { %6814 = vpow2.f32 %v3583_v22  ;;  %v3571_v35 = vsub.f32 %v8360_v28, %v3549_v26  ;;  %v3910_v11 = vsub.f32 %v8382_v44, %v3892_v32 }
0x1045   : > { %v8487_v37 = vpop.eup %6806 }
0x1046   : > { %v3579_v45 = vmul.f32 1.442695, %v3571_v35  ;;  %v3305_v24 = vsel %vm3238_vm7, %v8487_v37, 0.0  ;;  %v3920_v2 = vmul.f32 1.442695, %v3910_v11 }
0x1047   : > { %v3558_v46 = vpop.xlane.xlu1 %3557  ;;  %3306 = vadd.xlane.f32.xlu0 %v3305_v24  ;;  %v3886_v34 = vpop.xlane.xlu0 %3885 }
0x1048   : > { %6816 = vpow2.f32 %v3579_v45  ;;  %v3574_v36 = vsub.f32 %v8362_v31, %v3558_v46 }
0x1049   : > { %v8492_v39 = vpop.eup %6808  ;;  %6818 = vpow2.f32 %v3591_v41 }
0x104a   : > { %v3585_v49 = vmul.f32 1.442695, %v3574_v36  ;;  %v3299_v28 = vsel %vm3238_vm7, %v8492_v39, 0.0 }
0x104b   : > { %v3552_v50 = vpop.xlane.xlu1 %3551  ;;  %3300 = vadd.xlane.f32.xlu0 %v3299_v28  ;;  %v3904_v54 = vpop.xlane.xlu0 %3903 }
0x104c   : > { %6820 = vpow2.f32 %v3585_v49  ;;  %v3572_v8 = vsub.f32 %v8366_v33, %v3552_v50  ;;  %v3908_v33 = vsub.f32 %v8388_v30, %v3886_v34  ;;  %v3914_v30 = vsub.f32 %v8398_v48, %v3904_v54 }
0x104d   : > { %v8497_v57 = vpop.eup %6810 }
0x104e   : > { %v3581_v58 = vmul.f32 1.442695, %v3572_v8  ;;  %v3308_v31 = vsel %vm3238_vm7, %v8497_v57, 0.0  ;;  %v8502_v20 = vpop.eup %6812  ;;  %v3916_v7 = vmul.f32 1.442695, %v3908_v33 }
0x104f   : > { %v3561_v12 = vpop.xlane.xlu1 %3560  ;;  %3309 = vadd.xlane.f32.xlu1 %v3308_v31  ;;  %v3898_v14 = vpop.xlane.xlu0 %3897  ;;  %v3302_v4 = vsel %vm3238_vm7, %v8502_v20, 0.0  ;;  %v3928_v41 = vmul.f32 1.442695, %v3914_v30 }
0x1050   : > { %6822 = vpow2.f32 %v3581_v58  ;;  %v3575_v27 = vsub.f32 %v8374_v38, %v3561_v12  ;;  %v3912_v35 = vsub.f32 %v8404_v52, %v3898_v14 }
0x1051   : > { %v8505_v15 = vpop.eup %6814 }
0x1052   : > { %v3587_v3 = vmul.f32 1.442695, %v3575_v27  ;;  %v3601_v44 = vsel %vm3238_vm7, %v8505_v15, 0.0  ;;  %v3924_v49 = vmul.f32 1.442695, %v3912_v35 }
0x1053   : > { %v3570_v5 = vpop.xlane.xlu1 %3569  ;;  %3602 = vadd.xlane.f32.xlu0 %v3601_v44  ;;  %3303 = vadd.xlane.f32.xlu1 %v3302_v4  ;;  %v8512_v17 = vpop.xlane.xlu0 %4227 }
0x1054   : > { %6824 = vpow2.f32 %v3587_v3  ;;  %v3578_v38 = vsub.f32 %v8376_v40, %v3570_v5 }
0x1055   : > { %v8515_v6 = vpop.eup %6816  ;;  %6826 = vpow2.f32 %v3920_v2 }
0x1056   : > { %v3593_v21 = vmul.f32 1.442695, %v3578_v38  ;;  %v3595_v19 = vsel %vm3238_vm7, %v8515_v6, 0.0  ;;  %v8520_v22 = vpop.eup %6818 }
0x1057   : > { %v3564_v18 = vpop.xlane.xlu1 %3563  ;;  %3596 = vadd.xlane.f32.xlu0 %v3595_v19  ;;  %v8522_v26 = vpop.xlane.xlu0 %4221  ;;  %v3613_v24 = vsel %vm3238_vm7, %v8520_v22, 0.0 }
0x1058   : > { %6828 = vpow2.f32 %v3593_v21  ;;  %v3576_v32 = vsub.f32 %v8380_v43, %v3564_v18 }
0x1059   : > { %v8525_v40 = vpop.eup %6820  ;;  %6830 = vpow2.f32 %v3916_v7 }
0x105a   : > { %v3589_v48 = vmul.f32 1.442695, %v3576_v32  ;;  %v3604_v45 = vsel %vm3238_vm7, %v8525_v40, 0.0 }
0x105b   : > { %v3895_v46 = vpop.xlane.xlu1 %3894  ;;  %3605 = vadd.xlane.f32.xlu1 %v3604_v45  ;;  %3614 = vadd.xlane.f32.xlu0 %v3613_v24  ;;  %v4240_v34 = vpop.xlane.xlu0 %4239 }
0x105c   : > { %6832 = vpow2.f32 %v3589_v48  ;;  %v3911_v43 = vsub.f32 %v8390_v47, %v3895_v46  ;;  %v4250_v31 = vsub.f32 %v8430_v63, %v4240_v34  ;;  %v4246_v63 = vsub.f32 %v8414_v56, %v8512_v17 }
0x105d   : > { %v8533_v36 = vpop.eup %6822  ;;  %6834 = vpow2.f32 %v3928_v41  ;;  %v4244_v17 = vsub.f32 %v8420_v60, %v8522_v26 }
0x105e   : > { %v3922_v52 = vmul.f32 1.442695, %v3911_v43  ;;  %v3598_v28 = vsel %vm3238_vm7, %v8533_v36, 0.0  ;;  %v4264_v4 = vmul.f32 1.442695, %v4250_v31 }
0x105f   : > { %v3889_v50 = vpop.xlane.xlu1 %3888  ;;  %3599 = vadd.xlane.f32.xlu1 %v3598_v28  ;;  %v4234_v54 = vpop.xlane.xlu0 %4233  ;;  %v4256_v56 = vmul.f32 1.442695, %v4246_v63  ;;  %v4252_v60 = vmul.f32 1.442695, %v4244_v17 }
0x1060   : > { %6836 = vpow2.f32 %v3922_v52  ;;  %v3909_v8 = vsub.f32 %v8396_v1, %v3889_v50  ;;  %v4248_v11 = vsub.f32 %v8436_v59, %v4234_v54 }
0x1061   : > { %v8539_v58 = vpop.eup %6824  ;;  %6838 = vpow2.f32 %v3924_v49 }
0x1062   : > { %v8541_v47 = vpop.eup %6826  ;;  %v3918_v12 = vmul.f32 1.442695, %v3909_v8  ;;  %v4260_v14 = vmul.f32 1.442695, %v4248_v11  ;;  %v3607_v27 = vsel %vm3238_vm7, %v8539_v58, 0.0 }
0x1063   : > { %v3907_v2 = vpop.xlane.xlu1 %3906  ;;  %3608 = vadd.xlane.f32.xlu0 %v3607_v27  ;;  %v8546_v33 = vpop.permute.xlu0 %3640  ;;  %v3938_v3 = vsel %vm3238_vm7, %v8541_v47, 0.0 }
0x1064   : > { %6840 = vpow2.f32 %v3918_v12  ;;  %v3915_v1 = vsub.f32 %v8406_v53, %v3907_v2  ;;  %6253 = vmatprep.subr.msk.bf16.mxu1 %vm3343_vm6, %v8546_v33 }
0x1065   : > { %v8551_v59 = vpop.eup %6828  ;;  %6842 = vpow2.f32 %v4260_v14 }
0x1066   : > { %v8557_v44 = vpop.eup %6830  ;;  %v3930_v5 = vmul.f32 1.442695, %v3915_v1  ;;  %v3616_v38 = vsel %vm3238_vm7, %v8551_v59, 0.0 }
0x1067   : > { %v3901_v53 = vpop.xlane.xlu1 %3900  ;;  %3617 = vadd.xlane.f32.xlu1 %v3616_v38  ;;  %3939 = vadd.xlane.f32.xlu0 %v3938_v3  ;;  %v3932_v18 = vsel %vm3238_vm7, %v8557_v44, 0.0 }
0x1068   : > { %6844 = vpow2.f32 %v3930_v5  ;;  %v3913_v7 = vsub.f32 %v8412_v55, %v3901_v53 }
0x1069   : > { %v8562_v30 = vpop.eup %6832  ;;  %6846 = vpow2.f32 %v4264_v4 }
0x106a   : > { %v3926_v21 = vmul.f32 1.442695, %v3913_v7  ;;  %v3610_v19 = vsel %vm3238_vm7, %v8562_v30, 0.0  ;;  %v8570_v32 = vpop.eup %6834 }
0x106b   : > { %v4231_v35 = vpop.xlane.xlu1 %4230  ;;  %3611 = vadd.xlane.f32.xlu1 %v3610_v19  ;;  %3933 = vadd.xlane.f32.xlu0 %v3932_v18  ;;  %v3950_v45 = vsel %vm3238_vm7, %v8570_v32, 0.0 }
0x106c   : > { %6848 = vpow2.f32 %v3926_v21  ;;  %v4247_v41 = vsub.f32 %v8422_v61, %v4231_v35 }
0x106d   : > { %v8572_v55 = vpop.eup %6836  ;;  %6850 = vpow2.f32 %v4256_v56 }
0x106e   : > { %v8575_v48 = vpop.eup %6838  ;;  %v3941_v26 = vsel %vm3238_vm7, %v8572_v55, 0.0  ;;  %v4258_v34 = vmul.f32 1.442695, %v4247_v41  ;;  %6852 = vpow2.f32 %v4252_v60 }
0x106f   : > { %v4225_v24 = vpop.xlane.xlu1 %4224  ;;  %3942 = vadd.xlane.f32.xlu1 %v3941_v26  ;;  %3951 = vadd.xlane.f32.xlu0 %v3950_v45  ;;  %v3944_v49 = vsel %vm3238_vm7, %v8575_v48, 0.0 }
0x1070   : > { %v4245_v43 = vsub.f32 %v8428_v62, %v4225_v24  ;;  %6854 = vpow2.f32 %v4258_v34 }
0x1071   : > { %v8581_v46 = vpop.eup %6840 }
0x1072   : > { %v3935_v61 = vsel %vm3238_vm7, %v8581_v46, 0.0  ;;  %v8588_v52 = vpop.eup %6842  ;;  %v4254_v8 = vmul.f32 1.442695, %v4245_v43 }
0x1073   : > { %v4243_v28 = vpop.xlane.xlu1 %4242  ;;  %3936 = vadd.xlane.f32.xlu1 %v3935_v61  ;;  %3945 = vadd.xlane.f32.xlu0 %v3944_v49  ;;  %v4280_v31 = vsel %vm3238_vm7, %v8588_v52, 0.0 }
0x1074   : > { %v4251_v50 = vsub.f32 %v8450_v10, %v4243_v28 }
0x1075   : > { %v8591_v54 = vpop.eup %6844 }
0x1076   : > { %v4266_v11 = vmul.f32 1.442695, %v4251_v50  ;;  %v3953_v62 = vsel %vm3238_vm7, %v8591_v54, 0.0  ;;  %v8597_v12 = vpop.eup %6846 }
0x1077   : > { %3954 = vadd.xlane.f32.xlu1 %v3953_v62  ;;  %4281 = vadd.xlane.f32.xlu0 %v4280_v31  ;;  %v4286_v27 = vsel %vm3238_vm7, %v8597_v12, 0.0  ;;  %v4237_v17 = vpop.xlane.xlu1 %4236 }
0x1078   : > { %6856 = vpow2.f32 %v4266_v11  ;;  %v4249_v21 = vsub.f32 %v8454_v16, %v4237_v17 }
0x1079   : > { %v8599_v14 = vpop.eup %6848  ;;  %6858 = vpow2.f32 %v4254_v8 }
0x107a   : > { %v3947_v10 = vsel %vm3238_vm7, %v8599_v14, 0.0  ;;  %v8605_v2 = vpop.eup %6850  ;;  %v4262_v19 = vmul.f32 1.442695, %v4249_v21 }
0x107b   : > { %3948 = vadd.xlane.f32.xlu1 %v3947_v10  ;;  %4287 = vadd.xlane.f32.xlu0 %v4286_v27  ;;  %v4274_v1 = vsel %vm3238_vm7, %v8605_v2, 0.0  ;;  %v8609_v63 = vpop.eup %6852 }
0x107c   : > { %v4268_v4 = vsel %vm3238_vm7, %v8609_v63, 0.0  ;;  %6860 = vpow2.f32 %v4262_v19 }
0x107d   : > { %v8611_v3 = vpop.eup %6854 }
0x107e   : > { %v4277_v38 = vsel %vm3238_vm7, %v8611_v3, 0.0 }
0x107f   : > { %4275 = vadd.xlane.f32.xlu1 %v4274_v1  ;;  %v3655_v1 = vsel %vm3343_vm6, %v8546_v33, 0 }
0x1083   : > { %4269 = vadd.xlane.f32.xlu1 %v4268_v4 }
0x1085   : > { %v8615_v5 = vpop.eup %6856 }
0x1086   : > { %v4289_v53 = vsel %vm3238_vm7, %v8615_v5, 0.0  ;;  %v8621_v7 = vpop.eup %6858 }
0x1087   : > { %4278 = vadd.xlane.f32.xlu1 %v4277_v38  ;;  %4290 = vadd.xlane.f32.xlu0 %v4289_v53  ;;  %v4271_v56 = vsel %vm3238_vm7, %v8621_v7, 0.0 }
0x1089   : > { %v8630_v18 = vpop.eup %6860 }
0x108a   : > { %v4283_v35 = vsel %vm3238_vm7, %v8630_v18, 0.0 }
0x108b   : > { %4272 = vadd.xlane.f32.xlu1 %v4271_v56 }
0x109c   : > { %3976 = vrot.lane.b32.xlu1 %v8295_v23, %s7550_s19 }
0x109d   : > { %4312 = vrot.lane.b32.xlu0 %v8295_v23, %s7549_s28 }
0x10c0   : > { %4284 = vadd.xlane.f32.xlu1 %v4283_v35  ;;  %v3295_v41 = vpop.xlane.xlu0 %3294 }
0x10c4   : > { %v3289_v60 = vpop.xlane.xlu0 %3288 }
0x10c8   : > { %v3298_v26 = vpop.xlane.xlu1 %3297 }
0x10c9   : > { %6862 = vrcp.f32 %v3298_v26 }
0x10ca   : > { %6864 = vrcp.f32 %v3289_v60 }
0x10cb   : > { %6866 = vrcp.f32 %v3295_v41 }
0x10cc   : > { %v3292_v45 = vpop.xlane.xlu1 %3291 }
0x10cd   : > { %6868 = vrcp.f32 %v3292_v45 }
0x10d0   : > { %v3307_v23 = vpop.xlane.xlu0 %3306 }
0x10d4   : > { %v3301_v16 = vpop.xlane.xlu0 %3300 }
0x10d6   : > { %v6863_v24 = vpop.eup %6862 }
0x10d7   : > { %v6865_v34 = vpop.eup %6864  ;;  %v3322_v28 = vmul.f32 %v6863_v24, %v8476_v29 }
0x10d8   : > { %v3310_v43 = vpop.xlane.xlu1 %3309  ;;  %v6867_v61 = vpop.eup %6866  ;;  %v3319_v50 = vmul.f32 %v6865_v34, %v8470_v51 }
0x10d9   : > { %6870 = vrcp.f32 %v3310_v43  ;;  %v3321_v31 = vmul.f32 %v6867_v61, %v8465_v25 }
0x10da   : > { %v6869_v49 = vpop.eup %6868  ;;  %6872 = vrcp.f32 %v3301_v16 }
0x10db   : > { %v3320_v8 = vmul.f32 %v6869_v49, %v8481_v13  ;;  %6874 = vrcp.f32 %v3307_v23  ;;  %v3328_v27 = vpack.c.bf16 %v3322_v28, %v3321_v31 }
0x10dc   : > { %v3304_v11 = vpop.xlane.xlu1 %3303  ;;  %v3603_v62 = vpop.xlane.xlu0 %3602 }
0x10dd   : > { %6876 = vrcp.f32 %v3304_v11  ;;  %v3327_v10 = vpack.c.bf16 %v3320_v8, %v3319_v50 }
0x10df   : > { %6154 = vmatprep.mubr.msk.bf16.mxu1 %vm3238_vm7, %v3327_v10 }
0x10e0   : > { %6155 = vmatmul.mubr.msk.bf16.vlgmr.msra.gmra.mxu1 %vm3238_vm7, %v3328_v27  ;;  %v3597_v29 = vpop.xlane.xlu0 %3596 }
0x10e1   : > { %6175 = vmatpush3.bf16.msra.mxu1 %v3655_v1 }
0x10e4   : > { %v3606_v51 = vpop.xlane.xlu1 %3605  ;;  %v3615_v38 = vpop.xlane.xlu0 %3614 }
0x10e5   : > { %6878 = vrcp.f32 %v3606_v51 }
0x10e6   : > { %v6871_v13 = vpop.eup %6870  ;;  %6880 = vrcp.f32 %v3597_v29 }
0x10e7   : > { %v6873_v4 = vpop.eup %6872  ;;  %6882 = vrcp.f32 %v3603_v62  ;;  %v3326_v17 = vmul.f32 %v6871_v13, %v8497_v57 }
0x10e8   : > { %v3600_v25 = vpop.xlane.xlu1 %3599  ;;  %v6875_v53 = vpop.eup %6874  ;;  %v3323_v21 = vmul.f32 %v6873_v4, %v8492_v39 }
0x10e9   : > { %6884 = vrcp.f32 %v3600_v25  ;;  %v3325_v35 = vmul.f32 %v6875_v53, %v8487_v37 }
0x10ea   : > { %v6877_v56 = vpop.eup %6876 }
0x10eb   : > { %v3324_v33 = vmul.f32 %v6877_v56, %v8502_v20  ;;  %v3330_v60 = vpack.c.bf16 %v3326_v17, %v3325_v35 }
0x10ec   : > { %v3609_v19 = vpop.xlane.xlu0 %3608 }
0x10ed   : > { %v3329_v41 = vpack.c.bf16 %v3324_v33, %v3323_v21 }
0x10ef   : > { %6158 = vmatprep.mubr.msk.bf16.mxu1 %vm3238_vm7, %v3329_v41 }
0x10f0   : > { %v3618_v26 = vpop.xlane.xlu1 %3617  ;;  %6159 = vmatmul.mubr.msk.bf16.gmra.mxu1 %vm3238_vm7, %v3330_v60  ;;  %v3940_v45 = vpop.xlane.xlu0 %3939 }
0x10f1   : > { %6886 = vrcp.f32 %v3618_v26 }
0x10f2   : > { %v6879_v23 = vpop.eup %6878  ;;  %6888 = vrcp.f32 %v3609_v19 }
0x10f3   : > { %v6881_v24 = vpop.eup %6880  ;;  %6890 = vrcp.f32 %v3615_v38  ;;  %v3630_v34 = vmul.f32 %v6879_v23, %v8525_v40 }
0x10f4   : > { %v3612_v57 = vpop.xlane.xlu1 %3611  ;;  %v6883_v39 = vpop.eup %6882  ;;  %v3627_v37 = vmul.f32 %v6881_v24, %v8515_v6 }
0x10f5   : > { %6892 = vrcp.f32 %v3612_v57  ;;  %v3629_v43 = vmul.f32 %v6883_v39, %v8505_v15  ;;  %v3934_v61 = vpop.xlane.xlu0 %3933 }
0x10f6   : > { %v6885_v20 = vpop.eup %6884  ;;  %6894 = vrcp.f32 %v3934_v61 }
0x10f7   : > { %v3628_v16 = vmul.f32 %v6885_v20, %v8533_v36  ;;  %v3636_v50 = vpack.c.bf16 %v3630_v34, %v3629_v43 }
0x10f8   : > { %v3943_v49 = vpop.xlane.xlu1 %3942 }
0x10f9   : > { %v3635_v28 = vpack.c.bf16 %v3628_v16, %v3627_v37  ;;  %v3952_v11 = vpop.xlane.xlu0 %3951 }
0x10fb   : > { %6176 = vmatprep.mubr.msk.bf16.mxu1 %vm3238_vm7, %v3635_v28 }
0x10fc   : > { %v3937_v8 = vpop.xlane.xlu1 %3936  ;;  %6177 = vmatmul.mubr.msk.bf16.vlgmr.msra.gmra.mxu1 %vm3238_vm7, %v3636_v50 }
0x10fd   : > { %6896 = vrcp.f32 %v3937_v8  ;;  %v3946_v1 = vpop.xlane.xlu0 %3945 }
0x10fe   : > { %v6887_v62 = vpop.eup %6886  ;;  %6898 = vrcp.f32 %v3943_v49 }
0x10ff   : > { %v6889_v40 = vpop.eup %6888  ;;  %v3634_v36 = vmul.f32 %v6887_v62, %v8551_v59 }
0x1100   : > { %v3955_v31 = vpop.xlane.xlu1 %3954  ;;  %v6891_v6 = vpop.eup %6890  ;;  %v3631_v15 = vmul.f32 %v6889_v40, %v8539_v58 }
0x1101   : > { %v3633_v51 = vmul.f32 %v6891_v6, %v8520_v22  ;;  %v4282_v58 = vpop.xlane.xlu0 %4281 }
0x1102   : > { %v6893_v10 = vpop.eup %6892 }
0x1103   : > { %v3632_v27 = vmul.f32 %v6893_v10, %v8562_v30  ;;  %v3638_v4 = vpack.c.bf16 %v3634_v36, %v3633_v51  ;;  %v6895_v38 = vpop.eup %6894 }
0x1104   : > { %v3949_v29 = vpop.xlane.xlu1 %3948  ;;  %v3964_v30 = vmul.f32 %v6895_v38, %v8557_v44 }
0x1105   : > { %v3637_v13 = vpack.c.bf16 %v3632_v27, %v3631_v15  ;;  %6900 = vrcp.f32 %v3949_v29  ;;  %v4288_v17 = vpop.xlane.xlu0 %4287 }
0x1106   : > { %6902 = vrcp.f32 %v3940_v45 }
0x1107   : > { %6180 = vmatprep.mubr.msk.bf16.mxu1 %vm3238_vm7, %v3637_v13  ;;  %6904 = vrcp.f32 %v3946_v1 }
0x1108   : > { %v4276_v25 = vpop.xlane.xlu1 %4275  ;;  %6181 = vmatmul.mubr.msk.bf16.gmra.mxu1 %vm3238_vm7, %v3638_v4  ;;  %6906 = vrcp.f32 %v3955_v31 }
0x1109   : > { %6908 = vrcp.f32 %v3952_v11 }
0x110a   : > { %v6897_v59 = vpop.eup %6896 }
0x110b   : > { %v3965_v53 = vmul.f32 %v6897_v59, %v8581_v46  ;;  %v6899_v33 = vpop.eup %6898 }
0x110c   : > { %v4270_v56 = vpop.xlane.xlu1 %4269  ;;  %v3967_v44 = vmul.f32 %v6899_v33, %v8572_v55  ;;  %v6733_v33 = vld [vmem:[#allocation21 + $0x20] sm:$0xff]  }
0x110d   : > { %v3972_v22 = vpack.c.bf16 %v3965_v53, %v3964_v30  ;;  %6910 = vrcp.f32 %v4270_v56 }
0x110f   : > { %6198 = vmatprep.mubr.msk.bf16.mxu1 %vm3238_vm7, %v3972_v22  ;;  %v6730_v22 = vld [vmem:[#allocation21 + $0x38] sm:$0xff]  }
0x1110   : > { %v4279_v21 = vpop.xlane.xlu1 %4278  ;;  %v4291_v19 = vpop.xlane.xlu0 %4290  ;;  %6228 = vmatprep.subr.bf16.mxu0 %v6730_v22 }
0x1111   : > { %6229 = vmatpush3.bf16.msra.mxu0 %v6730_v22  ;;  %v5760_v22 = vld [vmem:[#allocation23] ss:$0 sm:$0xff] }
0x1112   : > { %v6901_v41 = vpop.eup %6900 }
0x1113   : > { %v6903_v60 = vpop.eup %6902  ;;  %v3969_v45 = vmul.f32 %v6901_v41, %v8599_v14 }
0x1114   : > { %v4273_v35 = vpop.xlane.xlu1 %4272  ;;  %v6905_v26 = vpop.eup %6904  ;;  %v3966_v23 = vmul.f32 %v6903_v60, %v8541_v47  ;;  %v6734_v60 = vld [vmem:[#allocation21 + $0x18] sm:$0xff]  }
0x1115   : > { %6912 = vrcp.f32 %v4273_v35  ;;  %v4313_v57 = vpop.permute.xlu0 %4312  ;;  %v3968_v39 = vmul.f32 %v6905_v26, %v8575_v48  ;;  %v6907_v34 = vpop.eup %6906 }
0x1116   : > { %6914 = vrcp.f32 %v4279_v21  ;;  %v3973_v20 = vpack.c.bf16 %v3967_v44, %v3966_v23  ;;  %v4327_v37 = vsel %vm3343_vm6, %v4313_v57, 0  ;;  %v6909_v14 = vpop.eup %6908  ;;  %v3971_v47 = vmul.f32 %v6907_v34, %v8591_v54  ;;  %v6732_v21 = vld [vmem:[#allocation21 + $0x28] sm:$0xff]  }
0x1117   : > { %6916 = vrcp.f32 %v4276_v25  ;;  %v3974_v55 = vpack.c.bf16 %v3969_v45, %v3968_v39  ;;  %v3970_v43 = vmul.f32 %v6909_v14, %v8570_v32 }
0x1118   : > { %v3977_v46 = vpop.permute.xlu1 %3976  ;;  %6918 = vrcp.f32 %v4291_v19 }
0x1119   : > { %v3991_v24 = vsel %vm3343_vm6, %v3977_v46, 0  ;;  %6254 = vmatprep.subr.msk.bf16.mxu1 %vm3343_vm6, %v3977_v46  ;;  %v3975_v48 = vpack.c.bf16 %v3971_v47, %v3970_v43  ;;  %6920 = vrcp.f32 %v4282_v58  ;;  %v6735_v46 = vld [vmem:[#allocation21 + $0x10] sm:$0xff]  }
0x111a   : > { %6197 = vmatpush3.bf16.msra.mxu1 %v3991_v24  ;;  %v6911_v16 = vpop.eup %6910  ;;  %6922 = vrcp.f32 %v4288_v17  ;;  %v6731_v17 = vld [vmem:[#allocation21 + $0x30] sm:$0xff]   ;;  %v6736_v24 = vld [vmem:[#allocation21 + $0x8] sm:$0xff]  }
0x111b   : > { %6255 = vmatprep.subr.msk.bf16.mxu1 %vm3343_vm6, %v4313_v57  ;;  %v4300_v49 = vmul.f32 %v6911_v16, %v8609_v63  ;;  %6230 = vmatprep.subr.bf16.mxu0 %v6731_v17 }
0x111c   : > { %6231 = vmatpush3.bf16.msra.mxu0 %v6731_v17 }
0x111d   : > { %6199 = vmatmul.mubr.msk.bf16.vlgmr.msra.gmra.mxu1 %vm3238_vm7, %v3973_v20  ;;  %6232 = vmatprep.subr.bf16.mxu0 %v6732_v21  ;;  %v6737_v20 = vld [vmem:[#allocation21] sm:$0xff]  }
0x111e   : > { %6202 = vmatprep.mubr.msk.bf16.mxu1 %vm3238_vm7, %v3974_v55  ;;  %6219 = vmatpush3.bf16.msra.mxu1 %v4327_v37 }
0x1120   : > { %6233 = vmatpush3.bf16.msra.mxu0 %v6732_v21 }
0x1121   : > { %6234 = vmatprep.subr.bf16.mxu0 %v6733_v33 }
0x1122   : > { %v6913_v61 = vpop.eup %6912 }
0x1123   : > { %v4301_v28 = vmul.f32 %v6913_v61, %v8621_v7  ;;  %v6915_v50 = vpop.eup %6914 }
0x1124   : > { %v6917_v11 = vpop.eup %6916  ;;  %v4303_v62 = vmul.f32 %v6915_v50, %v8611_v3  ;;  %6235 = vmatpush3.bf16.msra.mxu0 %v6733_v33 }
0x1125   : > { %6203 = vmatmul.mubr.msk.bf16.gmra.mxu1 %vm3238_vm7, %v3975_v48  ;;  %v4308_v8 = vpack.c.bf16 %v4301_v28, %v4300_v49  ;;  %v4302_v54 = vmul.f32 %v6917_v11, %v8605_v2  ;;  %v6919_v63 = vpop.eup %6918  ;;  %6236 = vmatprep.subr.bf16.mxu0 %v6734_v60 }
0x1126   : > { %v6921_v7 = vpop.eup %6920  ;;  %v4307_v10 = vmul.f32 %v6919_v63, %v8615_v5 }
0x1127   : > { %6220 = vmatprep.mubr.msk.bf16.mxu1 %vm3238_vm7, %v4308_v8  ;;  %v4309_v40 = vpack.c.bf16 %v4303_v62, %v4302_v54  ;;  %v6923_v31 = vpop.eup %6922  ;;  %v4304_v3 = vmul.f32 %v6921_v7, %v8588_v52 }
0x1128   : > { %v4306_v2 = vmul.f32 %v6923_v31, %v8597_v12  ;;  %6237 = vmatpush3.bf16.msra.mxu0 %v6734_v60 }
0x1129   : > { %6238 = vmatprep.subr.bf16.mxu0 %v6735_v46 }
0x112a   : > { %v4311_v27 = vpack.c.bf16 %v4307_v10, %v4306_v2 }
0x112c   : > { %6239 = vmatpush3.bf16.msra.mxu0 %v6735_v46 }
0x112d   : > { %6221 = vmatmul.mubr.msk.bf16.vlgmr.msra.gmra.mxu1 %vm3238_vm7, %v4309_v40  ;;  %6240 = vmatprep.subr.bf16.mxu0 %v6736_v24 }
0x1130   : > { %6241 = vmatpush3.bf16.msra.mxu0 %v6736_v24 }
0x1131   : > { %6242 = vmatprep.subr.bf16.mxu0 %v6737_v20 }
0x1134   : > { %6243 = vmatpush3.bf16.msra.mxu0 %v6737_v20 }
0x1149   : > { %v4285_v32 = vpop.xlane.xlu1 %4284 }
0x114a   : > { %6924 = vrcp.f32 %v4285_v32 }
0x1157   : > { %v6925_v6 = vpop.eup %6924 }
0x1158   : > { %v4305_v36 = vmul.f32 %v6925_v6, %v8630_v18 }
0x115a   : > { %v4310_v15 = vpack.c.bf16 %v4305_v36, %v4304_v3 }
0x115c   : > { %6224 = vmatprep.mubr.msk.bf16.mxu1 %vm3238_vm7, %v4310_v15 }
0x115d   : > { %6225 = vmatmul.mubr.msk.bf16.gmra.mxu1 %vm3238_vm7, %v4311_v27 }
0x115e   : > { %4868 = vmatprep.mubr.bf16.mxu1 %v7545_v0 }
0x11a0   : > { %v6156_v1 = vpop.f32.mrf.mxu1 }
0x11a1   : > { %3414 = vst.msk [vmem:[#allocation2 + $0x10] sm:$0xff] %vm1685_vm1, %v6156_v1 }
0x11a2   : > { %v3381_v29 = vpop.f32.mrf.mxu1 }
0x11a3   : > { %3412 = vst.msk [vmem:[#allocation2] sm:$0xff] %vm1685_vm1, %v3381_v29 }
0x11a4   : > { %v6157_v5 = vpop.f32.mrf.mxu1 }
0x11a5   : > { %3415 = vst.msk [vmem:[#allocation2 + $0x18] sm:$0xff] %vm1685_vm1, %v6157_v5 }
0x11a6   : > { %v3384_v52 = vpop.f32.mrf.mxu1 }
0x11a7   : > { %3413 = vst.msk [vmem:[#allocation2 + $0x8] sm:$0xff] %vm1685_vm1, %v3384_v52 }
0x11b0   : > { %v6160_v12 = vpop.f32.mrf.mxu1 }
0x11b1   : > { %3418 = vst.msk [vmem:[#allocation2 + $0x30] sm:$0xff] %vm1685_vm1, %v6160_v12 }
0x11b2   : > { %v3397_v18 = vpop.f32.mrf.mxu1 }
0x11b3   : > { %3416 = vst.msk [vmem:[#allocation2 + $0x20] sm:$0xff] %vm1685_vm1, %v3397_v18 }
0x11b4   : > { %v6161_v51 = vpop.f32.mrf.mxu1 }
0x11b5   : > { %3419 = vst.msk [vmem:[#allocation2 + $0x38] sm:$0xff] %vm1685_vm1, %v6161_v51 }
0x11b6   : > { %v3400_v13 = vpop.f32.mrf.mxu1 }
0x11b7   : > { %3417 = vst.msk [vmem:[#allocation2 + $0x28] sm:$0xff] %vm1685_vm1, %v3400_v13 }
0x11bc   : > { %v6178_v4 = vpop.f32.mrf.mxu1 }
0x11bd   : > { %3734 = vrot.lane.b32.xlu0 %v6178_v4, %s7549_s28 }
0x11be   : > { %v3691_v38 = vpop.f32.mrf.mxu1 }
0x11bf   : > { %3730 = vrot.lane.b32.xlu1 %v3691_v38, %s7549_s28 }
0x11c0   : > { %v6179_v25 = vpop.f32.mrf.mxu1 }
0x11c2   : > { %v3694_v59 = vpop.f32.mrf.mxu1 }
0x11c3   : > { %3736 = vrot.lane.b32.xlu1 %v6179_v25, %s7549_s28  ;;  %3732 = vrot.lane.b32.xlu0 %v3694_v59, %s7549_s28 }
0x11c8   : > { %v6182_v58 = vpop.f32.mrf.mxu1 }
0x11ca   : > { %v3707_v30 = vpop.f32.mrf.mxu1 }
0x11cb   : > { %3738 = vrot.lane.b32.xlu0 %v3707_v30, %s7549_s28 }
0x11cc   : > { %v6183_v53 = vpop.f32.mrf.mxu1 }
0x11ce   : > { %v3710_v56 = vpop.f32.mrf.mxu1 }
0x11cf   : > { %3740 = vrot.lane.b32.xlu1 %v3710_v56, %s7549_s28 }
0x11dd   : > { %v6200_v19 = vpop.f32.mrf.mxu1 }
0x11de   : > { %4070 = vrot.lane.b32.xlu0 %v6200_v19, %s7550_s19 }
0x11df   : > { %v4027_v35 = vpop.f32.mrf.mxu1 }
0x11e1   : > { %v6201_v41 = vpop.f32.mrf.mxu1 }
0x11e2   : > { %4066 = vrot.lane.b32.xlu0 %v4027_v35, %s7550_s19  ;;  %4072 = vrot.lane.b32.xlu1 %v6201_v41, %s7550_s19  ;;  %v6959_v35 = vld [vmem:[%s8032_s6] sm:$0xff] }
0x11e3   : > { %v4030_v26 = vpop.f32.mrf.mxu1 }
0x11e5   : > { %v6204_v44 = vpop.f32.mrf.mxu1 }
0x11e6   : > { %4068 = vrot.lane.b32.xlu1 %v4030_v26, %s7550_s19 }
0x11e7   : > { %v4043_v45 = vpop.f32.mrf.mxu1 }
0x11e9   : > { %v6205_v23 = vpop.f32.mrf.mxu1 }
0x11eb   : > { %v4046_v57 = vpop.f32.mrf.mxu1 }
0x11ed   : > { %v6222_v39 = vpop.f32.mrf.mxu1 }
0x11ee   : > { %4406 = vrot.lane.b32.xlu0 %v6222_v39, %s7548_s20 }
0x11ef   : > { %v4363_v34 = vpop.f32.mrf.mxu1 }
0x11f1   : > { %v6223_v55 = vpop.f32.mrf.mxu1 }
0x11f2   : > { %4402 = vrot.lane.b32.xlu0 %v4363_v34, %s7548_s20  ;;  %4408 = vrot.lane.b32.xlu1 %v6223_v55, %s7548_s20 }
0x11f3   : > { %v4366_v37 = vpop.f32.mrf.mxu1 }
0x11f6   : > { %3742 = vrot.lane.b32.xlu0 %v6182_v58, %s7549_s28  ;;  %4404 = vrot.lane.b32.xlu1 %v4366_v37, %s7548_s20 }
0x11fa   : > { %4074 = vrot.lane.b32.xlu0 %v4043_v45, %s7550_s19  ;;  %3744 = vrot.lane.b32.xlu1 %v6183_v53, %s7549_s28  ;;  %s5277_s28 = sshll.u32 %s1311_s3, 4  ;;  %s5278_s28 = int_to_ptr.vmem [resolvable:$true] %s5277_s28 }
0x11fb   : > { %s7365_s29 = scalar_lea.vmem %s5278_s28, 128  ;;  %p7372_p8 = scmp.lt.s32.totalorder %s5278_s28, %s7370_s26 }
0x11fc   : > { %p7366_p12 = scmp.ne.s32.totalorder %s5278_s28, %s7365_s29  ;;  %p7373_p1 = scmp.lt.s32.totalorder %s7371_s16, %s7365_s29 }
0x11fe   : > { %4078 = vrot.lane.b32.xlu0 %v6204_v44, %s7550_s19  ;;  %4076 = vrot.lane.b32.xlu1 %v4046_v57, %s7550_s19  ;;  %v6960_v44 = vld [vmem:[%s8032_s6 + $0x10] sm:$0xff]  ;;  %v6962_v57 = vld [vmem:[%s8032_s6 + $0x18] sm:$0xff]  ;;  %p7374_p11 = por %p7373_p1, %p7372_p8 }
0x1202   : > { %4080 = vrot.lane.b32.xlu1 %v6205_v23, %s7550_s19  ;;  %v6961_v23 = vld [vmem:[%s8032_s6 + $0x8] sm:$0xff]  ;;  %s5275_s19 = scalar_lea.hbm %s7728_s4, %s5810_s0 }
0x121d   : > { %v6226_v14 = vpop.f32.mrf.mxu1 }
0x121f   : > { %v4379_v47 = vpop.f32.mrf.mxu1 }
0x1220   : > { %4410 = vrot.lane.b32.xlu0 %v4379_v47, %s7548_s20  ;;  %v6963_v47 = vld [vmem:[%s8032_s6 + $0x20] sm:$0xff] }
0x1221   : > { %v6227_v16 = vpop.f32.mrf.mxu1 }
0x1223   : > { %v4382_v43 = vpop.f32.mrf.mxu1 }
0x1224   : > { %4414 = vrot.lane.b32.xlu0 %v6226_v14, %s7548_s20  ;;  %4412 = vrot.lane.b32.xlu1 %v4382_v43, %s7548_s20 }
0x1228   : > { %4416 = vrot.lane.b32.xlu1 %v6227_v16, %s7548_s20  ;;  %s9097_s20 = sld [smem:[#allocation63_spill]] }
0x122f   : > { %v3735_v61 = vpop.permute.xlu0 %3734 }
0x1230   : > { %3756 = vst.msk [vmem:[#allocation2 + $0x10] sm:$0xff] %vm1973_vm3, %v3735_v61 }
0x1231   : > { %v3731_v48 = vpop.permute.xlu1 %3730 }
0x1232   : > { %3754 = vst.msk [vmem:[#allocation2] sm:$0xff] %vm1973_vm3, %v3731_v48  ;;  %v6964_v48 = vld [vmem:[%s8032_s6 + $0x30] sm:$0xff] }
0x1235   : > { %v3737_v49 = vpop.permute.xlu1 %3736  ;;  %v3733_v28 = vpop.permute.xlu0 %3732 }
0x1236   : > { %3757 = vst.msk [vmem:[#allocation2 + $0x18] sm:$0xff] %vm1973_vm3, %v3737_v49  ;;  %3755 = vst.msk [vmem:[#allocation2 + $0x8] sm:$0xff] %vm1973_vm3, %v3733_v28 }
0x123d   : > { %v3739_v50 = vpop.permute.xlu0 %3738 }
0x123e   : > { %3758 = vst.msk [vmem:[#allocation2 + $0x20] sm:$0xff] %vm1973_vm3, %v3739_v50  ;;  %v6965_v50 = vld [vmem:[%s8032_s6 + $0x28] sm:$0xff] }
0x1241   : > { %v3741_v8 = vpop.permute.xlu1 %3740 }
0x1242   : > { %3759 = vst.msk [vmem:[#allocation2 + $0x28] sm:$0xff] %vm1973_vm3, %v3741_v8 }
0x1250   : > { %v4071_v11 = vpop.permute.xlu0 %4070 }
0x1251   : > { %4092 = vst.msk [vmem:[#allocation2 + $0x10] sm:$0xff] %vm2149_vm4, %v4071_v11  ;;  %v6966_v11 = vld [vmem:[%s8032_s6 + $0x38] sm:$0xff]  ;;  %s9094_s6 = sld [smem:[#allocation64_spill]] }
0x1254   : > { %v4073_v62 = vpop.permute.xlu1 %4072  ;;  %v4067_v54 = vpop.permute.xlu0 %4066 }
0x1255   : > { %4093 = vst.msk [vmem:[#allocation2 + $0x18] sm:$0xff] %vm2149_vm4, %v4073_v62  ;;  %4090 = vst.msk [vmem:[#allocation2] sm:$0xff] %vm2149_vm4, %v4067_v54  ;;  %v6738_v54 = vld [vmem:[#allocation24 + $0x70] ss:$8 sps:$4 sm:$0xff]  }
0x1258   : > { %v4069_v40 = vpop.permute.xlu1 %4068 }
0x1259   : > { %4091 = vst.msk [vmem:[#allocation2 + $0x8] sm:$0xff] %vm2149_vm4, %v4069_v40  ;;  %v6740_v40 = vld [vmem:[#allocation24 + $0x74] ss:$8 sps:$4 sm:$0xff]  }
0x125a   : > { %4836 = vmatprep.subr.bf16.mxu1 %v6740_v40 }
0x125b   : > { %4837 = vmatpush1.bf16.msra.mxu1 %v6738_v54 }
0x1260   : > { %v4407_v32 = vpop.permute.xlu0 %4406 }
0x1261   : > { %4428 = vst.msk [vmem:[#allocation2 + $0x10] sm:$0xff] %vm2325_vm5, %v4407_v32 }
0x1264   : > { %v4409_v63 = vpop.permute.xlu1 %4408  ;;  %v4403_v7 = vpop.permute.xlu0 %4402 }
0x1265   : > { %4429 = vst.msk [vmem:[#allocation2 + $0x18] sm:$0xff] %vm2325_vm5, %v4409_v63  ;;  %4426 = vst.msk [vmem:[#allocation2] sm:$0xff] %vm2325_vm5, %v4403_v7 }
0x1268   : > { %v4405_v31 = vpop.permute.xlu1 %4404  ;;  %v3743_v6 = vpop.permute.xlu0 %3742  ;;  %v4436_v5 = vld [vmem:[#allocation2 + $0x10] sm:$0xff] }
0x1269   : > { %4427 = vst.msk [vmem:[#allocation2 + $0x8] sm:$0xff] %vm2325_vm5, %v4405_v31 }
0x126a   : > { %3760 = vst.msk [vmem:[#allocation2 + $0x30] sm:$0xff] %vm1973_vm3, %v3743_v6 }
0x126c   : > { %v3745_v10 = vpop.permute.xlu1 %3744  ;;  %v4075_v3 = vpop.permute.xlu0 %4074  ;;  %v4437_v36 = vld [vmem:[#allocation2 + $0x18] sm:$0xff]  ;;  %v4434_v27 = vld [vmem:[#allocation2] sm:$0xff] }
0x126d   : > { %3761 = vst.msk [vmem:[#allocation2 + $0x38] sm:$0xff] %vm1973_vm3, %v3745_v10  ;;  %v4443_v52 = vpack.c.bf16 %v4437_v36, %v4436_v5 }
0x126e   : > { %4094 = vst.msk [vmem:[#allocation2 + $0x20] sm:$0xff] %vm2149_vm4, %v4075_v3 }
0x1270   : > { %v4077_v2 = vpop.permute.xlu1 %4076  ;;  %v4079_v15 = vpop.permute.xlu0 %4078  ;;  %v4435_v1 = vld [vmem:[#allocation2 + $0x8] sm:$0xff] }
0x1271   : > { %4095 = vst.msk [vmem:[#allocation2 + $0x28] sm:$0xff] %vm2149_vm4, %v4077_v2  ;;  %4096 = vst.msk [vmem:[#allocation2 + $0x30] sm:$0xff] %vm2149_vm4, %v4079_v15  ;;  %v4442_v29 = vpack.c.bf16 %v4435_v1, %v4434_v27 }
0x1273   : > { %6244 = vmatprep.mubr.bf16.mxu0 %v4442_v29 }
0x1274   : > { %v4081_v12 = vpop.permute.xlu1 %4080  ;;  %6245 = vmatmul.mubr.bf16.vlgmr.msra.gmra.mxu0 %v4443_v52 }
0x1275   : > { %4097 = vst.msk [vmem:[#allocation2 + $0x38] sm:$0xff] %vm2149_vm4, %v4081_v12 }
0x1292   : > { %v4411_v18 = vpop.permute.xlu0 %4410 }
0x1293   : > { %4430 = vst.msk [vmem:[#allocation2 + $0x20] sm:$0xff] %vm2325_vm5, %v4411_v18  ;;  %v6743_v18 = vld [vmem:[#allocation24 + $0x64] ss:$8 sps:$4 sm:$0xff]  }
0x1294   : > { %4838 = vmatprep.subr.bf16.mxu1 %v6743_v18 }
0x1296   : > { %v4413_v51 = vpop.permute.xlu1 %4412  ;;  %v4415_v13 = vpop.permute.xlu0 %4414 }
0x1297   : > { %4431 = vst.msk [vmem:[#allocation2 + $0x28] sm:$0xff] %vm2325_vm5, %v4413_v51  ;;  %4432 = vst.msk [vmem:[#allocation2 + $0x30] sm:$0xff] %vm2325_vm5, %v4415_v13  ;;  %v6741_v51 = vld [vmem:[#allocation24 + $0x60] ss:$8 sps:$4 sm:$0xff]   ;;  %v6746_v13 = vld [vmem:[#allocation24 + $0x54] ss:$8 sps:$4 sm:$0xff]  }
0x1298   : > { %4839 = vmatpush1.bf16.msra.mxu1 %v6741_v51 }
0x1299   : > { %4840 = vmatprep.subr.bf16.mxu1 %v6746_v13  ;;  %v5770_v13 = vld [vmem:[%s9095_s12] ss:$0 sm:$0xff] }
0x129a   : > { %v4417_v4 = vpop.permute.xlu1 %4416  ;;  %v4438_v38 = vld [vmem:[#allocation2 + $0x20] sm:$0xff] }
0x129b   : > { %4433 = vst.msk [vmem:[#allocation2 + $0x38] sm:$0xff] %vm2325_vm5, %v4417_v4  ;;  %v6744_v4 = vld [vmem:[#allocation24 + $0x50] ss:$8 sps:$4 sm:$0xff]  }
0x129c   : > { %4841 = vmatpush1.bf16.msra.mxu1 %v6744_v4 }
0x129e   : > { %v4439_v25 = vld [vmem:[#allocation2 + $0x28] sm:$0xff]  ;;  %v4440_v58 = vld [vmem:[#allocation2 + $0x30] sm:$0xff] }
0x129f   : > { %v4444_v59 = vpack.c.bf16 %v4439_v25, %v4438_v38  ;;  %v6749_v38 = vld [vmem:[#allocation24 + $0x44] ss:$8 sps:$4 sm:$0xff]   ;;  %v6747_v25 = vld [vmem:[#allocation24 + $0x40] ss:$8 sps:$4 sm:$0xff]  }
0x12a0   : > { %4842 = vmatprep.subr.bf16.mxu1 %v6749_v38 }
0x12a1   : > { %6248 = vmatprep.mubr.bf16.mxu0 %v4444_v59  ;;  %4843 = vmatpush1.bf16.msra.mxu1 %v6747_v25  ;;  %v6752_v59 = vld [vmem:[#allocation24 + $0x34] ss:$8 sps:$4 sm:$0xff]  }
0x12a2   : > { %v4441_v30 = vld [vmem:[#allocation2 + $0x38] sm:$0xff]  ;;  %4844 = vmatprep.subr.bf16.mxu1 %v6752_v59 }
0x12a3   : > { %v4445_v53 = vpack.c.bf16 %v4441_v30, %v4440_v58  ;;  %v6750_v58 = vld [vmem:[#allocation24 + $0x30] ss:$8 sps:$4 sm:$0xff]   ;;  %v6755_v30 = vld [vmem:[#allocation24 + $0x24] ss:$8 sps:$4 sm:$0xff]  }
0x12a5   : > { %6249 = vmatmul.mubr.bf16.gmra.mxu0 %v4445_v53  ;;  %4845 = vmatpush1.bf16.msra.mxu1 %v6750_v58  ;;  %v6753_v53 = vld [vmem:[#allocation24 + $0x20] ss:$8 sps:$4 sm:$0xff]  }
0x12a6   : > { %4846 = vmatprep.subr.bf16.mxu1 %v6755_v30 }
0x12a9   : > { %4847 = vmatpush1.bf16.msra.mxu1 %v6753_v53 }
0x1334   : > { %v6246_v56 = vpop.f32.mrf.mxu0 }
0x1335   : > { %v4543_v19 = vadd.f32 %v6246_v56, %v5760_v22  ;;  %v6758_v56 = vld [vmem:[#allocation24 + $0x14] ss:$8 sps:$4 sm:$0xff]  }
0x1336   : > { %v4534_v17 = vpop.f32.mrf.mxu0  ;;  %4848 = vmatprep.subr.bf16.mxu1 %v6758_v56 }
0x1337   : > { %v4535_v21 = vadd.f32 %v5760_v22, %v4534_v17  ;;  %v4567_v46 = vadd.f32 %v6960_v44, %v4543_v19  ;;  %v6761_v17 = vld [vmem:[#allocation24 + $0x4] ss:$8 sps:$4 sm:$0xff]  }
0x1338   : > { %v6247_v33 = vpop.f32.mrf.mxu0 }
0x1339   : > { %v4565_v41 = vadd.f32 %v6959_v35, %v4535_v21  ;;  %v4546_v45 = vadd.f32 %v6247_v33, %v5760_v22  ;;  %v6759_v21 = vld [vmem:[#allocation24] ss:$8 sps:$4 sm:$0xff]  }
0x133a   : > { %v4537_v60 = vpop.f32.mrf.mxu0 }
0x133b   : > { %v4538_v26 = vadd.f32 %v5760_v22, %v4537_v60  ;;  %4575 = vadd.xlane.f32.xlu0 %v4565_v41  ;;  %v4568_v39 = vadd.f32 %v6962_v57, %v4546_v45 }
0x133d   : > { %v4566_v24 = vadd.f32 %v6961_v23, %v4538_v26 }
0x133f   : > { %4577 = vadd.xlane.f32.xlu1 %v4566_v24  ;;  %4579 = vadd.xlane.f32.xlu0 %v4567_v46 }
0x1343   : > { %4581 = vadd.xlane.f32.xlu0 %v4568_v39 }
0x1365   : > { %v6250_v20 = vpop.f32.mrf.mxu0 }
0x1366   : > { %v4559_v14 = vadd.f32 %v6250_v20, %v5760_v22 }
0x1367   : > { %v4550_v34 = vpop.f32.mrf.mxu0 }
0x1368   : > { %v4551_v55 = vadd.f32 %v5760_v22, %v4550_v34  ;;  %v8754_v49 = vadd.f32 %v6964_v48, %v4559_v14  ;;  %v6763_v14 = vld [vmem:[#allocation26 + $0x38] sm:$0xff]   ;;  %v6768_v48 = vld [vmem:[#allocation26 + $0x60] sm:$0xff]  }
0x1369   : > { %v6251_v37 = vpop.f32.mrf.mxu0 }
0x136a   : > { %v8750_v16 = vadd.f32 %v6963_v47, %v4551_v55  ;;  %v4562_v28 = vadd.f32 %v6251_v37, %v5760_v22  ;;  %v6762_v37 = vld [vmem:[#allocation26 + $0x78] sm:$0xff]   ;;  %v6764_v47 = vld [vmem:[#allocation26 + $0x70] sm:$0xff]  }
0x136b   : > { %v4553_v43 = vpop.f32.mrf.mxu0  ;;  %5956 = vmatprep.subr.bf16.mxu0 %v6762_v37 }
0x136c   : > { %v4554_v61 = vadd.f32 %v5760_v22, %v4553_v43  ;;  %4583 = vadd.xlane.f32.xlu1 %v8750_v16  ;;  %v8762_v62 = vadd.f32 %v6966_v11, %v4562_v28  ;;  %v6756_v22 = vld [vmem:[#allocation24 + $0x10] ss:$8 sps:$4 sm:$0xff]   ;;  %5957 = vmatpush3.bf16.msra.mxu0 %v6763_v14  ;;  %v6766_v43 = vld [vmem:[#allocation26 + $0x68] sm:$0xff]  }
0x136d   : > { %4849 = vmatpush1.bf16.msra.mxu1 %v6756_v22  ;;  %5958 = vmatprep.subr.bf16.mxu0 %v6764_v47  ;;  %v6770_v28 = vld [vmem:[#allocation26 + $0x58] sm:$0xff]  }
0x136e   : > { %v8757_v8 = vadd.f32 %v6965_v50, %v4554_v61  ;;  %4850 = vmatprep.subr.bf16.mxu1 %v6761_v17  ;;  %v6767_v61 = vld [vmem:[#allocation26 + $0x28] sm:$0xff]   ;;  %v6771_v50 = vld [vmem:[#allocation26 + $0x18] sm:$0xff]  }
0x1370   : > { %4585 = vadd.xlane.f32.xlu0 %v8757_v8  ;;  %4587 = vadd.xlane.f32.xlu1 %v8754_v49 }
0x1371   : > { %4851 = vmatpush1.bf16.msra.mxu1 %v6759_v21 }
0x1374   : > { %4589 = vadd.xlane.f32.xlu0 %v8762_v62 }
0x13c4   : > { %v4576_v32 = vpop.xlane.xlu0 %4575 }
0x13c5   : > { %v4591_v63 = vmul.f32 0.0078125, %v4576_v32 }
0x13c7   : > { %v8765_v7 = vsub.f32 %v4565_v41, %v4591_v63 }
0x13c8   : > { %v4578_v31 = vpop.xlane.xlu1 %4577  ;;  %v4580_v6 = vpop.xlane.xlu0 %4579 }
0x13c9   : > { %v4592_v10 = vmul.f32 0.0078125, %v4578_v31  ;;  %v4593_v3 = vmul.f32 0.0078125, %v4580_v6  ;;  %v4607_v36 = vmul.f32 %v8765_v7, %v8765_v7 }
0x13cb   : > { %v8769_v2 = vsub.f32 %v4566_v24, %v4592_v10  ;;  %v8771_v15 = vsub.f32 %v4567_v46, %v4593_v3  ;;  %4615 = vadd.xlane.f32.xlu1 %v4607_v36 }
0x13cc   : > { %v4582_v27 = vpop.xlane.xlu0 %4581 }
0x13cd   : > { %v4594_v1 = vmul.f32 0.0078125, %v4582_v27  ;;  %v4608_v29 = vmul.f32 %v8769_v2, %v8769_v2  ;;  %v4609_v5 = vmul.f32 %v8771_v15, %v8771_v15 }
0x13cf   : > { %v8777_v52 = vsub.f32 %v4568_v39, %v4594_v1  ;;  %4617 = vadd.xlane.f32.xlu0 %v4608_v29  ;;  %4619 = vadd.xlane.f32.xlu1 %v4609_v5  ;;  %v5769_v29 = vld [vmem:[%s9094_s6] ss:$0 sm:$0xff] }
0x13d1   : > { %v4610_v12 = vmul.f32 %v8777_v52, %v8777_v52 }
0x13d3   : > { %4621 = vadd.xlane.f32.xlu0 %v4610_v12 }
0x13f5   : > { %v4584_v33 = vpop.xlane.xlu1 %4583 }
0x13f6   : > { %v4595_v19 = vmul.f32 0.0078125, %v4584_v33 }
0x13f8   : > { %v8782_v35 = vsub.f32 %v8750_v16, %v4595_v19  ;;  %v6765_v16 = vld [vmem:[#allocation26 + $0x30] sm:$0xff]  }
0x13f9   : > { %v4588_v41 = vpop.xlane.xlu1 %4587  ;;  %v4586_v60 = vpop.xlane.xlu0 %4585  ;;  %5959 = vmatpush3.bf16.msra.mxu0 %v6765_v16 }
0x13fa   : > { %v4597_v26 = vmul.f32 0.0078125, %v4588_v41  ;;  %v4596_v44 = vmul.f32 0.0078125, %v4586_v60  ;;  %v4611_v46 = vmul.f32 %v8782_v35, %v8782_v35  ;;  %5960 = vmatprep.subr.bf16.mxu0 %v6766_v43 }
0x13fc   : > { %v8787_v45 = vsub.f32 %v8754_v49, %v4597_v26  ;;  %v8790_v23 = vsub.f32 %v8757_v8, %v4596_v44  ;;  %4623 = vadd.xlane.f32.xlu1 %v4611_v46  ;;  %v6769_v49 = vld [vmem:[#allocation26 + $0x20] sm:$0xff]  }
0x13fd   : > { %v4590_v24 = vpop.xlane.xlu0 %4589  ;;  %5961 = vmatpush3.bf16.msra.mxu0 %v6767_v61 }
0x13fe   : > { %v4598_v57 = vmul.f32 0.0078125, %v4590_v24  ;;  %v4613_v39 = vmul.f32 %v8787_v45, %v8787_v45  ;;  %v4612_v20 = vmul.f32 %v8790_v23, %v8790_v23  ;;  %5962 = vmatprep.subr.bf16.mxu0 %v6768_v48 }
0x1400   : > { %v8797_v34 = vsub.f32 %v8762_v62, %v4598_v57  ;;  %4627 = vadd.xlane.f32.xlu1 %v4613_v39  ;;  %4625 = vadd.xlane.f32.xlu0 %v4612_v20 }
0x1401   : > { %5963 = vmatpush3.bf16.msra.mxu0 %v6769_v49 }
0x1402   : > { %v4614_v55 = vmul.f32 %v8797_v34, %v8797_v34  ;;  %5964 = vmatprep.subr.bf16.mxu0 %v6770_v28 }
0x1404   : > { %4629 = vadd.xlane.f32.xlu0 %v4614_v55 }
0x1405   : > { %5965 = vmatpush3.bf16.msra.mxu0 %v6771_v50 }
0x1454   : > { %v4616_v8 = vpop.xlane.xlu1 %4615 }
0x1455   : > { %v4631_v11 = vmul.f32 0.0078125, %v4616_v8 }
0x1457   : > { %v4639_v62 = vadd.f32 1e-05, %v4631_v11 }
0x1458   : > { %v4620_v54 = vpop.xlane.xlu1 %4619  ;;  %v4618_v40 = vpop.xlane.xlu0 %4617 }
0x1459   : > { %6926 = vrsqrt.f32 %v4639_v62  ;;  %v4633_v32 = vmul.f32 0.0078125, %v4620_v54  ;;  %v4632_v63 = vmul.f32 0.0078125, %v4618_v40  ;;  %v6772_v62 = vld [vmem:[#allocation26 + $0x50] sm:$0xff]   ;;  %v6775_v40 = vld [vmem:[#allocation26 + $0x8] sm:$0xff]  }
0x145a   : > { %v6773_v54 = vld [vmem:[#allocation26 + $0x10] sm:$0xff]   ;;  %5966 = vmatprep.subr.bf16.mxu0 %v6772_v62 }
0x145b   : > { %v4640_v31 = vadd.f32 1e-05, %v4632_v63  ;;  %v4641_v6 = vadd.f32 1e-05, %v4633_v32  ;;  %5967 = vmatpush3.bf16.msra.mxu0 %v6773_v54  ;;  %v6776_v32 = vld [vmem:[#allocation26 + $0x40] sm:$0xff]  }
0x145c   : > { %v4622_v10 = vpop.xlane.xlu0 %4621  ;;  %v6777_v63 = vld [vmem:[#allocation26] sm:$0xff]  }
0x145d   : > { %v4634_v3 = vmul.f32 0.0078125, %v4622_v10  ;;  %6928 = vrsqrt.f32 %v4640_v31 }
0x145e   : > { %6930 = vrsqrt.f32 %v4641_v6 }
0x145f   : > { %v4642_v36 = vadd.f32 1e-05, %v4634_v3 }
0x1461   : > { %6932 = vrsqrt.f32 %v4642_v36 }
0x1466   : > { %v6927_v27 = vpop.eup %6926 }
0x1467   : > { %v4655_v1 = vmul.f32 %v6927_v27, %v8765_v7 }
0x1469   : > { %v4669_v18 = vmul.f32 %v5769_v29, %v4655_v1 }
0x146a   : > { %v6929_v5 = vpop.eup %6928 }
0x146b   : > { %v4656_v12 = vmul.f32 %v6929_v5, %v8769_v2  ;;  %v6931_v51 = vpop.eup %6930  ;;  %v8806_v59 = vadd.f32 %v5770_v13, %v4669_v18 }
0x146c   : > { %v4657_v30 = vmul.f32 %v6931_v51, %v8771_v15 }
0x146d   : > { %v4670_v38 = vmul.f32 %v5769_v29, %v4656_v12 }
0x146e   : > { %v6933_v4 = vpop.eup %6932  ;;  %v4671_v56 = vmul.f32 %v5769_v29, %v4657_v30 }
0x146f   : > { %v4658_v25 = vmul.f32 %v6933_v4, %v8777_v52  ;;  %v8808_v58 = vadd.f32 %v5770_v13, %v4670_v38 }
0x1470   : > { %v8816_v22 = vadd.f32 %v5770_v13, %v4671_v56 }
0x1471   : > { %v4741_v7 = vpack.c.bf16 %v8808_v58, %v8806_v59  ;;  %v4672_v53 = vmul.f32 %v5769_v29, %v4658_v25 }
0x1473   : > { %4869 = vmatmul.mubr.bf16.vlgmr.msra.gmra.mxu1 %v4741_v7  ;;  %v8814_v2 = vadd.f32 %v5770_v13, %v4672_v53 }
0x1474   : > { %4878 = vmatprep.mubr.bf16.mxu1 %v7545_v0 }
0x1475   : > { %v4742_v52 = vpack.c.bf16 %v8814_v2, %v8816_v22 }
0x147b   : > { %4879 = vmatmul.mubr.bf16.gmra.mxu1 %v4742_v52 }
0x147c   : > { %4888 = vmatprep.mubr.bf16.mxu1 %v7545_v0 }
0x1485   : > { %v4624_v17 = vpop.xlane.xlu1 %4623 }
0x1486   : > { %v4635_v15 = vmul.f32 0.0078125, %v4624_v17 }
0x1488   : > { %v4643_v21 = vadd.f32 1e-05, %v4635_v15 }
0x1489   : > { %v4628_v33 = vpop.xlane.xlu1 %4627  ;;  %v4626_v19 = vpop.xlane.xlu0 %4625 }
0x148a   : > { %6934 = vrsqrt.f32 %v4643_v21  ;;  %v4637_v41 = vmul.f32 0.0078125, %v4628_v33  ;;  %v4636_v60 = vmul.f32 0.0078125, %v4626_v19 }
0x148c   : > { %v4644_v26 = vadd.f32 1e-05, %v4636_v60  ;;  %v4645_v44 = vadd.f32 1e-05, %v4637_v41 }
0x148d   : > { %v4630_v46 = vpop.xlane.xlu0 %4629 }
0x148e   : > { %v4638_v24 = vmul.f32 0.0078125, %v4630_v46  ;;  %6936 = vrsqrt.f32 %v4644_v26 }
0x148f   : > { %6938 = vrsqrt.f32 %v4645_v44 }
0x1490   : > { %v4646_v57 = vadd.f32 1e-05, %v4638_v24 }
0x1492   : > { %6940 = vrsqrt.f32 %v4646_v57 }
0x1497   : > { %v6935_v39 = vpop.eup %6934 }
0x1498   : > { %v4659_v20 = vmul.f32 %v6935_v39, %v8782_v35 }
0x149a   : > { %v4673_v14 = vmul.f32 %v5769_v29, %v4659_v20 }
0x149b   : > { %v6937_v55 = vpop.eup %6936 }
0x149c   : > { %v4660_v37 = vmul.f32 %v6937_v55, %v8790_v23  ;;  %v6939_v47 = vpop.eup %6938  ;;  %v8824_v48 = vadd.f32 %v5770_v13, %v4673_v14 }
0x149d   : > { %v4661_v28 = vmul.f32 %v6939_v47, %v8787_v45  ;;  %v6774_v45 = vld [vmem:[#allocation26 + $0x48] sm:$0xff]  }
0x149e   : > { %v4674_v43 = vmul.f32 %v5769_v29, %v4660_v37  ;;  %5968 = vmatprep.subr.bf16.mxu0 %v6774_v45 }
0x149f   : > { %v6941_v16 = vpop.eup %6940  ;;  %v4675_v35 = vmul.f32 %v5769_v29, %v4661_v28  ;;  %5969 = vmatpush3.bf16.msra.mxu0 %v6775_v40 }
0x14a0   : > { %v4662_v61 = vmul.f32 %v6941_v16, %v8797_v34  ;;  %v8826_v49 = vadd.f32 %v5770_v13, %v4674_v43  ;;  %5970 = vmatprep.subr.bf16.mxu0 %v6776_v32 }
0x14a1   : > { %v8834_v11 = vadd.f32 %v5770_v13, %v4675_v35 }
0x14a2   : > { %v4743_v50 = vpack.c.bf16 %v8826_v49, %v8824_v48  ;;  %v4676_v8 = vmul.f32 %v5769_v29, %v4662_v61 }
0x14a3   : > { %5971 = vmatpush3.bf16.msra.mxu0 %v6777_v63 }
0x14a4   : > { %4889 = vmatmul.mubr.bf16.gmra.mxu1 %v4743_v50  ;;  %v8832_v23 = vadd.f32 %v5770_v13, %v4676_v8 }
0x14a5   : > { %4898 = vmatprep.mubr.bf16.mxu1 %v7545_v0  ;;  %v4707_v0 = vld [vmem:[%s9096_s23] sm:$0x3] }
0x14a6   : > { %v4744_v34 = vpack.c.bf16 %v8832_v23, %v8834_v11  ;;  %v4753_v6 = vrot.slane %v4707_v0, %v8135_v9  ;;  %v4749_v10 = vrot.slane %v4707_v0, %v8121_v42 }
0x14ac   : > { %4899 = vmatmul.mubr.bf16.gmra.mxu1 %v4744_v34 }
0x1533   : > { %v4870_v31 = vpop.f32.mrf.mxu1 }
0x1534   : > { %v4871_v29 = vadd.f32 %v4870_v31, %v4749_v10 }
0x1535   : > { %v4872_v3 = vpop.f32.mrf.mxu1 }
0x1536   : > { %v4873_v27 = vadd.f32 %v4872_v3, %v4753_v6  ;;  %v4909_v38 = vmax.f32 %v4871_v29, 0.0 }
0x1537   : > { %v4874_v36 = vpop.f32.mrf.mxu1 }
0x1538   : > { %v4875_v1 = vadd.f32 %v4874_v36, %v4749_v10  ;;  %v4910_v13 = vmax.f32 %v4873_v27, 0.0  ;;  %v5787_v27 = vld [vmem:[%s9097_s20] ss:$0 sm:$0xff] }
0x1539   : > { %v4876_v5 = vpop.f32.mrf.mxu1 }
0x153a   : > { %v4877_v12 = vadd.f32 %v4876_v5, %v4753_v6  ;;  %v4911_v18 = vmax.f32 %v4875_v1, 0.0  ;;  %v1323_v5 = vld [vmem:[%s8049_s8] sm:$0xff] }
0x153b   : > { %v4880_v51 = vpop.f32.mrf.mxu1 }
0x153c   : > { %v4912_v4 = vmax.f32 %v4877_v12, 0.0  ;;  %v4925_v7 = vpack.c.bf16 %v4911_v18, %v4909_v38  ;;  %v4881_v42 = vadd.f32 %v4880_v51, %v4749_v10 }
0x153d   : > { %v4882_v25 = vpop.f32.mrf.mxu1 }
0x153e   : > { %v4926_v30 = vpack.c.bf16 %v4912_v4, %v4910_v13  ;;  %v4883_v56 = vadd.f32 %v4882_v25, %v4753_v6  ;;  %v4913_v19 = vmax.f32 %v4881_v42, 0.0  ;;  %v1324_v13 = vld [vmem:[%s8049_s8 + $0x8] sm:$0xff] }
0x153f   : > { %v4884_v53 = vpop.f32.mrf.mxu1 }
0x1540   : > { %v4885_v9 = vadd.f32 %v4884_v53, %v4749_v10  ;;  %5067 = vmatprep.mubr.bf16.mxu0 %v4926_v30  ;;  %v4914_v21 = vmax.f32 %v4883_v56, 0.0  ;;  %v1325_v56 = vld [vmem:[%s8049_s8 + $0x10] sm:$0xff] }
0x1541   : > { %v4886_v52 = vpop.f32.mrf.mxu1  ;;  %5068 = vmatmul.mubr.bf16.vlgmr.msra.gmra.mxu0 %v4925_v7 }
0x1542   : > { %v4887_v17 = vadd.f32 %v4886_v52, %v4753_v6  ;;  %v4915_v15 = vmax.f32 %v4885_v9, 0.0 }
0x1544   : > { %v4916_v33 = vmax.f32 %v4887_v17, 0.0  ;;  %v4927_v60 = vpack.c.bf16 %v4915_v15, %v4913_v19 }
0x1546   : > { %v4928_v41 = vpack.c.bf16 %v4916_v33, %v4914_v21  ;;  %v1326_v33 = vld [vmem:[%s8049_s8 + $0x18] sm:$0xff] }
0x1548   : > { %5075 = vmatprep.mubr.bf16.mxu0 %v4928_v41 }
0x1549   : > { %5076 = vmatmul.mubr.bf16.gmra.mxu0 %v4927_v60 }
0x1564   : > { %v4890_v26 = vpop.f32.mrf.mxu1 }
0x1565   : > { %v4891_v39 = vadd.f32 %v4890_v26, %v4749_v10 }
0x1566   : > { %v4892_v44 = vpop.f32.mrf.mxu1 }
0x1567   : > { %v4893_v24 = vadd.f32 %v4892_v44, %v4753_v6  ;;  %v4917_v43 = vmax.f32 %v4891_v39, 0.0 }
0x1568   : > { %v4894_v46 = vpop.f32.mrf.mxu1 }
0x1569   : > { %v4895_v57 = vadd.f32 %v4894_v46, %v4749_v10  ;;  %v4918_v47 = vmax.f32 %v4893_v24, 0.0  ;;  %v1327_v24 = vld [vmem:[%s8049_s8 + $0x20] sm:$0xff] }
0x156a   : > { %v4896_v20 = vpop.f32.mrf.mxu1 }
0x156b   : > { %v4897_v55 = vadd.f32 %v4896_v20, %v4753_v6  ;;  %v4919_v37 = vmax.f32 %v4895_v57, 0.0 }
0x156c   : > { %v4900_v14 = vpop.f32.mrf.mxu1 }
0x156d   : > { %v4920_v16 = vmax.f32 %v4897_v55, 0.0  ;;  %v4929_v50 = vpack.c.bf16 %v4919_v37, %v4917_v43  ;;  %v4901_v62 = vadd.f32 %v4900_v14, %v4749_v10  ;;  %v1328_v37 = vld [vmem:[%s8049_s8 + $0x28] sm:$0xff] }
0x156e   : > { %v4902_v61 = vpop.f32.mrf.mxu1 }
0x156f   : > { %v4930_v28 = vpack.c.bf16 %v4920_v16, %v4918_v47  ;;  %v4903_v35 = vadd.f32 %v4902_v61, %v4753_v6  ;;  %v4921_v0 = vmax.f32 %v4901_v62, 0.0  ;;  %v1329_v61 = vld [vmem:[%s8049_s8 + $0x30] sm:$0xff] }
0x1570   : > { %v4904_v8 = vpop.f32.mrf.mxu1 }
0x1571   : > { %v4905_v34 = vadd.f32 %v4904_v8, %v4749_v10  ;;  %5083 = vmatprep.mubr.bf16.mxu0 %v4930_v28  ;;  %v4922_v32 = vmax.f32 %v4903_v35, 0.0 }
0x1572   : > { %v4906_v54 = vpop.f32.mrf.mxu1  ;;  %5084 = vmatmul.mubr.bf16.gmra.mxu0 %v4929_v50 }
0x1573   : > { %v4907_v45 = vadd.f32 %v4906_v54, %v4753_v6  ;;  %v4923_v40 = vmax.f32 %v4905_v34, 0.0  ;;  %v1330_v54 = vld [vmem:[%s8049_s8 + $0x38] sm:$0xff]  ;;  %s9098_s8 = sld [smem:[#allocation73_spill]] }
0x1575   : > { %v4924_v63 = vmax.f32 %v4907_v45, 0.0  ;;  %v4931_v3 = vpack.c.bf16 %v4923_v40, %v4921_v0 }
0x1577   : > { %v4932_v31 = vpack.c.bf16 %v4924_v63, %v4922_v32 }
0x1579   : > { %5091 = vmatprep.mubr.bf16.mxu0 %v4932_v31  ;;  %p9099_p10 = scmp.ne.s32.totalorder %s9098_s8, 0 }
0x157a   : > { %5092 = vmatmul.mubr.bf16.gmra.mxu0 %v4931_v3 }
0x157b   : > { %p7367_p0 = pnand %p7366_p12, %p9099_p10 }
0x157d   : > { %p7368_p2 = pneg %p7367_p0 }
0x157f   : > { %p7375_p13 = pnand %p7374_p11, %p7368_p2 }
0x1601   : > { %v5972_v36 = vpop.f32.mrf.mxu0 }
0x1603   : > { %v5973_v1 = vpop.f32.mrf.mxu0 }
0x1604   : > { %v5974_v29 = vadd.f32 %v5973_v1, %v5972_v36 }
0x1605   : > { %v5975_v10 = vpop.f32.mrf.mxu0 }
0x1606   : > { %v5070_v12 = vadd.f32 %v5974_v29, %v5787_v27 }
0x1607   : > { %v5976_v18 = vpop.f32.mrf.mxu0 }
0x1608   : > { %v5100_v51 = vadd.f32 %v5070_v12, %v1323_v5  ;;  %v5977_v6 = vadd.f32 %v5976_v18, %v5975_v10 }
0x1609   : > { %v5978_v4 = vpop.f32.mrf.mxu0 }
0x160a   : > { %v5073_v38 = vadd.f32 %v5977_v6, %v5787_v27  ;;  %v5108_v25 = vadd.f32 %v5100_v51, %v8806_v59 }
0x160b   : > { %v5979_v30 = vpop.f32.mrf.mxu0 }
0x160c   : > { %v5101_v7 = vadd.f32 %v5073_v38, %v1324_v13  ;;  %v5980_v53 = vadd.f32 %v5979_v30, %v5978_v4  ;;  %5118 = vadd.xlane.f32.xlu1 %v5108_v25 }
0x160d   : > { %v5981_v9 = vpop.f32.mrf.mxu0 }
0x160e   : > { %v5078_v42 = vadd.f32 %v5980_v53, %v5787_v27  ;;  %v5109_v52 = vadd.f32 %v5101_v7, %v8808_v58 }
0x160f   : > { %v5982_v17 = vpop.f32.mrf.mxu0 }
0x1610   : > { %v5102_v15 = vadd.f32 %v5078_v42, %v1325_v56  ;;  %v5983_v21 = vadd.f32 %v5982_v17, %v5981_v9  ;;  %5120 = vadd.xlane.f32.xlu0 %v5109_v52 }
0x1612   : > { %v5081_v19 = vadd.f32 %v5983_v21, %v5787_v27  ;;  %v5110_v41 = vadd.f32 %v5102_v15, %v8816_v22 }
0x1614   : > { %v5103_v59 = vadd.f32 %v5081_v19, %v1326_v33  ;;  %5122 = vadd.xlane.f32.xlu1 %v5110_v41 }
0x1616   : > { %v5111_v60 = vadd.f32 %v5103_v59, %v8814_v2 }
0x1618   : > { %5124 = vadd.xlane.f32.xlu0 %v5111_v60 }
0x1632   : > { %v5984_v26 = vpop.f32.mrf.mxu0 }
0x1634   : > { %v5985_v44 = vpop.f32.mrf.mxu0 }
0x1635   : > { %v5986_v46 = vadd.f32 %v5985_v44, %v5984_v26 }
0x1636   : > { %v5987_v58 = vpop.f32.mrf.mxu0 }
0x1637   : > { %v5086_v57 = vadd.f32 %v5986_v46, %v5787_v27 }
0x1638   : > { %v5988_v39 = vpop.f32.mrf.mxu0 }
0x1639   : > { %v5104_v20 = vadd.f32 %v5086_v57, %v1327_v24  ;;  %v5989_v55 = vadd.f32 %v5988_v39, %v5987_v58 }
0x163a   : > { %v5990_v14 = vpop.f32.mrf.mxu0 }
0x163b   : > { %v5089_v47 = vadd.f32 %v5989_v55, %v5787_v27  ;;  %v5112_v22 = vadd.f32 %v5104_v20, %v8824_v48 }
0x163c   : > { %v5991_v16 = vpop.f32.mrf.mxu0 }
0x163d   : > { %v5105_v43 = vadd.f32 %v5089_v47, %v1328_v37  ;;  %v5992_v2 = vadd.f32 %v5991_v16, %v5990_v14  ;;  %5126 = vadd.xlane.f32.xlu1 %v5112_v22 }
0x163e   : > { %v5993_v28 = vpop.f32.mrf.mxu0 }
0x163f   : > { %v5094_v50 = vadd.f32 %v5992_v2, %v5787_v27  ;;  %v5113_v8 = vadd.f32 %v5105_v43, %v8826_v49 }
0x1640   : > { %v5994_v35 = vpop.f32.mrf.mxu0 }
0x1641   : > { %v5106_v34 = vadd.f32 %v5094_v50, %v1329_v61  ;;  %v5995_v62 = vadd.f32 %v5994_v35, %v5993_v28  ;;  %5128 = vadd.xlane.f32.xlu0 %v5113_v8 }
0x1643   : > { %v5097_v45 = vadd.f32 %v5995_v62, %v5787_v27  ;;  %v5114_v40 = vadd.f32 %v5106_v34, %v8834_v11 }
0x1645   : > { %v5107_v32 = vadd.f32 %v5097_v45, %v1330_v54  ;;  %5130 = vadd.xlane.f32.xlu1 %v5114_v40 }
0x1647   : > { %v5115_v48 = vadd.f32 %v5107_v32, %v8832_v23 }
0x1649   : > { %5132 = vadd.xlane.f32.xlu0 %v5115_v48 }
0x1695   : > { %v5119_v63 = vpop.xlane.xlu1 %5118 }
0x1696   : > { %v5134_v0 = vmul.f32 0.0078125, %v5119_v63 }
0x1698   : > { %v8858_v31 = vsub.f32 %v5108_v25, %v5134_v0 }
0x1699   : > { %v5121_v3 = vpop.xlane.xlu0 %5120 }
0x169a   : > { %v5135_v36 = vmul.f32 0.0078125, %v5121_v3  ;;  %v5150_v49 = vmul.f32 %v8858_v31, %v8858_v31 }
0x169c   : > { %v8862_v1 = vsub.f32 %v5109_v52, %v5135_v36  ;;  %5158 = vadd.xlane.f32.xlu1 %v5150_v49 }
0x169d   : > { %v5123_v27 = vpop.xlane.xlu1 %5122 }
0x169e   : > { %v5136_v29 = vmul.f32 0.0078125, %v5123_v27  ;;  %v5151_v11 = vmul.f32 %v8862_v1, %v8862_v1 }
0x16a0   : > { %v8866_v5 = vsub.f32 %v5110_v41, %v5136_v29  ;;  %5160 = vadd.xlane.f32.xlu0 %v5151_v11 }
0x16a1   : > { %v5125_v23 = vpop.xlane.xlu0 %5124 }
0x16a2   : > { %v5137_v10 = vmul.f32 0.0078125, %v5125_v23  ;;  %v5152_v12 = vmul.f32 %v8866_v5, %v8866_v5 }
0x16a4   : > { %v8870_v18 = vsub.f32 %v5111_v60, %v5137_v10  ;;  %5162 = vadd.xlane.f32.xlu1 %v5152_v12 }
0x16a6   : > { %v5153_v51 = vmul.f32 %v8870_v18, %v8870_v18 }
0x16a8   : > { %5164 = vadd.xlane.f32.xlu0 %v5153_v51 }
0x16c6   : > { %v5127_v6 = vpop.xlane.xlu1 %5126 }
0x16c7   : > { %v5138_v13 = vmul.f32 0.0078125, %v5127_v6 }
0x16c9   : > { %v8874_v4 = vsub.f32 %v5112_v22, %v5138_v13 }
0x16ca   : > { %v5129_v38 = vpop.xlane.xlu0 %5128 }
0x16cb   : > { %v5139_v25 = vmul.f32 0.0078125, %v5129_v38  ;;  %v5154_v30 = vmul.f32 %v8874_v4, %v8874_v4 }
0x16cd   : > { %v8878_v7 = vsub.f32 %v5113_v8, %v5139_v25  ;;  %5166 = vadd.xlane.f32.xlu1 %v5154_v30 }
0x16ce   : > { %v5131_v53 = vpop.xlane.xlu1 %5130 }
0x16cf   : > { %v5140_v56 = vmul.f32 0.0078125, %v5131_v53  ;;  %v5155_v9 = vmul.f32 %v8878_v7, %v8878_v7 }
0x16d1   : > { %v8882_v42 = vsub.f32 %v5114_v40, %v5140_v56  ;;  %5168 = vadd.xlane.f32.xlu0 %v5155_v9 }
0x16d2   : > { %v5133_v52 = vpop.xlane.xlu0 %5132 }
0x16d3   : > { %v5141_v17 = vmul.f32 0.0078125, %v5133_v52  ;;  %v5156_v15 = vmul.f32 %v8882_v42, %v8882_v42 }
0x16d5   : > { %v8886_v21 = vsub.f32 %v5115_v48, %v5141_v17  ;;  %5170 = vadd.xlane.f32.xlu1 %v5156_v15 }
0x16d7   : > { %v5157_v33 = vmul.f32 %v8886_v21, %v8886_v21 }
0x16d9   : > { %5172 = vadd.xlane.f32.xlu0 %v5157_v33 }
0x16da   : > { %7378 = shalt.err (!%p7375_p13)
}
0x16db   : > { %s7379_s15 = scalar_lea.hbm %s5275_s19, 128  ;;  %s7383_s2 = scalar_lea.hbm %s7728_s4, 256 }
0x16dc   : > { %p7380_p3 = scmp.ne.s32.totalorder %s5275_s19, %s7379_s15  ;;  %p7384_p4 = scmp.lt.s32.totalorder %s5275_s19, %s7728_s4 }
0x16dd   : > { %p7385_p5 = scmp.lt.s32.totalorder %s7383_s2, %s7379_s15 }
0x16de   : > { %p7381_p6 = pnand %p7380_p3, %p9099_p10 }
0x16df   : > { %p7386_p9 = por %p7385_p5, %p7384_p4 }
0x16e0   : > { %p7382_p7 = pneg %p7381_p6 }
0x16e2   : > { %p7387_p12 = pnand %p7386_p9, %p7382_p7 }
0x16e4   : > { %7390 = shalt.err (!%p7387_p12)
}
0x16e5   : > { %6309 = dma.vmem_to_hbm [thread:$0]  (%p9099_p10), %s5278_s28, 128, %s5275_s19, %s5248_s5  }
0x16e6   : > { %s9100_s22 = sld [smem:[#allocation66_spill]]  ;;  %s8908_s25 = scalar_lea.vmem [#allocation27], %s8028_s1 }
0x16e7   : > { %s9101_s7 = sld [smem:[#allocation67_spill]]  ;;  %s5815_s3 = sshll.u32 %s7751_s18, 10 }
0x16e8   : > { %s9102_s1 = sld [smem:[#allocation68_spill]]  ;;  %s5261_s6 = sshll.u32 %s8908_s25, 4  ;;  %s8928_s6 = int_to_ptr.vmem [resolvable:$true] %s5261_s6 }
0x16e9   : > { %s5243_s23 = scalar_lea.sflag [#allocation5], %s8025_s21  ;;  %s7391_s20 = scalar_lea.vmem %s8928_s6, 1024 }
0x16ea   : > { %p7392_p0 = scmp.ne.s32.totalorder %s8928_s6, %s7391_s20  ;;  %s7552_s0 = smov [#allocation27]  }
0x16eb   : > { %s7395_s18 = sshll.u32 %s7552_s0, 4  ;;  %s7396_s18 = int_to_ptr.vmem [resolvable:$false] %s7395_s18 }
0x16ec   : > { %v5804_v37 = vld [vmem:[%s9100_s22] ss:$0 sm:$0xff]  ;;  %p7393_p2 = pnand %p7392_p0, %p9099_p10  ;;  %s7397_s28 = scalar_lea.vmem %s7396_s18, 2048 }
0x16ed   : > { %v5805_v47 = vld [vmem:[%s9101_s7] ss:$0 sm:$0xff]  ;;  %p7398_p1 = scmp.lt.s32.totalorder %s8928_s6, %s7396_s18  ;;  %p7399_p11 = scmp.lt.s32.totalorder %s7397_s28, %s7391_s20 }
0x16ee   : > { %s8926_s12 = scalar_lea.hbm %s9102_s1, %s5815_s3  ;;  %p7394_p8 = pneg %p7393_p2 }
0x16ef   : > { %p7400_p13 = por %p7399_p11, %p7398_p1 }
0x16f1   : > { %p7401_p3 = pnand %p7400_p13, %p7394_p8 }
0x1725   : > { %v5159_v19 = vpop.xlane.xlu1 %5158 }
0x1726   : > { %v5174_v41 = vmul.f32 0.0078125, %v5159_v19 }
0x1728   : > { %v5182_v59 = vadd.f32 1e-05, %v5174_v41 }
0x1729   : > { %v5161_v60 = vpop.xlane.xlu0 %5160 }
0x172a   : > { %6942 = vrsqrt.f32 %v5182_v59  ;;  %v5175_v26 = vmul.f32 0.0078125, %v5161_v60 }
0x172c   : > { %v5183_v44 = vadd.f32 1e-05, %v5175_v26 }
0x172d   : > { %v5163_v46 = vpop.xlane.xlu1 %5162 }
0x172e   : > { %6944 = vrsqrt.f32 %v5183_v44  ;;  %v5176_v24 = vmul.f32 0.0078125, %v5163_v46 }
0x1730   : > { %v5184_v58 = vadd.f32 1e-05, %v5176_v24 }
0x1731   : > { %v5165_v57 = vpop.xlane.xlu0 %5164 }
0x1732   : > { %6946 = vrsqrt.f32 %v5184_v58  ;;  %v5177_v39 = vmul.f32 0.0078125, %v5165_v57 }
0x1734   : > { %v5185_v20 = vadd.f32 1e-05, %v5177_v39 }
0x1736   : > { %6948 = vrsqrt.f32 %v5185_v20 }
0x1737   : > { %v6943_v55 = vpop.eup %6942 }
0x1738   : > { %v5198_v14 = vmul.f32 %v6943_v55, %v8858_v31 }
0x173a   : > { %v5212_v22 = vmul.f32 %v5804_v37, %v5198_v14 }
0x173b   : > { %v6945_v16 = vpop.eup %6944 }
0x173c   : > { %v5226_v43 = vadd.f32 %v5805_v47, %v5212_v22  ;;  %v5199_v2 = vmul.f32 %v6945_v16, %v8862_v1 }
0x173e   : > { %5234 = vst [vmem:[%s8908_s25] sm:$0xff] %v5226_v43  ;;  %v5213_v61 = vmul.f32 %v5804_v37, %v5199_v2 }
0x173f   : > { %v6947_v28 = vpop.eup %6946 }
0x1740   : > { %v5227_v50 = vadd.f32 %v5805_v47, %v5213_v61  ;;  %v5200_v8 = vmul.f32 %v6947_v28, %v8866_v5 }
0x1742   : > { %5235 = vst [vmem:[%s8908_s25 + $0x8] sm:$0xff] %v5227_v50  ;;  %v5214_v35 = vmul.f32 %v5804_v37, %v5200_v8 }
0x1743   : > { %v6949_v34 = vpop.eup %6948 }
0x1744   : > { %v5228_v62 = vadd.f32 %v5805_v47, %v5214_v35  ;;  %v5201_v54 = vmul.f32 %v6949_v34, %v8870_v18 }
0x1746   : > { %5236 = vst [vmem:[%s8908_s25 + $0x10] sm:$0xff] %v5228_v62  ;;  %v5215_v45 = vmul.f32 %v5804_v37, %v5201_v54 }
0x1748   : > { %v5229_v40 = vadd.f32 %v5805_v47, %v5215_v45 }
0x174a   : > { %5237 = vst [vmem:[%s8908_s25 + $0x18] sm:$0xff] %v5229_v40 }
0x1756   : > { %v5167_v32 = vpop.xlane.xlu1 %5166 }
0x1757   : > { %v5178_v48 = vmul.f32 0.0078125, %v5167_v32 }
0x1759   : > { %v5186_v63 = vadd.f32 1e-05, %v5178_v48 }
0x175a   : > { %v5169_v0 = vpop.xlane.xlu0 %5168 }
0x175b   : > { %6950 = vrsqrt.f32 %v5186_v63  ;;  %v5179_v31 = vmul.f32 0.0078125, %v5169_v0 }
0x175d   : > { %v5187_v3 = vadd.f32 1e-05, %v5179_v31 }
0x175e   : > { %v5171_v36 = vpop.xlane.xlu1 %5170 }
0x175f   : > { %6952 = vrsqrt.f32 %v5187_v3  ;;  %v5180_v49 = vmul.f32 0.0078125, %v5171_v36 }
0x1761   : > { %v5188_v1 = vadd.f32 1e-05, %v5180_v49 }
0x1762   : > { %v5173_v27 = vpop.xlane.xlu0 %5172 }
0x1763   : > { %6954 = vrsqrt.f32 %v5188_v1  ;;  %v5181_v29 = vmul.f32 0.0078125, %v5173_v27 }
0x1765   : > { %v5189_v11 = vadd.f32 1e-05, %v5181_v29 }
0x1767   : > { %6956 = vrsqrt.f32 %v5189_v11 }
0x1768   : > { %v6951_v5 = vpop.eup %6950 }
0x1769   : > { %v5202_v23 = vmul.f32 %v6951_v5, %v8874_v4 }
0x176b   : > { %v5216_v10 = vmul.f32 %v5804_v37, %v5202_v23 }
0x176c   : > { %v6953_v12 = vpop.eup %6952 }
0x176d   : > { %v5230_v18 = vadd.f32 %v5805_v47, %v5216_v10  ;;  %v5203_v51 = vmul.f32 %v6953_v12, %v8878_v7 }
0x176f   : > { %5238 = vst [vmem:[%s8908_s25 + $0x20] sm:$0xff] %v5230_v18  ;;  %v5217_v6 = vmul.f32 %v5804_v37, %v5203_v51 }
0x1770   : > { %v6955_v13 = vpop.eup %6954 }
0x1771   : > { %v5231_v38 = vadd.f32 %v5805_v47, %v5217_v6  ;;  %v5204_v25 = vmul.f32 %v6955_v13, %v8882_v42 }
0x1773   : > { %5239 = vst [vmem:[%s8908_s25 + $0x28] sm:$0xff] %v5231_v38  ;;  %v5218_v30 = vmul.f32 %v5804_v37, %v5204_v25 }
0x1774   : > { %v6957_v4 = vpop.eup %6956 }
0x1775   : > { %v5232_v53 = vadd.f32 %v5805_v47, %v5218_v30  ;;  %v5205_v56 = vmul.f32 %v6957_v4, %v8886_v21 }
0x1777   : > { %5240 = vst [vmem:[%s8908_s25 + $0x30] sm:$0xff] %v5232_v53  ;;  %v5219_v9 = vmul.f32 %v5804_v37, %v5205_v56 }
0x1779   : > { %v5233_v7 = vadd.f32 %v5805_v47, %v5219_v9 }
0x177b   : > { %5241 = vst [vmem:[%s8908_s25 + $0x38] sm:$0xff] %v5233_v7 }
0x177c   : > { %7404 = shalt.err (!%p7401_p3)
}
0x177d   : > { %s7405_s19 = scalar_lea.hbm %s8926_s12, 1024  ;;  %s7409_s5 = scalar_lea.hbm %s9102_s1, 2048 }
0x177e   : > { %p7406_p6 = scmp.ne.s32.totalorder %s8926_s12, %s7405_s19  ;;  %p7410_p5 = scmp.lt.s32.totalorder %s8926_s12, %s9102_s1 }
0x177f   : > { %p7411_p9 = scmp.lt.s32.totalorder %s7409_s5, %s7405_s19 }
0x1780   : > { %p7407_p7 = pnand %p7406_p6, %p9099_p10 }
0x1781   : > { %p7412_p12 = por %p7411_p9, %p7410_p5 }
0x1782   : > { %p7408_p4 = pneg %p7407_p7 }
0x1784   : > { %p7413_p0 = pnand %p7412_p12, %p7408_p4 }
0x1786   : > { %7416 = shalt.err (!%p7413_p0)
}
0x1787   : > { %s7553_s29 = smov 128   ;;  %s7554_s17 = smov 8  }
0x1788   : > { %6308 = dma.vmem_to_hbm [thread:$0]  (%p9099_p10), %s8928_s6, 1024, %s8926_s12, %s5243_s23, %s7553_s29, %s7553_s29, %s7554_s17  }
0x1789 PF: > { %s9103_s26 = sld [smem:[#allocation69_spill]]  ;;  %p9106_p8 = scmp.ge.s32.totalorder %s7491_s11, 2 }
0x178a   : > { %s9104_s16 = sld [smem:[#allocation74_spill]] }
0x178f   : > { %s5289_s15 = sand.u32 1, %s9103_s26  }
0x1790   : > { %p9105_p2 = scmp.ne.s32.totalorder %s9104_s16, 0  ;;  %s5290_s2 = scalar_lea.sflag [#allocation5], %s5289_s15 }
0x1792   : > { %p6360_p1 = pnand %p9106_p8, %p9105_p2 }
0x1794   : > { %p6361_p11 = pneg %p6360_p1 }
0x1796   : > { %7470 = dma.done.wait (%p6361_p11), %s5290_s2, 1024  }
0x1797   : > { %7472 = vsyncadd (%p6361_p11), %s5290_s2, 4294966272  ;;  %s5299_s22 = scalar_lea.sflag [#allocation29], %s5289_s15 }
0x1798   : > { %7474 = dma.done.wait (%p6361_p11), %s5299_s22, 128  }
0x1799   : > { %7476 = vsyncadd (%p6361_p11), %s5299_s22, 4294967168  ;;  %s9107_s11 = sld [smem:[#allocation71_spill]]  ;;  %s9110_s7 = smov %s7483_s10 }
0x179a   : > { %s9108_s8 = sld [smem:[#allocation70_spill]] }
0x179b   : > { %s9109_s0 = sld [smem:[#allocation72_spill]] }
0x179f   : > { %p95_p10 = scmp.ge.s32.totalorder %s9107_s11, 4  }
0x17a0   : > { %s9111_s10 = smov %s9108_s8 }
0x17a1   :  { %97 = sbr.rel (!%p95_p10) target bundleno = 82 (0x52), region = 324 }
0x17a6   :  { %5304 = vsyncpa [#allocation4], 1 }
0x17a7   :  { %5306 = vsyncpa [#allocation4 + $0x1], 1 }
0x17a8   :  { %5307 = vsyncpa [#allocation7], 1 }
0x17a9   :  { %5309 = vsyncpa [#allocation7 + $0x1], 1 }
0x17aa   :  { %5310 = vsyncpa [#allocation10], 1 }
0x17ab   :  { %5312 = vsyncpa [#allocation10 + $0x1], 1 }
0x17ac   :  { %5313 = vsyncpa [#allocation13], 1 }
0x17ad   :  { %5314 = vsyncpa [#allocation16], 1 }
0x17ae   :  { %5315 = vsyncpa [#allocation19], 1 }
0x17af   :  { %5316 = vsyncpa [#allocation22], 1 }
0x17b0   :  { %5317 = vsyncpa [#allocation25], 1 }
0x17b1   :  { %5318 = vsyncpa [#allocation5], 1 }
0x17b2   :  { %5320 = vsyncpa [#allocation5 + $0x1], 1 }
0x17b3   :  { %5321 = vsyncpa [#allocation29], 1 }
0x17b4   :  { %5323 = vsyncpa [#allocation29 + $0x1], 1 }

</bundles_post_ra>
